<compile_context>
chip_gen: v5e
topology: v5e:2x2
jax: 0.10.0
libtpu: 0.0.40
codegen_flags: <defaults>
</compile_context>

<pallas_src>
import jax
import jax.numpy as jnp
from jax.experimental import pallas as pl
from jax.experimental.pallas import tpu as pltpu

# ----------------- configuration (mirrors HexPlane.__init__) -----------------
LABEL_N_COMP = (8, 8, 8)        # cfg.model.label_n_comp
DEFORM_N_COMP = 8               # cfg.model.deform_n_comp
LABEL_DIM = 8                   # cfg.model.max_part_num
DEFORM_DIM = 7 * LABEL_DIM
VOXEL_GRID = (16, 16, 16)       # cfg.model.voxel_grid
TIME_GRID = 16                  # cfg.model.time_grid_init
ALIGN_CORNERS = True            # cfg.model.align_corners
INIT_SCALE = 0.1                # cfg.model.init_scale
INIT_SHIFT = 0.0                # cfg.model.init_shift
TAU = 0.1                       # cfg.optim.tau  (gumbel=False, hard=False, eval=False)
BOUNDS = 1.0
MAT_MODE = ((0, 1), (0, 2), (1, 2))

# derived sizes for the fused matmul (K layout: [plane0 | plane1 | plane2 | time])
_PLANE_HW = tuple(VOXEL_GRID[m1] * VOXEL_GRID[m0] for (m0, m1) in MAT_MODE) \
    + (TIME_GRID * TIME_GRID,)
K_TOTAL = sum(_PLANE_HW)                 # 1024
OUT_COLS = LABEL_DIM + DEFORM_DIM        # 64: [label(8) | qw qx qy qz tx ty tz (8 each)]
IN_PACK = 16                             # rows: [pts(3) | rot(4) | t_src | t_tgt | pad(7)]
OUT_PACK = 16                            # rows: [label(8) | pts(3) | rot(4) | pad(1)]

N_PTS = 256


# --------------------------------- Pallas kernel ------------------------------------
def hexplane_kernel(inp_ref, folded_ref, out_ref):
    P = LABEL_DIM
    f32 = jnp.float32
    x = inp_ref[...]                      # (IN_PACK, tile_n), points on lanes
    tile_n = x.shape[1]

    px, py, pz = x[0:1, :], x[1:2, :], x[2:3, :]
    rw, rx, ry, rz = x[3:4, :], x[4:5, :], x[5:6, :], x[6:7, :]
    tsrc, ttgt = x[7:8, :], x[8:9, :]

    # normalize_aabb with aabb = [[b,b,b], [-b,-b,-b]]
    xyz = (x[0:3, :] - BOUNDS) * (2.0 / (-2.0 * BOUNDS)) - 1.0     # (3, tile_n)

    # per-plane (cx indexes width w, cy indexes height h), all sizes 16x16 here
    plane_coords = [(xyz[m0:m0 + 1, :], xyz[m1:m1 + 1, :], VOXEL_GRID[m1], VOXEL_GRID[m0])
                    for (m0, m1) in MAT_MODE]
    plane_coords.append((tsrc, ttgt, TIME_GRID, TIME_GRID))

    # hoisted per distinct plane size: flat-row index decomposed into (coly, colx)
    grid_cache = {}

    def tent_block(cx, cy, h, w):
        """Separable bilinear ('tent') weights replicating F.grid_sample with
        padding_mode='zeros'.  Returns (h*w, tile_n) so folded_T @ block gives the
        sampled features for every point in the tile."""
        hw = h * w
        if (h, w) not in grid_cache:
            rowf = jax.lax.broadcasted_iota(jnp.int32, (hw, tile_n), 0).astype(f32)
            coly = jnp.floor(rowf * (1.0 / w))
            colx = rowf - coly * w
            grid_cache[(h, w)] = (colx, coly)
        colx, coly = grid_cache[(h, w)]
        if ALIGN_CORNERS:
            ix = (cx + 1.0) * (0.5 * (w - 1))
            iy = (cy + 1.0) * (0.5 * (h - 1))
        else:
            ix = ((cx + 1.0) * w - 1.0) * 0.5
            iy = ((cy + 1.0) * h - 1.0) * 0.5
        tx = jnp.maximum(1.0 - jnp.abs(ix - colx), 0.0)            # (hw, tile_n)
        ty = jnp.maximum(1.0 - jnp.abs(iy - coly), 0.0)            # (hw, tile_n)
        return tx * ty

    # ---- per-plane MXU matmuls accumulated into one (OUT_COLS, tile_n) register ----
    fused = None
    off = 0
    for cx, cy, h, w in plane_coords:
        hw = h * w
        wb = tent_block(cx, cy, h, w)                               # (hw, tile_n)
        part = jnp.dot(folded_ref[:, off:off + hw], wb,
                       preferred_element_type=f32)                  # (OUT_COLS, tile_n)
        fused = part if fused is None else fused + part
        off += hw

    # softmax(label_feat / tau)  (gumbel=False, eval=False branch); parts on sublanes
    lf = fused[0:P, :]                                              # (P, tile_n)
    z = lf * (1.0 / TAU)
    z = z - jnp.max(z, axis=0, keepdims=True)
    e = jnp.exp(z)
    denom = jnp.sum(e, axis=0, keepdims=True)                       # (1, tile_n)
    r = pl.reciprocal(denom, approx=True)
    r = r * (2.0 - denom * r)                                       # one Newton step
    label = e * r                                                   # (P, tile_n)

    # deform components (grouped by component, each P rows)
    qw = fused[P:2 * P, :]
    qx = fused[2 * P:3 * P, :]
    qy = fused[3 * P:4 * P, :]
    qz = fused[4 * P:5 * P, :]
    tx_ = fused[5 * P:6 * P, :]
    ty_ = fused[6 * P:7 * P, :]
    tz_ = fused[7 * P:8 * P, :]

    # F.normalize(quat, dim=-1), eps=1e-12  (rsqrt -> EUP), folded with label weights
    nsq = qw * qw + qx * qx + qy * qy + qz * qz
    inv = jax.lax.rsqrt(jnp.maximum(nsq, 1e-24))
    wq = label * inv
    Qw = jnp.sum(qw * wq, axis=0, keepdims=True)                    # (1, tile_n)
    Qx = jnp.sum(qx * wq, axis=0, keepdims=True)
    Qy = jnp.sum(qy * wq, axis=0, keepdims=True)
    Qz = jnp.sum(qz * wq, axis=0, keepdims=True)
    Tx = jnp.sum(tx_ * label, axis=0, keepdims=True)
    Ty = jnp.sum(ty_ * label, axis=0, keepdims=True)
    Tz = jnp.sum(tz_ * label, axis=0, keepdims=True)

    # pytorch3d quaternion_apply(Q, pts) + T   (real-part-first)
    mw = -Qx * px - Qy * py - Qz * pz
    mx = Qw * px + Qy * pz - Qz * py
    my = Qw * py - Qx * pz + Qz * px
    mz = Qw * pz + Qx * py - Qy * px
    ox = -mw * Qx + mx * Qw - my * Qz + mz * Qy
    oy = -mw * Qy + mx * Qz + my * Qw - mz * Qx
    oz = -mw * Qz - mx * Qy + my * Qx + mz * Qw

    # pytorch3d quaternion_multiply(Q, rot) = standardize(raw_multiply(Q, rot))
    nw = Qw * rw - Qx * rx - Qy * ry - Qz * rz
    nx = Qw * rx + Qx * rw + Qy * rz - Qz * ry
    ny = Qw * ry - Qx * rz + Qy * rw + Qz * rx
    nz = Qw * rz + Qx * ry - Qy * rx + Qz * rw
    sign = jnp.where(nw < 0.0, -1.0, 1.0)

    # single lane-dense store: rows [label(8) | pts(3) | rot(4) | pad(1)]
    out_ref[...] = jnp.concatenate(
        [label,
         ox + Tx, oy + Ty, oz + Tz,
         nw * sign, nx * sign, ny * sign, nz * sign,
         jnp.zeros((1, tile_n), f32)], axis=0)


# ------------------------------- plain-JAX glue --------------------------------------
def fold_params(params):
    """Parameter-only preprocessing, hoisted out of the per-forward path: fold the
    basis matrices into the flattened planes, stack along K, and transpose to the
    kernel's resident (OUT_COLS, K_TOTAL) LHS."""
    f32 = jnp.float32
    P = LABEL_DIM
    wl = params["label_basis_w"].T.astype(f32)            # (sum_comp, P)
    wd = params["deform_basis_w"].T.astype(f32)           # (Cd, 7P), col = part*7 + comp
    perm = jnp.asarray([p * 7 + c for c in range(7) for p in range(P)], jnp.int32)
    wd_perm = wd[:, perm]                                  # col = comp*P + part

    blocks = []
    off = 0
    for i in range(3):
        ci = LABEL_N_COMP[i]
        pflat = params["label_plane"][i][0].reshape(ci, -1).T            # (H*W, Ci)
        lab = pflat @ wl[off:off + ci, :]                                # (H*W, P)
        blocks.append(jnp.concatenate(
            [lab, jnp.zeros((pflat.shape[0], DEFORM_DIM), f32)], axis=1))
        off += ci
    ptime = params["deform_plane"][0].reshape(DEFORM_N_COMP, -1).T       # (T*T, Cd)
    dfm = ptime @ wd_perm                                                # (T*T, 7P)
    blocks.append(jnp.concatenate([jnp.zeros((ptime.shape[0], P), f32), dfm], axis=1))
    folded = jnp.concatenate(blocks, axis=0)                             # (K_TOTAL, OUT_COLS)
    assert folded.shape == (K_TOTAL, OUT_COLS)
    return folded.T                                                      # (OUT_COLS, K_TOTAL)


def _pick_tile(n):
    # Largest tile that still gives >=2 grid steps (v7x has 2 TensorCores); keep 128
    # as the floor for tiny problem sizes.
    for t in (1024, 512, 256, 128):
        if n >= 2 * t:
            return t
    return 128


def _hexplane_forward_impl(folded_t, rays_pts_emb, rotations_emb, t_src, t_tgt):
    pts = rays_pts_emb[:, :3].astype(jnp.float32)
    rot = rotations_emb[:, :4].astype(jnp.float32)
    n = pts.shape[0]
    tile_n = _pick_tile(n)
    n_pad = tile_n * pl.cdiv(n, tile_n)

    # lane-major packing: points on lanes, features on sublanes
    packed = jnp.concatenate(
        [pts.T, rot.T,
         t_src.reshape(1, n).astype(jnp.float32),
         t_tgt.reshape(1, n).astype(jnp.float32),
         jnp.zeros((IN_PACK - 9, n), jnp.float32)], axis=0)              # (IN_PACK, n)
    if n_pad != n:
        packed = jnp.pad(packed, ((0, 0), (0, n_pad - n)))

    out = pl.pallas_call(
        hexplane_kernel,
        out_shape=jax.ShapeDtypeStruct((OUT_PACK, n_pad), jnp.float32),
        grid=(n_pad // tile_n,),
        in_specs=[
            pl.BlockSpec((IN_PACK, tile_n), lambda i: (0, i)),
            pl.BlockSpec((OUT_COLS, K_TOTAL), lambda i: (0, 0)),   # resident folded planes
        ],
        out_specs=pl.BlockSpec((OUT_PACK, tile_n), lambda i: (0, i)),
        compiler_params=pltpu.CompilerParams(dimension_semantics=("parallel",)),
    )(packed, folded_t)

    label = out[0:LABEL_DIM, :n].T
    pts_out = out[LABEL_DIM:LABEL_DIM + 3, :n].T
    rot_out = out[LABEL_DIM + 3:LABEL_DIM + 7, :n].T
    return pts_out, rot_out, label


hexplane_forward = jax.jit(_hexplane_forward_impl)


def init_params(key):
    keys = jax.random.split(key, 6)
    label_plane = []
    for i, (m0, m1) in enumerate(MAT_MODE):
        H, W = VOXEL_GRID[m1], VOXEL_GRID[m0]
        label_plane.append(
            INIT_SCALE * jax.random.normal(keys[i], (1, LABEL_N_COMP[i], H, W), jnp.float32)
            + INIT_SHIFT)
    deform_plane = (INIT_SCALE
                    * jax.random.normal(keys[3], (1, DEFORM_N_COMP, TIME_GRID, TIME_GRID),
                                        jnp.float32) + INIT_SHIFT)
    sum_comp = sum(LABEL_N_COMP)
    b1 = 1.0 / float(sum_comp) ** 0.5
    b2 = 1.0 / float(DEFORM_N_COMP) ** 0.5
    # torch.nn.Linear(bias=False) weights, (out_features, in_features)
    label_basis_w = jax.random.uniform(keys[4], (LABEL_DIM, sum_comp), jnp.float32, -b1, b1)
    deform_basis_w = jax.random.uniform(keys[5], (DEFORM_DIM, DEFORM_N_COMP), jnp.float32, -b2, b2)
    return dict(label_plane=label_plane, deform_plane=deform_plane,
                label_basis_w=label_basis_w, deform_basis_w=deform_basis_w)


# -------------------- pure-JAX reference (same torch semantics) ----------------------
def grid_sample_weights(x, y, H, W, align_corners=True):
    x = x.astype(jnp.float32)
    y = y.astype(jnp.float32)
    if align_corners:
        ix = (x + 1.0) * 0.5 * (W - 1)
        iy = (y + 1.0) * 0.5 * (H - 1)
    else:
        ix = ((x + 1.0) * W - 1.0) * 0.5
        iy = ((y + 1.0) * H - 1.0) * 0.5
    x0 = jnp.floor(ix)
    y0 = jnp.floor(iy)
    x1 = x0 + 1.0
    y1 = y0 + 1.0
    wx1 = ix - x0
    wx0 = 1.0 - wx1
    wy1 = iy - y0
    wy0 = 1.0 - wy1
    out = jnp.zeros((x.shape[0], H * W), jnp.float32)
    corners = ((x0, y0, wx0 * wy0), (x1, y0, wx1 * wy0),
               (x0, y1, wx0 * wy1), (x1, y1, wx1 * wy1))
    for cx, cy, w in corners:
        xi = cx.astype(jnp.int32)
        yi = cy.astype(jnp.int32)
        valid = ((xi >= 0) & (xi < W) & (yi >= 0) & (yi < H)).astype(jnp.float32)
        flat = jnp.clip(yi, 0, H - 1) * W + jnp.clip(xi, 0, W - 1)
        out = out + jax.nn.one_hot(flat, H * W, dtype=jnp.float32) * (w * valid)[:, None]
    return out


def hexplane_forward_ref(params, rays_pts_emb, rotations_emb, t_src, t_tgt):
    pts = rays_pts_emb[:, :3]
    rot = rotations_emb[:, :4]
    N = pts.shape[0]
    xyz = (pts - BOUNDS) * (2.0 / (-2.0 * BOUNDS)) - 1.0

    feats = []
    for i, (m0, m1) in enumerate(MAT_MODE):
        H, W = VOXEL_GRID[m1], VOXEL_GRID[m0]
        ws = grid_sample_weights(xyz[:, m0], xyz[:, m1], H, W, ALIGN_CORNERS)
        pf = params["label_plane"][i][0].reshape(LABEL_N_COMP[i], -1)
        feats.append(ws @ pf.T)
    lf = jnp.concatenate(feats, axis=1) @ params["label_basis_w"].T
    label = jax.nn.softmax(lf / TAU, axis=-1)

    wt = grid_sample_weights(t_src.reshape(-1), t_tgt.reshape(-1),
                             TIME_GRID, TIME_GRID, ALIGN_CORNERS)
    tfeat = wt @ params["deform_plane"][0].reshape(DEFORM_N_COMP, -1).T
    deform = (tfeat @ params["deform_basis_w"].T).reshape(N, LABEL_DIM, 7)
    q = deform[..., 0:4]
    q = q / jnp.maximum(jnp.linalg.norm(q, axis=-1, keepdims=True), 1e-12)
    t = deform[..., 4:7]
    Q = jnp.sum(q * label[:, :, None], axis=1)
    T = jnp.sum(t * label[:, :, None], axis=1)

    def raw_mul(a, b):
        aw, ax, ay, az = a[..., 0], a[..., 1], a[..., 2], a[..., 3]
        bw, bx, by, bz = b[..., 0], b[..., 1], b[..., 2], b[..., 3]
        return jnp.stack([aw * bw - ax * bx - ay * by - az * bz,
                          aw * bx + ax * bw + ay * bz - az * by,
                          aw * by - ax * bz + ay * bw + az * bx,
                          aw * bz + ax * by - ay * bx + az * bw], axis=-1)

    pq = jnp.concatenate([jnp.zeros((N, 1), jnp.float32), pts], axis=-1)
    qinv = Q * jnp.asarray([1.0, -1.0, -1.0, -1.0], jnp.float32)
    pts_out = raw_mul(raw_mul(Q, pq), qinv)[..., 1:] + T
    ro = raw_mul(Q, rot)
    ro = jnp.where(ro[..., 0:1] < 0, -ro, ro)
    return pts_out, ro, label


if __name__ == "__main__":
    key = jax.random.PRNGKey(0)
    kp, k1, k2, k3, k4 = jax.random.split(key, 5)
    params = init_params(kp)
    folded_t = fold_params(params)   # parameter-only preprocessing, done once

    rays_pts_emb = jax.random.uniform(k1, (N_PTS, 6), jnp.float32, -1.0, 1.0)
    rotations_emb = jax.random.normal(k2, (N_PTS, 4), jnp.float32)
    time_feature_source = jax.random.uniform(k3, (N_PTS, 1), jnp.float32, -1.0, 1.0)
    time_feature_target = jax.random.uniform(k4, (N_PTS, 1), jnp.float32, -1.0, 1.0)

    out = hexplane_forward(folded_t, rays_pts_emb, rotations_emb,
                           time_feature_source, time_feature_target)
    out = jax.block_until_ready(out)

    ref = hexplane_forward_ref(params, rays_pts_emb, rotations_emb,
                               time_feature_source, time_feature_target)
    for o, r in zip(out, ref):
        assert o.shape == r.shape and o.dtype == r.dtype
        assert jnp.allclose(o, r, atol=1e-3, rtol=1e-3), "mismatch vs reference"

    print("KERNEL_OK")
</pallas_src>

<mosaic_0001>
module attributes {stable_mosaic.version = 11 : i64} {
  func.func @hexplane_kernel(%arg0: i32, %arg1: memref<16x128xf32, #tpu.memory_space<vmem>>, %arg2: memref<64x1024xf32, #tpu.memory_space<vmem>>, %arg3: memref<16x128xf32, #tpu.memory_space<vmem>>) attributes {dimension_semantics = [#tpu.dimension_semantics<parallel>], iteration_bounds = array<i64: 2>, scalar_prefetch = 0 : i64, scratch_operands = 0 : i64, tpu.core_type = #tpu.core_type<tc>, window_params = [{transform_indices = @transform_0, window_bounds = array<i64: 16, 128>}, {pipeline_mode = #tpu.pipeline_mode<synchronous>, transform_indices = @transform_1, window_bounds = array<i64: 64, 1024>}, {transform_indices = @transform_2, window_bounds = array<i64: 16, 128>}]} {
    %c0 = arith.constant 0 : index
    %c0_0 = arith.constant 0 : index
    %0 = vector.load %arg1[%c0, %c0_0] : memref<16x128xf32, #tpu.memory_space<vmem>>, vector<16x128xf32>
    %1 = vector.extract_strided_slice %0 {offsets = [0, 0], sizes = [1, 128], strides = [1, 1]} : vector<16x128xf32> to vector<1x128xf32>
    %2 = vector.extract_strided_slice %0 {offsets = [1, 0], sizes = [1, 128], strides = [1, 1]} : vector<16x128xf32> to vector<1x128xf32>
    %3 = vector.extract_strided_slice %0 {offsets = [2, 0], sizes = [1, 128], strides = [1, 1]} : vector<16x128xf32> to vector<1x128xf32>
    %4 = vector.extract_strided_slice %0 {offsets = [3, 0], sizes = [1, 128], strides = [1, 1]} : vector<16x128xf32> to vector<1x128xf32>
    %5 = vector.extract_strided_slice %0 {offsets = [4, 0], sizes = [1, 128], strides = [1, 1]} : vector<16x128xf32> to vector<1x128xf32>
    %6 = vector.extract_strided_slice %0 {offsets = [5, 0], sizes = [1, 128], strides = [1, 1]} : vector<16x128xf32> to vector<1x128xf32>
    %7 = vector.extract_strided_slice %0 {offsets = [6, 0], sizes = [1, 128], strides = [1, 1]} : vector<16x128xf32> to vector<1x128xf32>
    %8 = vector.extract_strided_slice %0 {offsets = [7, 0], sizes = [1, 128], strides = [1, 1]} : vector<16x128xf32> to vector<1x128xf32>
    %9 = vector.extract_strided_slice %0 {offsets = [8, 0], sizes = [1, 128], strides = [1, 1]} : vector<16x128xf32> to vector<1x128xf32>
    %10 = vector.extract_strided_slice %0 {offsets = [0, 0], sizes = [3, 128], strides = [1, 1]} : vector<16x128xf32> to vector<3x128xf32>
    %cst = arith.constant 1.000000e+00 : f32
    %11 = vector.broadcast %cst : f32 to vector<3x128xf32>
    %12 = arith.subf %10, %11 : vector<3x128xf32>
    %cst_1 = arith.constant -1.000000e+00 : f32
    %13 = vector.broadcast %cst_1 : f32 to vector<3x128xf32>
    %14 = arith.mulf %12, %13 : vector<3x128xf32>
    %cst_2 = arith.constant 1.000000e+00 : f32
    %15 = vector.broadcast %cst_2 : f32 to vector<3x128xf32>
    %16 = arith.subf %14, %15 : vector<3x128xf32>
    %17 = vector.extract_strided_slice %16 {offsets = [0, 0], sizes = [1, 128], strides = [1, 1]} : vector<3x128xf32> to vector<1x128xf32>
    %18 = vector.extract_strided_slice %16 {offsets = [1, 0], sizes = [1, 128], strides = [1, 1]} : vector<3x128xf32> to vector<1x128xf32>
    %19 = vector.extract_strided_slice %16 {offsets = [0, 0], sizes = [1, 128], strides = [1, 1]} : vector<3x128xf32> to vector<1x128xf32>
    %20 = vector.extract_strided_slice %16 {offsets = [2, 0], sizes = [1, 128], strides = [1, 1]} : vector<3x128xf32> to vector<1x128xf32>
    %21 = vector.extract_strided_slice %16 {offsets = [1, 0], sizes = [1, 128], strides = [1, 1]} : vector<3x128xf32> to vector<1x128xf32>
    %22 = vector.extract_strided_slice %16 {offsets = [2, 0], sizes = [1, 128], strides = [1, 1]} : vector<3x128xf32> to vector<1x128xf32>
    %23 = tpu.iota {dimensions = array<i32: 0>} : vector<256x128xi32>
    %24 = arith.sitofp %23 : vector<256x128xi32> to vector<256x128xf32>
    %cst_3 = arith.constant 6.250000e-02 : f32
    %25 = vector.broadcast %cst_3 : f32 to vector<256x128xf32>
    %26 = arith.mulf %24, %25 : vector<256x128xf32>
    %27 = math.floor %26 : vector<256x128xf32>
    %cst_4 = arith.constant 1.600000e+01 : f32
    %28 = vector.broadcast %cst_4 : f32 to vector<256x128xf32>
    %29 = arith.mulf %27, %28 : vector<256x128xf32>
    %30 = arith.subf %24, %29 : vector<256x128xf32>
    %cst_5 = arith.constant 1.000000e+00 : f32
    %31 = vector.broadcast %cst_5 : f32 to vector<1x128xf32>
    %32 = arith.addf %17, %31 : vector<1x128xf32>
    %cst_6 = arith.constant 7.500000e+00 : f32
    %33 = vector.broadcast %cst_6 : f32 to vector<1x128xf32>
    %34 = arith.mulf %32, %33 : vector<1x128xf32>
    %cst_7 = arith.constant 1.000000e+00 : f32
    %35 = vector.broadcast %cst_7 : f32 to vector<1x128xf32>
    %36 = arith.addf %18, %35 : vector<1x128xf32>
    %cst_8 = arith.constant 7.500000e+00 : f32
    %37 = vector.broadcast %cst_8 : f32 to vector<1x128xf32>
    %38 = arith.mulf %36, %37 : vector<1x128xf32>
    %39 = vector.broadcast %34 : vector<1x128xf32> to vector<256x128xf32>
    %40 = arith.subf %39, %30 : vector<256x128xf32>
    %41 = math.absf %40 : vector<256x128xf32>
    %cst_9 = arith.constant 1.000000e+00 : f32
    %42 = vector.broadcast %cst_9 : f32 to vector<256x128xf32>
    %43 = arith.subf %42, %41 : vector<256x128xf32>
    %cst_10 = arith.constant 0.000000e+00 : f32
    %44 = vector.broadcast %cst_10 : f32 to vector<256x128xf32>
    %45 = arith.maximumf %43, %44 : vector<256x128xf32>
    %46 = vector.broadcast %38 : vector<1x128xf32> to vector<256x128xf32>
    %47 = arith.subf %46, %27 : vector<256x128xf32>
    %48 = math.absf %47 : vector<256x128xf32>
    %cst_11 = arith.constant 1.000000e+00 : f32
    %49 = vector.broadcast %cst_11 : f32 to vector<256x128xf32>
    %50 = arith.subf %49, %48 : vector<256x128xf32>
    %cst_12 = arith.constant 0.000000e+00 : f32
    %51 = vector.broadcast %cst_12 : f32 to vector<256x128xf32>
    %52 = arith.maximumf %50, %51 : vector<256x128xf32>
    %53 = arith.mulf %45, %52 : vector<256x128xf32>
    %c0_13 = arith.constant 0 : index
    %c0_14 = arith.constant 0 : index
    %54 = vector.load %arg2[%c0_13, %c0_14] : memref<64x1024xf32, #tpu.memory_space<vmem>>, vector<64x256xf32>
    %cst_15 = arith.constant dense<0.000000e+00> : vector<64x128xf32>
    %55 = tpu.matmul %54, %53, %cst_15 {dimension_numbers = #tpu.dot_dimension_numbers<[1], [0], [0], [1], [0, 0, 1, 1], [], []>} : vector<64x256xf32>, vector<256x128xf32>, vector<64x128xf32> -> vector<64x128xf32>
    %cst_16 = arith.constant 1.000000e+00 : f32
    %56 = vector.broadcast %cst_16 : f32 to vector<1x128xf32>
    %57 = arith.addf %19, %56 : vector<1x128xf32>
    %cst_17 = arith.constant 7.500000e+00 : f32
    %58 = vector.broadcast %cst_17 : f32 to vector<1x128xf32>
    %59 = arith.mulf %57, %58 : vector<1x128xf32>
    %cst_18 = arith.constant 1.000000e+00 : f32
    %60 = vector.broadcast %cst_18 : f32 to vector<1x128xf32>
    %61 = arith.addf %20, %60 : vector<1x128xf32>
    %cst_19 = arith.constant 7.500000e+00 : f32
    %62 = vector.broadcast %cst_19 : f32 to vector<1x128xf32>
    %63 = arith.mulf %61, %62 : vector<1x128xf32>
    %64 = vector.broadcast %59 : vector<1x128xf32> to vector<256x128xf32>
    %65 = arith.subf %64, %30 : vector<256x128xf32>
    %66 = math.absf %65 : vector<256x128xf32>
    %cst_20 = arith.constant 1.000000e+00 : f32
    %67 = vector.broadcast %cst_20 : f32 to vector<256x128xf32>
    %68 = arith.subf %67, %66 : vector<256x128xf32>
    %cst_21 = arith.constant 0.000000e+00 : f32
    %69 = vector.broadcast %cst_21 : f32 to vector<256x128xf32>
    %70 = arith.maximumf %68, %69 : vector<256x128xf32>
    %71 = vector.broadcast %63 : vector<1x128xf32> to vector<256x128xf32>
    %72 = arith.subf %71, %27 : vector<256x128xf32>
    %73 = math.absf %72 : vector<256x128xf32>
    %cst_22 = arith.constant 1.000000e+00 : f32
    %74 = vector.broadcast %cst_22 : f32 to vector<256x128xf32>
    %75 = arith.subf %74, %73 : vector<256x128xf32>
    %cst_23 = arith.constant 0.000000e+00 : f32
    %76 = vector.broadcast %cst_23 : f32 to vector<256x128xf32>
    %77 = arith.maximumf %75, %76 : vector<256x128xf32>
    %78 = arith.mulf %70, %77 : vector<256x128xf32>
    %c0_24 = arith.constant 0 : index
    %c256 = arith.constant 256 : index
    %79 = vector.load %arg2[%c0_24, %c256] : memref<64x1024xf32, #tpu.memory_space<vmem>>, vector<64x256xf32>
    %cst_25 = arith.constant dense<0.000000e+00> : vector<64x128xf32>
    %80 = tpu.matmul %79, %78, %cst_25 {dimension_numbers = #tpu.dot_dimension_numbers<[1], [0], [0], [1], [0, 0, 1, 1], [], []>} : vector<64x256xf32>, vector<256x128xf32>, vector<64x128xf32> -> vector<64x128xf32>
    %81 = arith.addf %55, %80 : vector<64x128xf32>
    %cst_26 = arith.constant 1.000000e+00 : f32
    %82 = vector.broadcast %cst_26 : f32 to vector<1x128xf32>
    %83 = arith.addf %21, %82 : vector<1x128xf32>
    %cst_27 = arith.constant 7.500000e+00 : f32
    %84 = vector.broadcast %cst_27 : f32 to vector<1x128xf32>
    %85 = arith.mulf %83, %84 : vector<1x128xf32>
    %cst_28 = arith.constant 1.000000e+00 : f32
    %86 = vector.broadcast %cst_28 : f32 to vector<1x128xf32>
    %87 = arith.addf %22, %86 : vector<1x128xf32>
    %cst_29 = arith.constant 7.500000e+00 : f32
    %88 = vector.broadcast %cst_29 : f32 to vector<1x128xf32>
    %89 = arith.mulf %87, %88 : vector<1x128xf32>
    %90 = vector.broadcast %85 : vector<1x128xf32> to vector<256x128xf32>
    %91 = arith.subf %90, %30 : vector<256x128xf32>
    %92 = math.absf %91 : vector<256x128xf32>
    %cst_30 = arith.constant 1.000000e+00 : f32
    %93 = vector.broadcast %cst_30 : f32 to vector<256x128xf32>
    %94 = arith.subf %93, %92 : vector<256x128xf32>
    %cst_31 = arith.constant 0.000000e+00 : f32
    %95 = vector.broadcast %cst_31 : f32 to vector<256x128xf32>
    %96 = arith.maximumf %94, %95 : vector<256x128xf32>
    %97 = vector.broadcast %89 : vector<1x128xf32> to vector<256x128xf32>
    %98 = arith.subf %97, %27 : vector<256x128xf32>
    %99 = math.absf %98 : vector<256x128xf32>
    %cst_32 = arith.constant 1.000000e+00 : f32
    %100 = vector.broadcast %cst_32 : f32 to vector<256x128xf32>
    %101 = arith.subf %100, %99 : vector<256x128xf32>
    %cst_33 = arith.constant 0.000000e+00 : f32
    %102 = vector.broadcast %cst_33 : f32 to vector<256x128xf32>
    %103 = arith.maximumf %101, %102 : vector<256x128xf32>
    %104 = arith.mulf %96, %103 : vector<256x128xf32>
    %c0_34 = arith.constant 0 : index
    %c512 = arith.constant 512 : index
    %105 = vector.load %arg2[%c0_34, %c512] : memref<64x1024xf32, #tpu.memory_space<vmem>>, vector<64x256xf32>
    %cst_35 = arith.constant dense<0.000000e+00> : vector<64x128xf32>
    %106 = tpu.matmul %105, %104, %cst_35 {dimension_numbers = #tpu.dot_dimension_numbers<[1], [0], [0], [1], [0, 0, 1, 1], [], []>} : vector<64x256xf32>, vector<256x128xf32>, vector<64x128xf32> -> vector<64x128xf32>
    %107 = arith.addf %81, %106 : vector<64x128xf32>
    %cst_36 = arith.constant 1.000000e+00 : f32
    %108 = vector.broadcast %cst_36 : f32 to vector<1x128xf32>
    %109 = arith.addf %8, %108 : vector<1x128xf32>
    %cst_37 = arith.constant 7.500000e+00 : f32
    %110 = vector.broadcast %cst_37 : f32 to vector<1x128xf32>
    %111 = arith.mulf %109, %110 : vector<1x128xf32>
    %cst_38 = arith.constant 1.000000e+00 : f32
    %112 = vector.broadcast %cst_38 : f32 to vector<1x128xf32>
    %113 = arith.addf %9, %112 : vector<1x128xf32>
    %cst_39 = arith.constant 7.500000e+00 : f32
    %114 = vector.broadcast %cst_39 : f32 to vector<1x128xf32>
    %115 = arith.mulf %113, %114 : vector<1x128xf32>
    %116 = vector.broadcast %111 : vector<1x128xf32> to vector<256x128xf32>
    %117 = arith.subf %116, %30 : vector<256x128xf32>
    %118 = math.absf %117 : vector<256x128xf32>
    %cst_40 = arith.constant 1.000000e+00 : f32
    %119 = vector.broadcast %cst_40 : f32 to vector<256x128xf32>
    %120 = arith.subf %119, %118 : vector<256x128xf32>
    %cst_41 = arith.constant 0.000000e+00 : f32
    %121 = vector.broadcast %cst_41 : f32 to vector<256x128xf32>
    %122 = arith.maximumf %120, %121 : vector<256x128xf32>
    %123 = vector.broadcast %115 : vector<1x128xf32> to vector<256x128xf32>
    %124 = arith.subf %123, %27 : vector<256x128xf32>
    %125 = math.absf %124 : vector<256x128xf32>
    %cst_42 = arith.constant 1.000000e+00 : f32
    %126 = vector.broadcast %cst_42 : f32 to vector<256x128xf32>
    %127 = arith.subf %126, %125 : vector<256x128xf32>
    %cst_43 = arith.constant 0.000000e+00 : f32
    %128 = vector.broadcast %cst_43 : f32 to vector<256x128xf32>
    %129 = arith.maximumf %127, %128 : vector<256x128xf32>
    %130 = arith.mulf %122, %129 : vector<256x128xf32>
    %c0_44 = arith.constant 0 : index
    %c768 = arith.constant 768 : index
    %131 = vector.load %arg2[%c0_44, %c768] : memref<64x1024xf32, #tpu.memory_space<vmem>>, vector<64x256xf32>
    %cst_45 = arith.constant dense<0.000000e+00> : vector<64x128xf32>
    %132 = tpu.matmul %131, %130, %cst_45 {dimension_numbers = #tpu.dot_dimension_numbers<[1], [0], [0], [1], [0, 0, 1, 1], [], []>} : vector<64x256xf32>, vector<256x128xf32>, vector<64x128xf32> -> vector<64x128xf32>
    %133 = arith.addf %107, %132 : vector<64x128xf32>
    %134 = vector.extract_strided_slice %133 {offsets = [0, 0], sizes = [8, 128], strides = [1, 1]} : vector<64x128xf32> to vector<8x128xf32>
    %cst_46 = arith.constant 1.000000e+01 : f32
    %135 = vector.broadcast %cst_46 : f32 to vector<8x128xf32>
    %136 = arith.mulf %134, %135 : vector<8x128xf32>
    %cst_47 = arith.constant dense<0xFF800000> : vector<128xf32>
    %137 = vector.multi_reduction <maximumf>, %136, %cst_47 [0] : vector<8x128xf32> to vector<128xf32>
    %138 = vector.shape_cast %137 : vector<128xf32> to vector<1x128xf32>
    %139 = vector.broadcast %138 : vector<1x128xf32> to vector<8x128xf32>
    %140 = arith.subf %136, %139 : vector<8x128xf32>
    %141 = math.exp %140 : vector<8x128xf32>
    %cst_48 = arith.constant dense<0.000000e+00> : vector<128xf32>
    %142 = vector.multi_reduction <add>, %141, %cst_48 [0] : vector<8x128xf32> to vector<128xf32>
    %143 = vector.shape_cast %142 : vector<128xf32> to vector<1x128xf32>
    %144 = tpu.reciprocal %143 {approx = true} : vector<1x128xf32> -> vector<1x128xf32>
    %145 = arith.mulf %143, %144 : vector<1x128xf32>
    %cst_49 = arith.constant 2.000000e+00 : f32
    %146 = vector.broadcast %cst_49 : f32 to vector<1x128xf32>
    %147 = arith.subf %146, %145 : vector<1x128xf32>
    %148 = arith.mulf %144, %147 : vector<1x128xf32>
    %149 = vector.broadcast %148 : vector<1x128xf32> to vector<8x128xf32>
    %150 = arith.mulf %141, %149 : vector<8x128xf32>
    %151 = vector.extract_strided_slice %133 {offsets = [8, 0], sizes = [8, 128], strides = [1, 1]} : vector<64x128xf32> to vector<8x128xf32>
    %152 = vector.extract_strided_slice %133 {offsets = [16, 0], sizes = [8, 128], strides = [1, 1]} : vector<64x128xf32> to vector<8x128xf32>
    %153 = vector.extract_strided_slice %133 {offsets = [24, 0], sizes = [8, 128], strides = [1, 1]} : vector<64x128xf32> to vector<8x128xf32>
    %154 = vector.extract_strided_slice %133 {offsets = [32, 0], sizes = [8, 128], strides = [1, 1]} : vector<64x128xf32> to vector<8x128xf32>
    %155 = vector.extract_strided_slice %133 {offsets = [40, 0], sizes = [8, 128], strides = [1, 1]} : vector<64x128xf32> to vector<8x128xf32>
    %156 = vector.extract_strided_slice %133 {offsets = [48, 0], sizes = [8, 128], strides = [1, 1]} : vector<64x128xf32> to vector<8x128xf32>
    %157 = vector.extract_strided_slice %133 {offsets = [56, 0], sizes = [8, 128], strides = [1, 1]} : vector<64x128xf32> to vector<8x128xf32>
    %158 = arith.mulf %151, %151 : vector<8x128xf32>
    %159 = arith.mulf %152, %152 : vector<8x128xf32>
    %160 = arith.addf %158, %159 : vector<8x128xf32>
    %161 = arith.mulf %153, %153 : vector<8x128xf32>
    %162 = arith.addf %160, %161 : vector<8x128xf32>
    %163 = arith.mulf %154, %154 : vector<8x128xf32>
    %164 = arith.addf %162, %163 : vector<8x128xf32>
    %cst_50 = arith.constant 1.000000e-24 : f32
    %165 = vector.broadcast %cst_50 : f32 to vector<8x128xf32>
    %166 = arith.maximumf %164, %165 : vector<8x128xf32>
    %167 = math.rsqrt %166 : vector<8x128xf32>
    %168 = arith.mulf %150, %167 : vector<8x128xf32>
    %169 = arith.mulf %151, %168 : vector<8x128xf32>
    %cst_51 = arith.constant dense<0.000000e+00> : vector<128xf32>
    %170 = vector.multi_reduction <add>, %169, %cst_51 [0] : vector<8x128xf32> to vector<128xf32>
    %171 = vector.shape_cast %170 : vector<128xf32> to vector<1x128xf32>
    %172 = arith.mulf %152, %168 : vector<8x128xf32>
    %cst_52 = arith.constant dense<0.000000e+00> : vector<128xf32>
    %173 = vector.multi_reduction <add>, %172, %cst_52 [0] : vector<8x128xf32> to vector<128xf32>
    %174 = vector.shape_cast %173 : vector<128xf32> to vector<1x128xf32>
    %175 = arith.mulf %153, %168 : vector<8x128xf32>
    %cst_53 = arith.constant dense<0.000000e+00> : vector<128xf32>
    %176 = vector.multi_reduction <add>, %175, %cst_53 [0] : vector<8x128xf32> to vector<128xf32>
    %177 = vector.shape_cast %176 : vector<128xf32> to vector<1x128xf32>
    %178 = arith.mulf %154, %168 : vector<8x128xf32>
    %cst_54 = arith.constant dense<0.000000e+00> : vector<128xf32>
    %179 = vector.multi_reduction <add>, %178, %cst_54 [0] : vector<8x128xf32> to vector<128xf32>
    %180 = vector.shape_cast %179 : vector<128xf32> to vector<1x128xf32>
    %181 = arith.mulf %155, %150 : vector<8x128xf32>
    %cst_55 = arith.constant dense<0.000000e+00> : vector<128xf32>
    %182 = vector.multi_reduction <add>, %181, %cst_55 [0] : vector<8x128xf32> to vector<128xf32>
    %183 = vector.shape_cast %182 : vector<128xf32> to vector<1x128xf32>
    %184 = arith.mulf %156, %150 : vector<8x128xf32>
    %cst_56 = arith.constant dense<0.000000e+00> : vector<128xf32>
    %185 = vector.multi_reduction <add>, %184, %cst_56 [0] : vector<8x128xf32> to vector<128xf32>
    %186 = vector.shape_cast %185 : vector<128xf32> to vector<1x128xf32>
    %187 = arith.mulf %157, %150 : vector<8x128xf32>
    %cst_57 = arith.constant dense<0.000000e+00> : vector<128xf32>
    %188 = vector.multi_reduction <add>, %187, %cst_57 [0] : vector<8x128xf32> to vector<128xf32>
    %189 = vector.shape_cast %188 : vector<128xf32> to vector<1x128xf32>
    %cst_58 = arith.constant 0.000000e+00 : f32
    %190 = vector.broadcast %cst_58 : f32 to vector<1x128xf32>
    %191 = arith.subf %190, %174 : vector<1x128xf32>
    %192 = arith.mulf %191, %1 : vector<1x128xf32>
    %193 = arith.mulf %177, %2 : vector<1x128xf32>
    %194 = arith.subf %192, %193 : vector<1x128xf32>
    %195 = arith.mulf %180, %3 : vector<1x128xf32>
    %196 = arith.subf %194, %195 : vector<1x128xf32>
    %197 = arith.mulf %171, %1 : vector<1x128xf32>
    %198 = arith.mulf %177, %3 : vector<1x128xf32>
    %199 = arith.addf %197, %198 : vector<1x128xf32>
    %200 = arith.mulf %180, %2 : vector<1x128xf32>
    %201 = arith.subf %199, %200 : vector<1x128xf32>
    %202 = arith.mulf %171, %2 : vector<1x128xf32>
    %203 = arith.mulf %174, %3 : vector<1x128xf32>
    %204 = arith.subf %202, %203 : vector<1x128xf32>
    %205 = arith.mulf %180, %1 : vector<1x128xf32>
    %206 = arith.addf %204, %205 : vector<1x128xf32>
    %207 = arith.mulf %171, %3 : vector<1x128xf32>
    %208 = arith.mulf %174, %2 : vector<1x128xf32>
    %209 = arith.addf %207, %208 : vector<1x128xf32>
    %210 = arith.mulf %177, %1 : vector<1x128xf32>
    %211 = arith.subf %209, %210 : vector<1x128xf32>
    %cst_59 = arith.constant 0.000000e+00 : f32
    %212 = vector.broadcast %cst_59 : f32 to vector<1x128xf32>
    %213 = arith.subf %212, %196 : vector<1x128xf32>
    %214 = arith.mulf %213, %174 : vector<1x128xf32>
    %215 = arith.mulf %201, %171 : vector<1x128xf32>
    %216 = arith.addf %214, %215 : vector<1x128xf32>
    %217 = arith.mulf %206, %180 : vector<1x128xf32>
    %218 = arith.subf %216, %217 : vector<1x128xf32>
    %219 = arith.mulf %211, %177 : vector<1x128xf32>
    %220 = arith.addf %218, %219 : vector<1x128xf32>
    %cst_60 = arith.constant 0.000000e+00 : f32
    %221 = vector.broadcast %cst_60 : f32 to vector<1x128xf32>
    %222 = arith.subf %221, %196 : vector<1x128xf32>
    %223 = arith.mulf %222, %177 : vector<1x128xf32>
    %224 = arith.mulf %201, %180 : vector<1x128xf32>
    %225 = arith.addf %223, %224 : vector<1x128xf32>
    %226 = arith.mulf %206, %171 : vector<1x128xf32>
    %227 = arith.addf %225, %226 : vector<1x128xf32>
    %228 = arith.mulf %211, %174 : vector<1x128xf32>
    %229 = arith.subf %227, %228 : vector<1x128xf32>
    %cst_61 = arith.constant 0.000000e+00 : f32
    %230 = vector.broadcast %cst_61 : f32 to vector<1x128xf32>
    %231 = arith.subf %230, %196 : vector<1x128xf32>
    %232 = arith.mulf %231, %180 : vector<1x128xf32>
    %233 = arith.mulf %201, %177 : vector<1x128xf32>
    %234 = arith.subf %232, %233 : vector<1x128xf32>
    %235 = arith.mulf %206, %174 : vector<1x128xf32>
    %236 = arith.addf %234, %235 : vector<1x128xf32>
    %237 = arith.mulf %211, %171 : vector<1x128xf32>
    %238 = arith.addf %236, %237 : vector<1x128xf32>
    %239 = arith.mulf %171, %4 : vector<1x128xf32>
    %240 = arith.mulf %174, %5 : vector<1x128xf32>
    %241 = arith.subf %239, %240 : vector<1x128xf32>
    %242 = arith.mulf %177, %6 : vector<1x128xf32>
    %243 = arith.subf %241, %242 : vector<1x128xf32>
    %244 = arith.mulf %180, %7 : vector<1x128xf32>
    %245 = arith.subf %243, %244 : vector<1x128xf32>
    %246 = arith.mulf %171, %5 : vector<1x128xf32>
    %247 = arith.mulf %174, %4 : vector<1x128xf32>
    %248 = arith.addf %246, %247 : vector<1x128xf32>
    %249 = arith.mulf %177, %7 : vector<1x128xf32>
    %250 = arith.addf %248, %249 : vector<1x128xf32>
    %251 = arith.mulf %180, %6 : vector<1x128xf32>
    %252 = arith.subf %250, %251 : vector<1x128xf32>
    %253 = arith.mulf %171, %6 : vector<1x128xf32>
    %254 = arith.mulf %174, %7 : vector<1x128xf32>
    %255 = arith.subf %253, %254 : vector<1x128xf32>
    %256 = arith.mulf %177, %4 : vector<1x128xf32>
    %257 = arith.addf %255, %256 : vector<1x128xf32>
    %258 = arith.mulf %180, %5 : vector<1x128xf32>
    %259 = arith.addf %257, %258 : vector<1x128xf32>
    %260 = arith.mulf %171, %7 : vector<1x128xf32>
    %261 = arith.mulf %174, %6 : vector<1x128xf32>
    %262 = arith.addf %260, %261 : vector<1x128xf32>
    %263 = arith.mulf %177, %5 : vector<1x128xf32>
    %264 = arith.subf %262, %263 : vector<1x128xf32>
    %265 = arith.mulf %180, %4 : vector<1x128xf32>
    %266 = arith.addf %264, %265 : vector<1x128xf32>
    %cst_62 = arith.constant 0.000000e+00 : f32
    %267 = vector.broadcast %cst_62 : f32 to vector<1x128xf32>
    %268 = arith.cmpf olt, %245, %267 : vector<1x128xf32>
    %cst_63 = arith.constant -1.000000e+00 : f32
    %cst_64 = arith.constant 1.000000e+00 : f32
    %269 = vector.broadcast %cst_63 : f32 to vector<1x128xf32>
    %270 = vector.broadcast %cst_64 : f32 to vector<1x128xf32>
    %271 = arith.select %268, %269, %270 : vector<1x128xi1>, vector<1x128xf32>
    %272 = arith.addf %220, %183 : vector<1x128xf32>
    %273 = arith.addf %229, %186 : vector<1x128xf32>
    %274 = arith.addf %238, %189 : vector<1x128xf32>
    %275 = arith.mulf %245, %271 : vector<1x128xf32>
    %276 = arith.mulf %252, %271 : vector<1x128xf32>
    %277 = arith.mulf %259, %271 : vector<1x128xf32>
    %278 = arith.mulf %266, %271 : vector<1x128xf32>
    %cst_65 = arith.constant 0.000000e+00 : f32
    %279 = vector.broadcast %cst_65 : f32 to vector<1x128xf32>
    %280 = tpu.concatenate %150, %272, %273, %274, %275, %276, %277, %278, %279 in 0 : vector<8x128xf32>, vector<1x128xf32>, vector<1x128xf32>, vector<1x128xf32>, vector<1x128xf32>, vector<1x128xf32>, vector<1x128xf32>, vector<1x128xf32>, vector<1x128xf32> -> vector<16x128xf32>
    %c0_66 = arith.constant 0 : index
    %c0_67 = arith.constant 0 : index
    %281 = vector.load %arg3[%c0_66, %c0_67] : memref<16x128xf32, #tpu.memory_space<vmem>>, vector<16x128xf32>
    tpu.vector_store %arg3[%c0_66, %c0_67], %280 {strides = array<i32>} : memref<16x128xf32, #tpu.memory_space<vmem>>, vector<16x128xf32>,
    return
  }
  func.func @transform_0(%arg0: i32) -> (i32, i32) {
    %c0_i32 = arith.constant 0 : i32
    %c0_i32_0 = arith.constant 0 : i32
    return %c0_i32, %arg0 : i32, i32
  }
  func.func @transform_1(%arg0: i32) -> (i32, i32) {
    %c0_i32 = arith.constant 0 : i32
    %c0_i32_0 = arith.constant 0 : i32
    %c0_i32_1 = arith.constant 0 : i32
    return %c0_i32, %c0_i32_0 : i32, i32
  }
  func.func @transform_2(%arg0: i32) -> (i32, i32) {
    %c0_i32 = arith.constant 0 : i32
    %c0_i32_0 = arith.constant 0 : i32
    return %c0_i32, %arg0 : i32, i32
  }
}

</mosaic_0001>

<bundles_post_ra>
// kernel: _hexplane_forward_impl.1
= control target key start
LH: loop header
LB: loop body
LE: loop exit
PB: predicated region body
PF: predicated region fallthrough
CT: control target
= control target key end

     0   :  { %7 = vsyncpa [#allocation4], 0  ;;  %s2172_s9 = smov 0   ;;  %s2174_s10 = smov 0   ;;  %s3114_s0 = inlined_call_operand.vmem [shape: f32[16,256], index: 0, kind: input, shape index: {}]   ;;  %s3115_s1 = inlined_call_operand.hbm [shape: f32[64,1024], index: 1, kind: input, shape index: {}]   ;;  %s3116_s2 = inlined_call_operand.vmem [shape: f32[16,256], index: 2, kind: output, shape index: {}]  }
   0x1   :  { %s2176_s11 = smov 0  }
   0x2 LB: > { %s2188_s12 = sadd.s32 4294967295, %s2151_s11   ;;  %s2191_s13 = sadd.s32 1, %s2151_s11   ;;  %s2151_s11 = sphi %s2176_s11, %s3309_s11   ;;  %s2147_s10 = sphi %s2174_s10, %s3308_s10   ;;  %s2143_s9 = sphi %s2172_s9, %s3307_s9  }
   0x3   : > { %s17_s14 = ssub.s32 %s2151_s11, %s2191_s13  ;;  %s20_s15 = sadd.s32 1, %s2147_s10 }
   0x4   : > { %p18_p0 = scmp.eq.s32.totalorder %s17_s14, 0  ;;  %p27_p1 = scmp.ne.s32.totalorder %s2147_s10, %s2143_s9 }
   0x5   : > { %p28_p2 = scmp.eq.s32.totalorder %s2151_s11, 0  ;;  %p78_p3 = scmp.eq.s32.totalorder %s2188_s12, 1 }
   0x6   : > { %s2201_s16 = scalar_select %p18_p0, %s2147_s10, %s20_s15  }
   0x7   : > { %p2203_p4 = por %p28_p2, %p27_p1  ;;  %p2207_p5 = por %p78_p3, %p27_p1 }
   0x8   : > { %p2034_p6 = scmp.ge.s32.totalorder %s2151_s11, 1  ;;  %p91_p7 = scmp.lt.s32.totalorder %s2151_s11, 3 }
   0x9   : > { %p2057_p8 = scmp.eq.s32.totalorder %s2188_s12, 0  ;;  %s102_s22 = sshll.u32 %s3115_s1, 4  ;;  %s103_s22 = int_to_ptr.hbm [resolvable:$true] %s102_s22 }
   0xa   : > { %p2214_p9 = pnand %p2034_p6, %p91_p7  ;;  %s2153_s23 = smov [#allocation3]  }
   0xb   : > { %s104_s24 = sshll.u32 %s2153_s23, 4  ;;  %s2154_s25 = smov 1024   ;;  %s105_s24 = int_to_ptr.vmem [resolvable:$true] %s104_s24 }
   0xc   : > { %p2053_p10 = pneg %p2214_p9  ;;  %s2155_s26 = smov 64  }
   0xd   : > { %p2036_p12 = scmp.ge.s32.totalorder %s2151_s11, 2 }
   0xe   : > { %p2054_p11 = pnand %p2057_p8, %p2053_p10 }
   0xf   : > { %114 = sbr.rel (%p2036_p12) target bundleno = 26 (0x1a), region = 20 }
  0x10   : > { %2056 = dma.hbm_to_vmem [thread:$0]  (!%p2054_p11), %s103_s22, 8192, %s105_s24, [#allocation4], %s2154_s25, %s2154_s25, %s2155_s26  }
  0x14   : > { %117 = sbr.rel (!%p2203_p4) target bundleno = 26 (0x1a), region = 24  ;;  %s119_s27 = sand.u32 (%p2203_p4), 1, %s2147_s10  }
  0x15   : > { %s2038_s28 = sshll.u32 (%p2203_p4), %s2151_s11, 3  ;;  %s2037_s29 = sshll.u32 (%p2203_p4), %s119_s27, 4 }
  0x16   : > { %s123_s4 = scalar_lea.vmem (%p2203_p4), %s3114_s0, %s2038_s28  ;;  %s121_s5 = scalar_lea.vmem (%p2203_p4), [#allocation2], %s2037_s29 }
  0x17   : > { %v154_v0 = vld [vmem:[%s123_s4] sm:$0xff] (%p2203_p4)  ;;  %v156_v1 = vld [vmem:[%s123_s4 + $0x10] sm:$0xff] (%p2203_p4) }
  0x18   : > { %155 = vst [vmem:[%s121_s5] sm:$0xff] (%p2203_p4), %v154_v0 }
  0x19   : > { %157 = vst [vmem:[%s121_s5 + $0x8] sm:$0xff] %v156_v1 }
  0x1a PF: > { %166 = sbr.rel (%p2214_p9) target bundleno = 565 (0x235), region = 62 }
  0x1f   : > { %s169_s6 = sand.u32 1, %s2143_s9  }
  0x20   : > { %s2236_s7 = sshll.u32 %s169_s6, 4 }
  0x21   : > { %s2239_s8 = scalar_lea.vmem [#allocation2], %s2236_s7 }
  0x22   : > { %2138 = dma.done.wait (%p2057_p8), [#allocation4], 8192  }
  0x23   : > { %2140 = vsyncadd (%p2057_p8), [#allocation4], 4294959104  ;;  %v199_v2 = vlaneseq  ;;  %v194_v16 = vld [vmem:[%s2239_s8] sm:$0xff]  ;;  %s3080_s9 = scalar_lea.vmem [#allocation5], %s2236_s7  ;;  %vm1902_vm4 = vcmask 1040384   ;;  %vm1904_vm5 = vcmask 1041408  }
  0x24   : > { %v2043_v21 = vadd.f32 -1.0, %v194_v16  ;;  %vm1906_vm6 = vcmask 1042432   ;;  %vm1908_vm7 = vcmask 1043456   ;;  %vm1910_vm8 = vcmask 1044480   ;;  %s2046_s11 = sshll.u32 (%p2207_p5), %s2188_s12, 3 }
  0x25   : > { %v2245_v3 = vshrl.u32 %v199_v2, 7  ;;  %vm1912_vm9 = vcmask 1045504   ;;  %vm1914_vm10 = vcmask 1046528   ;;  %s1926_s17 = scalar_lea.vmem (%p2207_p5), %s3116_s2, %s2046_s11 }
  0x26   : > { %v197_v29 = vmul.f32 -1.0, %v2043_v21 }
  0x27   : > { %v215_v4 = vadd.s32 120, %v2245_v3  ;;  %v231_v5 = vadd.s32 248, %v2245_v3  ;;  %v214_v6 = vadd.s32 112, %v2245_v3  ;;  %v230_v7 = vadd.s32 240, %v2245_v3 }
  0x28   : > { %v213_v8 = vadd.s32 104, %v2245_v3  ;;  %v229_v9 = vadd.s32 232, %v2245_v3  ;;  %v212_v10 = vadd.s32 96, %v2245_v3  ;;  %v2255_v11 = vadd.s32 224, %v2245_v3 }
  0x29   : > { %v247_v12 = vcvt.s32.f32 %v215_v4  ;;  %v263_v13 = vcvt.s32.f32 %v231_v5  ;;  %v246_v14 = vcvt.s32.f32 %v214_v6  ;;  %v262_v15 = vcvt.s32.f32 %v230_v7 }
  0x2a   : > { %v245_v17 = vcvt.s32.f32 %v213_v8  ;;  %v261_v18 = vcvt.s32.f32 %v229_v9  ;;  %v244_v19 = vcvt.s32.f32 %v212_v10  ;;  %v260_v20 = vcvt.s32.f32 %v2255_v11 }
  0x2b   : > { %v279_v22 = vmul.f32 0.0625, %v247_v12  ;;  %v295_v23 = vmul.f32 0.0625, %v263_v13  ;;  %v278_v24 = vmul.f32 0.0625, %v246_v14  ;;  %v294_v25 = vmul.f32 0.0625, %v262_v15 }
  0x2c   : > { %v277_v26 = vmul.f32 0.0625, %v245_v17  ;;  %v293_v27 = vmul.f32 0.0625, %v261_v18  ;;  %v276_v28 = vmul.f32 0.0625, %v244_v19  ;;  %v2044_v37 = vadd.f32 -1.0, %v197_v29 }
  0x2d   : > { %v2259_v30 = vfloor.f32 %v279_v22  ;;  %v2261_v31 = vfloor.f32 %v295_v23  ;;  %v2263_v32 = vfloor.f32 %v278_v24  ;;  %v2265_v33 = vfloor.f32 %v294_v25 }
  0x2e   : > { %v2267_v34 = vfloor.f32 %v277_v26  ;;  %v2269_v35 = vfloor.f32 %v293_v27  ;;  %v2271_v36 = vfloor.f32 %v276_v28  ;;  %v392_v46 = vadd.f32 1.0, %v2044_v37 }
  0x2f   : > { %v343_v38 = vmul.f32 16.0, %v2259_v30  ;;  %v359_v39 = vmul.f32 16.0, %v2261_v31  ;;  %v342_v40 = vmul.f32 16.0, %v2263_v32  ;;  %v358_v41 = vmul.f32 16.0, %v2265_v33 }
  0x30   : > { %v341_v42 = vmul.f32 16.0, %v2267_v34  ;;  %v357_v43 = vmul.f32 16.0, %v2269_v35  ;;  %v340_v44 = vmul.f32 16.0, %v2271_v36  ;;  %v393_v51 = vmul.f32 7.5, %v392_v46 }
  0x31   : > { %v2280_v45 = vsub.f32 %v247_v12, %v343_v38  ;;  %v2282_v47 = vsub.f32 %v263_v13, %v359_v39  ;;  %v2284_v48 = vsub.f32 %v246_v14, %v342_v40  ;;  %v2286_v49 = vsub.f32 %v262_v15, %v358_v41 }
  0x32   : > { %v2288_v50 = vsub.f32 %v245_v17, %v341_v42  ;;  %v292_v52 = vmul.f32 0.0625, %v260_v20  ;;  %v2293_v53 = vadd.s32 88, %v2245_v3  ;;  %v2296_v54 = vadd.s32 216, %v2245_v3 }
  0x33   : > { %v2298_v55 = vsub.f32 %v261_v18, %v357_v43  ;;  %v2300_v56 = vsub.f32 %v244_v19, %v340_v44  ;;  %v2303_v57 = vadd.s32 80, %v2245_v3  ;;  %v2306_v58 = vadd.s32 208, %v2245_v3 }
  0x34   : > { %v2308_v59 = vperm.slane %v393_v51, 0  ;;  %v2310_v60 = vperm.slane %v393_v51, 1  ;;  %v2312_v61 = vperm.slane %v393_v51, 2  ;;  %v2314_v62 = vfloor.f32 %v292_v52 }
  0x35   : > { %v243_v63 = vcvt.s32.f32 %v2293_v53  ;;  %v259_v0 = vcvt.s32.f32 %v2296_v54  ;;  %v242_v1 = vcvt.s32.f32 %v2303_v57  ;;  %v258_v2 = vcvt.s32.f32 %v2306_v58 }
  0x36   : > { %v410_v4 = vsub.f32 %v2308_v59, %v2280_v45  ;;  %v716_v5 = vsub.f32 %v2312_v61, %v2259_v30  ;;  %v426_v6 = vsub.f32 %v2308_v59, %v2282_v47  ;;  %v732_v7 = vsub.f32 %v2312_v61, %v2261_v31 }
  0x37   : > { %v539_v8 = vsub.f32 %v2310_v60, %v2259_v30  ;;  %v555_v9 = vsub.f32 %v2310_v60, %v2261_v31  ;;  %v409_v10 = vsub.f32 %v2308_v59, %v2284_v48  ;;  %v715_v12 = vsub.f32 %v2312_v61, %v2263_v32 }
  0x38   : > { %v442_v13 = vand.u32 2147483647, %v410_v4  ;;  %v748_v14 = vand.u32 2147483647, %v716_v5  ;;  %v458_v15 = vand.u32 2147483647, %v426_v6  ;;  %v425_v16 = vsub.f32 %v2308_v59, %v2286_v49 }
  0x39   : > { %v764_v17 = vand.u32 2147483647, %v732_v7  ;;  %v571_v18 = vand.u32 2147483647, %v539_v8  ;;  %v587_v19 = vand.u32 2147483647, %v555_v9  ;;  %v731_v21 = vsub.f32 %v2312_v61, %v2265_v33 }
  0x3a   : > { %v474_v22 = vsub.f32 1.0, %v442_v13  ;;  %v780_v23 = vsub.f32 1.0, %v748_v14  ;;  %v490_v24 = vsub.f32 1.0, %v458_v15  ;;  %v441_v25 = vand.u32 2147483647, %v409_v10 }
  0x3b   : > { %v796_v26 = vsub.f32 1.0, %v764_v17  ;;  %v603_v27 = vsub.f32 1.0, %v571_v18  ;;  %v619_v28 = vsub.f32 1.0, %v587_v19  ;;  %v747_v29 = vand.u32 2147483647, %v715_v12 }
  0x3c   : > { %v506_v37 = vmax.f32 %v474_v22, 0.0  ;;  %v2340_v38 = vmax.f32 %v780_v23, 0.0  ;;  %v522_v39 = vmax.f32 %v490_v24, 0.0  ;;  %v473_v40 = vsub.f32 1.0, %v441_v25 }
  0x3d   : > { %v2342_v41 = vmax.f32 %v796_v26, 0.0  ;;  %v635_v42 = vmax.f32 %v603_v27, 0.0  ;;  %v651_v43 = vmax.f32 %v619_v28, 0.0  ;;  %v779_v44 = vsub.f32 1.0, %v747_v29 }
  0x3e   : > { %v844_v46 = vmul.f32 %v2340_v38, %v506_v37  ;;  %v505_v51 = vmax.f32 %v473_v40, 0.0  ;;  %v457_v52 = vand.u32 2147483647, %v425_v16  ;;  %v763_v4 = vand.u32 2147483647, %v731_v21 }
  0x3f   : > { %v860_v5 = vmul.f32 %v2342_v41, %v522_v39  ;;  %v667_v6 = vmul.f32 %v635_v42, %v506_v37  ;;  %v683_v7 = vmul.f32 %v651_v43, %v522_v39  ;;  %v2346_v8 = vmax.f32 %v779_v44, 0.0 }
  0x40   : > { %877 = vmatpush.msra.mxu0 %v844_v46  ;;  %v489_v9 = vsub.f32 1.0, %v457_v52  ;;  %v795_v10 = vsub.f32 1.0, %v763_v4  ;;  %v538_v12 = vsub.f32 %v2310_v60, %v2263_v32  ;;  %v554_v13 = vsub.f32 %v2310_v60, %v2265_v33 }
  0x41   : > { %918 = vmatpush.msra.mxu1 %v860_v5  ;;  %959 = vmatpush.msra.mxu2 %v667_v6  ;;  %v843_v14 = vmul.f32 %v2346_v8, %v505_v51  ;;  %v408_v15 = vsub.f32 %v2308_v59, %v2288_v50  ;;  %v714_v16 = vsub.f32 %v2312_v61, %v2267_v34  ;;  %v356_v17 = vmul.f32 16.0, %v2314_v62 }
  0x42   : > { %1000 = vmatpush.msra.mxu3 %v683_v7  ;;  %v521_v18 = vmax.f32 %v489_v9, 0.0  ;;  %v2358_v19 = vmax.f32 %v795_v10, 0.0  ;;  %v570_v21 = vand.u32 2147483647, %v538_v12  ;;  %v586_v22 = vand.u32 2147483647, %v554_v13 }
  0x43   : > { %878 = vmatpush.msra.mxu0 %v843_v14  ;;  %v440_v23 = vand.u32 2147483647, %v408_v15  ;;  %v746_v24 = vand.u32 2147483647, %v714_v16  ;;  %v424_v25 = vsub.f32 %v2308_v59, %v2298_v55  ;;  %v730_v26 = vsub.f32 %v2312_v61, %v2269_v35 }
  0x44   : > { %v859_v27 = vmul.f32 %v2358_v19, %v521_v18  ;;  %v602_v28 = vsub.f32 1.0, %v570_v21  ;;  %v618_v29 = vsub.f32 1.0, %v586_v22  ;;  %v537_v37 = vsub.f32 %v2310_v60, %v2267_v34 }
  0x45   : > { %v472_v39 = vsub.f32 1.0, %v440_v23  ;;  %v778_v40 = vsub.f32 1.0, %v746_v24  ;;  %v456_v42 = vand.u32 2147483647, %v424_v25  ;;  %v762_v43 = vand.u32 2147483647, %v730_v26 }
  0x46   : > { %919 = vmatpush.msra.mxu1 %v859_v27  ;;  %v634_v44 = vmax.f32 %v602_v28, 0.0  ;;  %v650_v46 = vmax.f32 %v618_v29, 0.0  ;;  %v569_v52 = vand.u32 2147483647, %v537_v37  ;;  %v553_v4 = vsub.f32 %v2310_v60, %v2269_v35 }
  0x47   : > { %v504_v5 = vmax.f32 %v472_v39, 0.0  ;;  %v2369_v6 = vmax.f32 %v778_v40, 0.0  ;;  %v488_v7 = vsub.f32 1.0, %v456_v42  ;;  %v794_v9 = vsub.f32 1.0, %v762_v43 }
  0x48   : > { %v666_v10 = vmul.f32 %v634_v44, %v505_v51  ;;  %v682_v12 = vmul.f32 %v650_v46, %v521_v18  ;;  %v601_v13 = vsub.f32 1.0, %v569_v52  ;;  %v585_v14 = vand.u32 2147483647, %v553_v4 }
  0x49   : > { %v842_v15 = vmul.f32 %v2369_v6, %v504_v5  ;;  %v520_v16 = vmax.f32 %v488_v7, 0.0  ;;  %v2372_v21 = vmax.f32 %v794_v9, 0.0  ;;  %v407_v22 = vsub.f32 %v2308_v59, %v2300_v56 }
  0x4a   : > { %960 = vmatpush.msra.mxu2 %v666_v10  ;;  %1001 = vmatpush.msra.mxu3 %v682_v12  ;;  %v633_v23 = vmax.f32 %v601_v13, 0.0  ;;  %v617_v24 = vsub.f32 1.0, %v585_v14  ;;  %v713_v25 = vsub.f32 %v2312_v61, %v2271_v36  ;;  %v2380_v51 = vsub.f32 %v260_v20, %v356_v17 }
  0x4b   : > { %879 = vmatpush.msra.mxu0 %v842_v15  ;;  %v858_v18 = vmul.f32 %v2372_v21, %v520_v16  ;;  %v439_v26 = vand.u32 2147483647, %v407_v22  ;;  %v729_v27 = vsub.f32 %v2312_v61, %v2314_v62  ;;  %v536_v28 = vsub.f32 %v2310_v60, %v2271_v36 }
  0x4c   : > { %v665_v29 = vmul.f32 %v633_v23, %v504_v5  ;;  %v649_v37 = vmax.f32 %v617_v24, 0.0  ;;  %v745_v39 = vand.u32 2147483647, %v713_v25  ;;  %v423_v40 = vsub.f32 %v2308_v59, %v2380_v51 }
  0x4d   : > { %920 = vmatpush.msra.mxu1 %v858_v18  ;;  %v471_v11 = vsub.f32 1.0, %v439_v26  ;;  %v761_v20 = vand.u32 2147483647, %v729_v27  ;;  %v568_v17 = vand.u32 2147483647, %v536_v28  ;;  %v552_v42 = vsub.f32 %v2310_v60, %v2314_v62 }
  0x4e   : > { %961 = vmatpush.msra.mxu2 %v665_v29  ;;  %v681_v43 = vmul.f32 %v649_v37, %v520_v16  ;;  %v777_v44 = vsub.f32 1.0, %v745_v39  ;;  %v455_v46 = vand.u32 2147483647, %v423_v40  ;;  %v275_v52 = vmul.f32 0.0625, %v243_v63 }
  0x4f   : > { %v503_v4 = vmax.f32 %v471_v11, 0.0  ;;  %v793_v5 = vsub.f32 1.0, %v761_v20  ;;  %v600_v7 = vsub.f32 1.0, %v568_v17  ;;  %v584_v9 = vand.u32 2147483647, %v552_v42 }
  0x50   : > { %1002 = vmatpush.msra.mxu3 %v681_v43  ;;  %v2393_v10 = vmax.f32 %v777_v44, 0.0  ;;  %v487_v12 = vsub.f32 1.0, %v455_v46  ;;  %v2395_v13 = vfloor.f32 %v275_v52  ;;  %v291_v14 = vmul.f32 0.0625, %v259_v0 }
  0x51   : > { %v2399_v15 = vmax.f32 %v793_v5, 0.0  ;;  %v632_v16 = vmax.f32 %v600_v7, 0.0  ;;  %v616_v22 = vsub.f32 1.0, %v584_v9  ;;  %v274_v23 = vmul.f32 0.0625, %v242_v1 }
  0x52   : > { %v841_v24 = vmul.f32 %v2393_v10, %v503_v4  ;;  %v519_v25 = vmax.f32 %v487_v12, 0.0  ;;  %v339_v18 = vmul.f32 16.0, %v2395_v13  ;;  %v712_v26 = vsub.f32 %v2312_v61, %v2395_v13 }
  0x53   : > { %v664_v27 = vmul.f32 %v632_v16, %v503_v4  ;;  %v648_v28 = vmax.f32 %v616_v22, 0.0  ;;  %v2407_v29 = vfloor.f32 %v291_v14  ;;  %v535_v37 = vsub.f32 %v2310_v60, %v2395_v13 }
  0x54   : > { %880 = vmatpush.msra.mxu0 %v841_v24  ;;  %v857_v39 = vmul.f32 %v2399_v15, %v519_v25  ;;  %v2414_v40 = vsub.f32 %v243_v63, %v339_v18  ;;  %v744_v11 = vand.u32 2147483647, %v712_v26  ;;  %v2416_v20 = vfloor.f32 %v274_v23 }
  0x55   : > { %962 = vmatpush.msra.mxu2 %v664_v27  ;;  %v680_v17 = vmul.f32 %v648_v28, %v519_v25  ;;  %v355_v42 = vmul.f32 16.0, %v2407_v29  ;;  %v728_v43 = vsub.f32 %v2312_v61, %v2407_v29  ;;  %v567_v44 = vand.u32 2147483647, %v535_v37 }
  0x56   : > { %921 = vmatpush.msra.mxu1 %v857_v39  ;;  %v406_v46 = vsub.f32 %v2308_v59, %v2414_v40  ;;  %v776_v52 = vsub.f32 1.0, %v744_v11  ;;  %v551_v53 = vsub.f32 %v2310_v60, %v2407_v29  ;;  %v338_v63 = vmul.f32 16.0, %v2416_v20 }
  0x57   : > { %1003 = vmatpush.msra.mxu3 %v680_v17  ;;  %v2428_v4 = vsub.f32 %v259_v0, %v355_v42  ;;  %v760_v5 = vand.u32 2147483647, %v728_v43  ;;  %v599_v7 = vsub.f32 1.0, %v567_v44  ;;  %v711_v9 = vsub.f32 %v2312_v61, %v2416_v20 }
  0x58   : > { %v438_v12 = vand.u32 2147483647, %v406_v46  ;;  %v2432_v14 = vmax.f32 %v776_v52, 0.0  ;;  %v583_v16 = vand.u32 2147483647, %v551_v53  ;;  %v2436_v22 = vsub.f32 %v242_v1, %v338_v63 }
  0x59   : > { %v422_v23 = vsub.f32 %v2308_v59, %v2428_v4  ;;  %v792_v24 = vsub.f32 1.0, %v760_v5  ;;  %v631_v54 = vmax.f32 %v599_v7, 0.0  ;;  %v743_v0 = vand.u32 2147483647, %v711_v9 }
  0x5a   : > { %3191 = vst [vmem:[#allocation7_spill] sm:$0xff] %v2432_v14  ;;  %v470_v25 = vsub.f32 1.0, %v438_v12  ;;  %v615_v18 = vsub.f32 1.0, %v583_v16  ;;  %v405_v26 = vsub.f32 %v2308_v59, %v2436_v22  ;;  %v290_v27 = vmul.f32 0.0625, %v258_v2 }
  0x5b   : > { %v454_v28 = vand.u32 2147483647, %v422_v23  ;;  %v2444_v37 = vmax.f32 %v792_v24, 0.0  ;;  %v775_v57 = vsub.f32 1.0, %v743_v0  ;;  %v534_v1 = vsub.f32 %v2310_v60, %v2416_v20 }
  0x5c   : > { %v502_v39 = vmax.f32 %v470_v25, 0.0  ;;  %v647_v11 = vmax.f32 %v615_v18, 0.0  ;;  %v437_v17 = vand.u32 2147483647, %v405_v26  ;;  %v2448_v42 = vfloor.f32 %v290_v27 }
  0x5d   : > { %3192 = vst [vmem:[#allocation8_spill] sm:$0xff] %v2444_v37  ;;  %v486_v43 = vsub.f32 1.0, %v454_v28  ;;  %v2450_v44 = vmax.f32 %v775_v57, 0.0  ;;  %v566_v46 = vand.u32 2147483647, %v534_v1  ;;  %v209_v52 = vadd.s32 72, %v2245_v3 }
  0x5e   : > { %v840_v53 = vmul.f32 %v2432_v14, %v502_v39  ;;  %v663_v63 = vmul.f32 %v631_v54, %v502_v39  ;;  %v469_v5 = vsub.f32 1.0, %v437_v17  ;;  %v354_v7 = vmul.f32 16.0, %v2448_v42 }
  0x5f   : > { %3193 = vst [vmem:[#allocation9_spill] sm:$0xff] %v2450_v44  ;;  %v518_v9 = vmax.f32 %v486_v43, 0.0  ;;  %v727_v12 = vsub.f32 %v2312_v61, %v2448_v42  ;;  %v598_v16 = vsub.f32 1.0, %v566_v46  ;;  %v550_v23 = vsub.f32 %v2310_v60, %v2448_v42 }
  0x60   : > { %881 = vmatpush.msra.mxu0 %v840_v53  ;;  %963 = vmatpush.msra.mxu2 %v663_v63  ;;  %v501_v24 = vmax.f32 %v469_v5, 0.0  ;;  %v2461_v0 = vsub.f32 %v258_v2, %v354_v7  ;;  %v241_v25 = vcvt.s32.f32 %v209_v52  ;;  %v225_v54 = vadd.s32 200, %v2245_v3 }
  0x61   : > { %v856_v18 = vmul.f32 %v2444_v37, %v518_v9  ;;  %v679_v26 = vmul.f32 %v647_v11, %v518_v9  ;;  %v759_v27 = vand.u32 2147483647, %v727_v12  ;;  %v630_v28 = vmax.f32 %v598_v16, 0.0 }
  0x62   : > { %v839_v57 = vmul.f32 %v2450_v44, %v501_v24  ;;  %v421_v1 = vsub.f32 %v2308_v59, %v2461_v0  ;;  %v582_v39 = vand.u32 2147483647, %v550_v23  ;;  %v273_v17 = vmul.f32 0.0625, %v241_v25 }
  0x63   : > { %922 = vmatpush.msra.mxu1 %v856_v18  ;;  %1004 = vmatpush.msra.mxu3 %v679_v26  ;;  %v791_v58 = vsub.f32 1.0, %v759_v27  ;;  %v662_v2 = vmul.f32 %v630_v28, %v501_v24  ;;  %v257_v43 = vcvt.s32.f32 %v225_v54  ;;  %v208_v46 = vadd.s32 64, %v2245_v3 }
  0x64   : > { %882 = vmatpush.msra.mxu0 %v839_v57  ;;  %v453_v52 = vand.u32 2147483647, %v421_v1  ;;  %v614_v53 = vsub.f32 1.0, %v582_v39  ;;  %v2469_v11 = vfloor.f32 %v273_v17  ;;  %v224_v63 = vadd.s32 192, %v2245_v3 }
  0x65   : > { %v2472_v5 = vmax.f32 %v791_v58, 0.0  ;;  %964 = vmatpush.msra.mxu2 %v662_v2  ;;  %v289_v7 = vmul.f32 0.0625, %v257_v43  ;;  %v240_v9 = vcvt.s32.f32 %v208_v46  ;;  %v2475_v12 = vadd.s32 56, %v2245_v3 }
  0x66   : > { %3194 = vst [vmem:[#allocation10_spill] sm:$0xff] %v2469_v11  ;;  %v485_v16 = vsub.f32 1.0, %v453_v52  ;;  %v646_v23 = vmax.f32 %v614_v53, 0.0  ;;  %v337_v24 = vmul.f32 16.0, %v2469_v11  ;;  %v710_v54 = vsub.f32 %v2312_v61, %v2469_v11 }
  0x67   : > { %3195 = vst [vmem:[#allocation11_spill] sm:$0xff] %v2472_v5  ;;  %v2480_v18 = vfloor.f32 %v289_v7  ;;  %v533_v26 = vsub.f32 %v2310_v60, %v2469_v11  ;;  %v272_v27 = vmul.f32 0.0625, %v240_v9  ;;  %v256_v28 = vcvt.s32.f32 %v224_v63 }
  0x68   : > { %v517_v57 = vmax.f32 %v485_v16, 0.0  ;;  %v2484_v1 = vsub.f32 %v241_v25, %v337_v24  ;;  %v742_v39 = vand.u32 2147483647, %v710_v54 }
  0x69   : > { %3196 = vst [vmem:[#allocation12_spill] sm:$0xff] %v2480_v18  ;;  %v353_v58 = vmul.f32 16.0, %v2480_v18  ;;  %v726_v2 = vsub.f32 %v2312_v61, %v2480_v18  ;;  %v565_v46 = vand.u32 2147483647, %v533_v26  ;;  %v549_v52 = vsub.f32 %v2310_v60, %v2480_v18 }
  0x6a   : > { %3197 = vst [vmem:[#allocation13_spill] sm:$0xff] %v2484_v1  ;;  %v855_v53 = vmul.f32 %v2472_v5, %v517_v57  ;;  %v678_v7 = vmul.f32 %v646_v23, %v517_v57  ;;  %v404_v63 = vsub.f32 %v2308_v59, %v2484_v1  ;;  %v774_v25 = vsub.f32 1.0, %v742_v39 }
  0x6b   : > { %v2495_v16 = vsub.f32 %v257_v43, %v353_v58  ;;  %v758_v24 = vand.u32 2147483647, %v726_v2  ;;  %v597_v54 = vsub.f32 1.0, %v565_v46  ;;  %v581_v17 = vand.u32 2147483647, %v549_v52 }
  0x6c   : > { %923 = vmatpush.msra.mxu1 %v855_v53  ;;  %1005 = vmatpush.msra.mxu3 %v678_v7  ;;  %v436_v44 = vand.u32 2147483647, %v404_v63  ;;  %v2497_v11 = vmax.f32 %v774_v25, 0.0  ;;  %v2499_v26 = vfloor.f32 %v272_v27  ;;  %v288_v18 = vmul.f32 0.0625, %v256_v28 }
  0x6d   : > { %3198 = vst [vmem:[#allocation14_spill] sm:$0xff] %v2495_v16  ;;  %v420_v23 = vsub.f32 %v2308_v59, %v2495_v16  ;;  %v790_v57 = vsub.f32 1.0, %v758_v24  ;;  %v629_v5 = vmax.f32 %v597_v54, 0.0  ;;  %v613_v1 = vsub.f32 1.0, %v581_v17 }
  0x6e   : > { %3199 = vst [vmem:[#allocation15_spill] sm:$0xff] %v2497_v11  ;;  %v468_v39 = vsub.f32 1.0, %v436_v44  ;;  %v336_v43 = vmul.f32 16.0, %v2499_v26  ;;  %v709_v58 = vsub.f32 %v2312_v61, %v2499_v26  ;;  %v2506_v2 = vfloor.f32 %v288_v18 }
  0x6f   : > { %3200 = vst [vmem:[#allocation16_spill] sm:$0xff] %v2499_v26  ;;  %v452_v46 = vand.u32 2147483647, %v420_v23  ;;  %v2508_v52 = vmax.f32 %v790_v57, 0.0  ;;  %v645_v27 = vmax.f32 %v613_v1, 0.0  ;;  %v532_v53 = vsub.f32 %v2310_v60, %v2499_v26 }
  0x70   : > { %3201 = vst [vmem:[#allocation17_spill] sm:$0xff] %v2506_v2  ;;  %v500_v7 = vmax.f32 %v468_v39, 0.0  ;;  %v2512_v63 = vsub.f32 %v240_v9, %v336_v43  ;;  %v741_v25 = vand.u32 2147483647, %v709_v58  ;;  %v352_v44 = vmul.f32 16.0, %v2506_v2 }
  0x71   : > { %3202 = vst [vmem:[#allocation18_spill] sm:$0xff] %v2508_v52  ;;  %v484_v17 = vsub.f32 1.0, %v452_v46  ;;  %v725_v24 = vsub.f32 %v2312_v61, %v2506_v2  ;;  %v564_v54 = vand.u32 2147483647, %v532_v53  ;;  %v548_v18 = vsub.f32 %v2310_v60, %v2506_v2 }
  0x72   : > { %3203 = vst [vmem:[#allocation19_spill] sm:$0xff] %v2512_v63  ;;  %v838_v23 = vmul.f32 %v2497_v11, %v500_v7  ;;  %v661_v1 = vmul.f32 %v629_v5, %v500_v7  ;;  %v403_v57 = vsub.f32 %v2308_v59, %v2512_v63  ;;  %v773_v39 = vsub.f32 1.0, %v741_v25 }
  0x73   : > { %v516_v9 = vmax.f32 %v484_v17, 0.0  ;;  %v2522_v43 = vsub.f32 %v256_v28, %v352_v44  ;;  %v757_v58 = vand.u32 2147483647, %v725_v24  ;;  %v596_v26 = vsub.f32 1.0, %v564_v54 }
  0x74   : > { %883 = vmatpush.msra.mxu0 %v838_v23  ;;  %965 = vmatpush.msra.mxu2 %v661_v1  ;;  %v435_v46 = vand.u32 2147483647, %v403_v57  ;;  %v2524_v16 = vmax.f32 %v773_v39, 0.0  ;;  %v580_v53 = vand.u32 2147483647, %v548_v18  ;;  %v3206_v2 = vcvt.s32.f32 %v2475_v12 }
  0x75   : > { %3204 = vst [vmem:[#allocation20_spill] sm:$0xff] %v2522_v43  ;;  %v854_v5 = vmul.f32 %v2508_v52, %v516_v9  ;;  %v677_v7 = vmul.f32 %v645_v27, %v516_v9  ;;  %v419_v25 = vsub.f32 %v2308_v59, %v2522_v43  ;;  %v789_v17 = vsub.f32 1.0, %v757_v58 }
  0x76   : > { %3205 = vst [vmem:[#allocation21_spill] sm:$0xff] %v2524_v16  ;;  %v271_v37 = vmul.f32 0.0625, %v3206_v2  ;;  %v467_v28 = vsub.f32 1.0, %v435_v46  ;;  %v628_v44 = vmax.f32 %v596_v26, 0.0  ;;  %v612_v24 = vsub.f32 1.0, %v580_v53 }
  0x77   : > { %924 = vmatpush.msra.mxu1 %v854_v5  ;;  %1006 = vmatpush.msra.mxu3 %v677_v7  ;;  %v451_v23 = vand.u32 2147483647, %v419_v25  ;;  %v2533_v1 = vmax.f32 %v789_v17, 0.0  ;;  %v223_v18 = vadd.s32 184, %v2245_v3  ;;  %v206_v2 = vadd.s32 48, %v2245_v3 }
  0x78   : > { %v2531_v54 = vfloor.f32 %v271_v37  ;;  %v499_v57 = vmax.f32 %v467_v28, 0.0  ;;  %v644_v27 = vmax.f32 %v612_v24, 0.0  ;;  %v3209_v7 = vcvt.s32.f32 %v2475_v12 }
  0x79   : > { %3208 = vst [vmem:[#allocation23_spill] sm:$0xff] %v2533_v1  ;;  %v483_v26 = vsub.f32 1.0, %v451_v23  ;;  %v255_v58 = vcvt.s32.f32 %v223_v18  ;;  %v238_v46 = vcvt.s32.f32 %v206_v2  ;;  %v222_v2 = vadd.s32 176, %v2245_v3 }
  0x7a   : > { %3207 = vst [vmem:[#allocation22_spill] sm:$0xff] %v2531_v54  ;;  %v335_v39 = vmul.f32 16.0, %v2531_v54  ;;  %v708_v9 = vsub.f32 %v2312_v61, %v2531_v54  ;;  %v531_v37 = vsub.f32 %v2310_v60, %v2531_v54  ;;  %v837_v53 = vmul.f32 %v2524_v16, %v499_v57 }
  0x7b   : > { %v660_v5 = vmul.f32 %v628_v44, %v499_v57  ;;  %v515_v28 = vmax.f32 %v483_v26, 0.0  ;;  %v287_v24 = vmul.f32 0.0625, %v255_v58  ;;  %v270_v11 = vmul.f32 0.0625, %v238_v46 }
  0x7c   : > { %v2545_v25 = vsub.f32 %v3209_v7, %v335_v39  ;;  %v740_v17 = vand.u32 2147483647, %v708_v9  ;;  %v563_v52 = vand.u32 2147483647, %v531_v37  ;;  %884 = vmatpush.msra.mxu0 %v837_v53  ;;  %v2551_v16 = vadd.s32 40, %v2245_v3 }
  0x7d   : > { %966 = vmatpush.msra.mxu2 %v660_v5  ;;  %v853_v12 = vmul.f32 %v2533_v1, %v515_v28  ;;  %v676_v44 = vmul.f32 %v644_v27, %v515_v28  ;;  %v2554_v57 = vfloor.f32 %v287_v24  ;;  %v2558_v37 = vfloor.f32 %v270_v11 }
  0x7e   : > { %3210 = vst [vmem:[#allocation24_spill] sm:$0xff] %v2545_v25  ;;  %v402_v23 = vsub.f32 %v2308_v59, %v2545_v25  ;;  %v772_v18 = vsub.f32 1.0, %v740_v17  ;;  %v595_v39 = vsub.f32 1.0, %v563_v52  ;;  %v254_v53 = vcvt.s32.f32 %v222_v2 }
  0x7f   : > { %3211 = vst [vmem:[#allocation25_spill] sm:$0xff] %v2554_v57  ;;  %925 = vmatpush.msra.mxu1 %v853_v12  ;;  %1007 = vmatpush.msra.mxu3 %v676_v44  ;;  %v351_v5 = vmul.f32 16.0, %v2554_v57  ;;  %v724_v7 = vsub.f32 %v2312_v61, %v2554_v57  ;;  %v547_v27 = vsub.f32 %v2310_v60, %v2554_v57  ;;  %v334_v52 = vmul.f32 16.0, %v2558_v37 }
  0x80   : > { %v434_v9 = vand.u32 2147483647, %v402_v23  ;;  %v2556_v26 = vmax.f32 %v772_v18, 0.0  ;;  %3213 = vst [vmem:[#allocation27_spill] sm:$0xff] %v2558_v37  ;;  %v627_v17 = vmax.f32 %v595_v39, 0.0  ;;  %v707_v24 = vsub.f32 %v2312_v61, %v2558_v37 }
  0x81   : > { %v286_v11 = vmul.f32 0.0625, %v254_v53  ;;  %v2568_v23 = vsub.f32 %v255_v58, %v351_v5  ;;  %v756_v18 = vand.u32 2147483647, %v724_v7  ;;  %v579_v2 = vand.u32 2147483647, %v547_v27 }
  0x82   : > { %3212 = vst [vmem:[#allocation26_spill] sm:$0xff] %v2556_v26  ;;  %v466_v28 = vsub.f32 1.0, %v434_v9  ;;  %v530_v12 = vsub.f32 %v2310_v60, %v2558_v37  ;;  %v2572_v1 = vsub.f32 %v238_v46, %v334_v52  ;;  %v739_v39 = vand.u32 2147483647, %v707_v24 }
  0x83   : > { %3214 = vst [vmem:[#allocation28_spill] sm:$0xff] %v2568_v23  ;;  %v2574_v54 = vfloor.f32 %v286_v11  ;;  %v418_v9 = vsub.f32 %v2308_v59, %v2568_v23  ;;  %v788_v57 = vsub.f32 1.0, %v756_v18  ;;  %v611_v25 = vsub.f32 1.0, %v579_v2 }
  0x84   : > { %v498_v44 = vmax.f32 %v466_v28, 0.0  ;;  %3215 = vst [vmem:[#allocation29_spill] sm:$0xff] %v2572_v1  ;;  %v562_v43 = vand.u32 2147483647, %v530_v12  ;;  %v401_v7 = vsub.f32 %v2308_v59, %v2572_v1  ;;  %v771_v27 = vsub.f32 1.0, %v739_v39 }
  0x85   : > { %3216 = vst [vmem:[#allocation30_spill] sm:$0xff] %v2574_v54  ;;  %v450_v37 = vand.u32 2147483647, %v418_v9  ;;  %v2581_v28 = vmax.f32 %v788_v57, 0.0  ;;  %v643_v46 = vmax.f32 %v611_v25, 0.0  ;;  %v350_v52 = vmul.f32 16.0, %v2574_v54 }
  0x86   : > { %v836_v58 = vmul.f32 %v2556_v26, %v498_v44  ;;  %v659_v5 = vmul.f32 %v627_v17, %v498_v44  ;;  %v433_v24 = vand.u32 2147483647, %v401_v7  ;;  %v2584_v11 = vmax.f32 %v771_v27, 0.0 }
  0x87   : > { %3217 = vst [vmem:[#allocation31_spill] sm:$0xff] %v2581_v28  ;;  %v723_v18 = vsub.f32 %v2312_v61, %v2574_v54  ;;  %v594_v2 = vsub.f32 1.0, %v562_v43  ;;  %v482_v17 = vsub.f32 1.0, %v450_v37  ;;  %v2588_v12 = vsub.f32 %v254_v53, %v350_v52 }
  0x88   : > { %885 = vmatpush.msra.mxu0 %v836_v58  ;;  %967 = vmatpush.msra.mxu2 %v659_v5  ;;  %3218 = vst [vmem:[#allocation32_spill] sm:$0xff] %v2584_v11  ;;  %v546_v44 = vsub.f32 %v2310_v60, %v2574_v54  ;;  %v237_v57 = vcvt.s32.f32 %v2551_v16  ;;  %v465_v25 = vsub.f32 1.0, %v433_v24  ;;  %v221_v58 = vadd.s32 168, %v2245_v3 }
  0x89   : > { %3219 = vst [vmem:[#allocation33_spill] sm:$0xff] %v2588_v12  ;;  %v755_v39 = vand.u32 2147483647, %v723_v18  ;;  %v626_v9 = vmax.f32 %v594_v2, 0.0  ;;  %v514_v5 = vmax.f32 %v482_v17, 0.0  ;;  %v417_v7 = vsub.f32 %v2308_v59, %v2588_v12 }
  0x8a   : > { %v578_v27 = vand.u32 2147483647, %v546_v44  ;;  %v269_v26 = vmul.f32 0.0625, %v237_v57  ;;  %v497_v43 = vmax.f32 %v465_v25, 0.0  ;;  %v253_v53 = vcvt.s32.f32 %v221_v58 }
  0x8b   : > { %v787_v37 = vsub.f32 1.0, %v755_v39  ;;  %v204_v52 = vadd.s32 32, %v2245_v3  ;;  %v852_v54 = vmul.f32 %v2581_v28, %v514_v5  ;;  %v675_v1 = vmul.f32 %v643_v46, %v514_v5 }
  0x8c   : > { %v449_v16 = vand.u32 2147483647, %v417_v7  ;;  %v610_v24 = vsub.f32 1.0, %v578_v27  ;;  %v835_v18 = vmul.f32 %v2584_v11, %v497_v43  ;;  %v658_v17 = vmul.f32 %v626_v9, %v497_v43 }
  0x8d   : > { %v2599_v2 = vmax.f32 %v787_v37, 0.0  ;;  %v2601_v23 = vfloor.f32 %v269_v26  ;;  %926 = vmatpush.msra.mxu1 %v852_v54  ;;  %1008 = vmatpush.msra.mxu3 %v675_v1  ;;  %v285_v39 = vmul.f32 0.0625, %v253_v53  ;;  %v236_v58 = vcvt.s32.f32 %v204_v52 }
  0x8e   : > { %v481_v44 = vsub.f32 1.0, %v449_v16  ;;  %v642_v25 = vmax.f32 %v610_v24, 0.0  ;;  %886 = vmatpush.msra.mxu0 %v835_v18  ;;  %968 = vmatpush.msra.mxu2 %v658_v17  ;;  %v220_v9 = vadd.s32 160, %v2245_v3  ;;  %v2612_v1 = vadd.s32 24, %v2245_v3 }
  0x8f   : > { %3220 = vst [vmem:[#allocation34_spill] sm:$0xff] %v2599_v2  ;;  %v333_v28 = vmul.f32 16.0, %v2601_v23  ;;  %v706_v46 = vsub.f32 %v2312_v61, %v2601_v23  ;;  %v529_v5 = vsub.f32 %v2310_v60, %v2601_v23  ;;  %v2609_v7 = vfloor.f32 %v285_v39 }
  0x90   : > { %3221 = vst [vmem:[#allocation35_spill] sm:$0xff] %v2601_v23  ;;  %v513_v26 = vmax.f32 %v481_v44, 0.0  ;;  %v268_v54 = vmul.f32 0.0625, %v236_v58  ;;  %v252_v52 = vcvt.s32.f32 %v220_v9 }
  0x91   : > { %3222 = vst [vmem:[#allocation36_spill] sm:$0xff] %v2609_v7  ;;  %v2614_v27 = vsub.f32 %v237_v57, %v333_v28  ;;  %v738_v43 = vand.u32 2147483647, %v706_v46  ;;  %v561_v37 = vand.u32 2147483647, %v529_v5  ;;  %v349_v18 = vmul.f32 16.0, %v2609_v7 }
  0x92   : > { %v851_v16 = vmul.f32 %v2599_v2, %v513_v26  ;;  %v674_v24 = vmul.f32 %v642_v25, %v513_v26  ;;  %v722_v17 = vsub.f32 %v2312_v61, %v2609_v7  ;;  %v545_v28 = vsub.f32 %v2310_v60, %v2609_v7 }
  0x93   : > { %3223 = vst [vmem:[#allocation37_spill] sm:$0xff] %v2614_v27  ;;  %v400_v44 = vsub.f32 %v2308_v59, %v2614_v27  ;;  %v770_v39 = vsub.f32 1.0, %v738_v43  ;;  %v593_v11 = vsub.f32 1.0, %v561_v37  ;;  %v2624_v57 = vsub.f32 %v253_v53, %v349_v18 }
  0x94   : > { %927 = vmatpush.msra.mxu1 %v851_v16  ;;  %1009 = vmatpush.msra.mxu3 %v674_v24  ;;  %v754_v46 = vand.u32 2147483647, %v722_v17  ;;  %v2626_v5 = vfloor.f32 %v268_v54  ;;  %v284_v25 = vmul.f32 0.0625, %v252_v52  ;;  %v577_v23 = vand.u32 2147483647, %v545_v28 }
  0x95   : > { %3224 = vst [vmem:[#allocation38_spill] sm:$0xff] %v2624_v57  ;;  %v432_v9 = vand.u32 2147483647, %v400_v44  ;;  %v2628_v26 = vmax.f32 %v770_v39, 0.0  ;;  %v625_v2 = vmax.f32 %v593_v11, 0.0  ;;  %v416_v43 = vsub.f32 %v2308_v59, %v2624_v57 }
  0x96   : > { %3225 = vst [vmem:[#allocation39_spill] sm:$0xff] %v2626_v5  ;;  %v786_v37 = vsub.f32 1.0, %v754_v46  ;;  %v332_v27 = vmul.f32 16.0, %v2626_v5  ;;  %v705_v16 = vsub.f32 %v2312_v61, %v2626_v5  ;;  %v609_v24 = vsub.f32 1.0, %v577_v23 }
  0x97   : > { %3226 = vst [vmem:[#allocation40_spill] sm:$0xff] %v2628_v26  ;;  %v464_v53 = vsub.f32 1.0, %v432_v9  ;;  %v2635_v18 = vfloor.f32 %v284_v25  ;;  %v528_v54 = vsub.f32 %v2310_v60, %v2626_v5  ;;  %v448_v17 = vand.u32 2147483647, %v416_v43 }
  0x98   : > { %v2639_v44 = vmax.f32 %v786_v37, 0.0  ;;  %v2641_v11 = vsub.f32 %v236_v58, %v332_v27  ;;  %v737_v39 = vand.u32 2147483647, %v705_v16  ;;  %v641_v46 = vmax.f32 %v609_v24, 0.0 }
  0x99   : > { %3227 = vst [vmem:[#allocation41_spill] sm:$0xff] %v2635_v18  ;;  %v496_v28 = vmax.f32 %v464_v53, 0.0  ;;  %v348_v7 = vmul.f32 16.0, %v2635_v18  ;;  %v721_v57 = vsub.f32 %v2312_v61, %v2635_v18  ;;  %v480_v9 = vsub.f32 1.0, %v448_v17 }
  0x9a   : > { %3228 = vst [vmem:[#allocation42_spill] sm:$0xff] %v2639_v44  ;;  %v399_v23 = vsub.f32 %v2308_v59, %v2641_v11  ;;  %v769_v25 = vsub.f32 1.0, %v737_v39  ;;  %v560_v12 = vand.u32 2147483647, %v528_v54  ;;  %v544_v54 = vsub.f32 %v2310_v60, %v2635_v18 }
  0x9b   : > { %3229 = vst [vmem:[#allocation43_spill] sm:$0xff] %v2641_v11  ;;  %v834_v43 = vmul.f32 %v2628_v26, %v496_v28  ;;  %v657_v37 = vmul.f32 %v625_v2, %v496_v28  ;;  %v2649_v5 = vsub.f32 %v252_v52, %v348_v7  ;;  %v753_v58 = vand.u32 2147483647, %v721_v57 }
  0x9c   : > { %v512_v27 = vmax.f32 %v480_v9, 0.0  ;;  %v431_v16 = vand.u32 2147483647, %v399_v23  ;;  %v2651_v53 = vmax.f32 %v769_v25, 0.0  ;;  %v592_v24 = vsub.f32 1.0, %v560_v12 }
  0x9d   : > { %3230 = vst [vmem:[#allocation44_spill] sm:$0xff] %v2649_v5  ;;  %887 = vmatpush.msra.mxu0 %v834_v43  ;;  %969 = vmatpush.msra.mxu2 %v657_v37  ;;  %v415_v17 = vsub.f32 %v2308_v59, %v2649_v5  ;;  %v785_v63 = vsub.f32 1.0, %v753_v58  ;;  %v235_v39 = vcvt.s32.f32 %v2612_v1  ;;  %v576_v12 = vand.u32 2147483647, %v544_v54 }
  0x9e   : > { %3231 = vst [vmem:[#allocation45_spill] sm:$0xff] %v2651_v53  ;;  %v850_v2 = vmul.f32 %v2639_v44, %v512_v27  ;;  %v673_v7 = vmul.f32 %v641_v46, %v512_v27  ;;  %v463_v52 = vsub.f32 1.0, %v431_v16  ;;  %v624_v57 = vmax.f32 %v592_v24, 0.0 }
  0x9f   : > { %v447_v28 = vand.u32 2147483647, %v415_v17  ;;  %v2659_v9 = vmax.f32 %v785_v63, 0.0  ;;  %v267_v23 = vmul.f32 0.0625, %v235_v39  ;;  %v219_v43 = vadd.s32 152, %v2245_v3 }
  0xa0   : > { %928 = vmatpush.msra.mxu1 %v850_v2  ;;  %1010 = vmatpush.msra.mxu3 %v673_v7  ;;  %v495_v25 = vmax.f32 %v463_v52, 0.0  ;;  %v202_v37 = vadd.s32 16, %v2245_v3  ;;  %v2664_v58 = vadd.s32 144, %v2245_v3  ;;  %v608_v44 = vsub.f32 1.0, %v576_v12 }
  0xa1   : > { %3232 = vst [vmem:[#allocation46_spill] sm:$0xff] %v2659_v9  ;;  %v479_v1 = vsub.f32 1.0, %v447_v28  ;;  %v2666_v46 = vfloor.f32 %v267_v23  ;;  %v2669_v27 = vadd.s32 8, %v2245_v3  ;;  %v251_v24 = vcvt.s32.f32 %v219_v43 }
  0xa2   : > { %v833_v63 = vmul.f32 %v2651_v53, %v495_v25  ;;  %v656_v16 = vmul.f32 %v624_v57, %v495_v25  ;;  %v234_v17 = vcvt.s32.f32 %v202_v37  ;;  %v640_v2 = vmax.f32 %v608_v44, 0.0 }
  0xa3   : > { %3233 = vst [vmem:[#allocation47_spill] sm:$0xff] %v2666_v46  ;;  %v511_v54 = vmax.f32 %v479_v1, 0.0  ;;  %v331_v7 = vmul.f32 16.0, %v2666_v46  ;;  %v704_v52 = vsub.f32 %v2312_v61, %v2666_v46  ;;  %v283_v28 = vmul.f32 0.0625, %v251_v24 }
  0xa4   : > { %888 = vmatpush.msra.mxu0 %v833_v63  ;;  %970 = vmatpush.msra.mxu2 %v656_v16  ;;  %v527_v12 = vsub.f32 %v2310_v60, %v2666_v46  ;;  %v266_v23 = vmul.f32 0.0625, %v234_v17  ;;  %v250_v26 = vcvt.s32.f32 %v2664_v58 }
  0xa5   : > { %v849_v57 = vmul.f32 %v2659_v9, %v511_v54  ;;  %v672_v25 = vmul.f32 %v640_v2, %v511_v54  ;;  %v2679_v43 = vsub.f32 %v235_v39, %v331_v7  ;;  %v736_v44 = vand.u32 2147483647, %v704_v52 }
  0xa6   : > { %v2681_v37 = vfloor.f32 %v283_v28  ;;  %v559_v1 = vand.u32 2147483647, %v527_v12  ;;  %v2683_v53 = vfloor.f32 %v266_v23  ;;  %v282_v63 = vmul.f32 0.0625, %v250_v26 }
  0xa7   : > { %3234 = vst [vmem:[#allocation48_spill] sm:$0xff] %v2679_v43  ;;  %929 = vmatpush.msra.mxu1 %v849_v57  ;;  %1011 = vmatpush.msra.mxu3 %v672_v25  ;;  %v398_v16 = vsub.f32 %v2308_v59, %v2679_v43  ;;  %v768_v46 = vsub.f32 1.0, %v736_v44  ;;  %v2689_v9 = vadd.s32 136, %v2245_v3 }
  0xa8   : > { %3235 = vst [vmem:[#allocation49_spill] sm:$0xff] %v2681_v37  ;;  %v347_v39 = vmul.f32 16.0, %v2681_v37  ;;  %v720_v54 = vsub.f32 %v2312_v61, %v2681_v37  ;;  %v591_v2 = vsub.f32 1.0, %v559_v1  ;;  %v543_v7 = vsub.f32 %v2310_v60, %v2681_v37 }
  0xa9   : > { %3236 = vst [vmem:[#allocation50_spill] sm:$0xff] %v2683_v53  ;;  %v430_v52 = vand.u32 2147483647, %v398_v16  ;;  %v2696_v28 = vmax.f32 %v768_v46, 0.0  ;;  %v330_v12 = vmul.f32 16.0, %v2683_v53  ;;  %v703_v23 = vsub.f32 %v2312_v61, %v2683_v53 }
  0xaa   : > { %v2701_v57 = vsub.f32 %v251_v24, %v347_v39  ;;  %v752_v25 = vand.u32 2147483647, %v720_v54  ;;  %v623_v44 = vmax.f32 %v591_v2, 0.0  ;;  %v575_v58 = vand.u32 2147483647, %v543_v7 }
  0xab   : > { %3237 = vst [vmem:[#allocation51_spill] sm:$0xff] %v2696_v28  ;;  %v462_v43 = vsub.f32 1.0, %v430_v52  ;;  %v2703_v18 = vsub.f32 %v234_v17, %v330_v12  ;;  %v735_v1 = vand.u32 2147483647, %v703_v23  ;;  %v2705_v5 = vfloor.f32 %v282_v63 }
  0xac   : > { %v414_v46 = vsub.f32 %v2308_v59, %v2701_v57  ;;  %v784_v16 = vsub.f32 1.0, %v752_v25  ;;  %v607_v37 = vsub.f32 1.0, %v575_v58  ;;  %v526_v11 = vsub.f32 %v2310_v60, %v2683_v53 }
  0xad   : > { %3238 = vst [vmem:[#allocation52_spill] sm:$0xff] %v2703_v18  ;;  %v494_v14 = vmax.f32 %v462_v43, 0.0  ;;  %v397_v24 = vsub.f32 %v2308_v59, %v2703_v18  ;;  %v767_v39 = vsub.f32 1.0, %v735_v1  ;;  %v346_v54 = vmul.f32 16.0, %v2705_v5 }
  0xae   : > { %3239 = vst [vmem:[#allocation53_spill] sm:$0xff] %v2705_v5  ;;  %v446_v17 = vand.u32 2147483647, %v414_v46  ;;  %v2714_v2 = vmax.f32 %v784_v16, 0.0  ;;  %v639_v63 = vmax.f32 %v607_v37, 0.0  ;;  %v719_v7 = vsub.f32 %v2312_v61, %v2705_v5 }
  0xaf   : > { %v832_v52 = vmul.f32 %v2696_v28, %v494_v14  ;;  %v655_v58 = vmul.f32 %v623_v44, %v494_v14  ;;  %v429_v12 = vand.u32 2147483647, %v397_v24  ;;  %v2719_v23 = vmax.f32 %v767_v39, 0.0 }
  0xb0   : > { %v478_v43 = vsub.f32 1.0, %v446_v17  ;;  %v2721_v25 = vsub.f32 %v250_v26, %v346_v54  ;;  %v751_v53 = vand.u32 2147483647, %v719_v7  ;;  %v558_v1 = vand.u32 2147483647, %v526_v11 }
  0xb1   : > { %3240 = vst [vmem:[#allocation54_spill] sm:$0xff] %v2719_v23  ;;  %889 = vmatpush.msra.mxu0 %v832_v52  ;;  %971 = vmatpush.msra.mxu2 %v655_v58  ;;  %v461_v46 = vsub.f32 1.0, %v429_v12  ;;  %v542_v37 = vsub.f32 %v2310_v60, %v2705_v5  ;;  %v3241_v16 = vcvt.s32.f32 %v2669_v27  ;;  %v249_v28 = vcvt.s32.f32 %v2689_v9 }
  0xb2   : > { %v510_v14 = vmax.f32 %v478_v43, 0.0  ;;  %v413_v44 = vsub.f32 %v2308_v59, %v2721_v25  ;;  %v783_v24 = vsub.f32 1.0, %v751_v53  ;;  %v590_v26 = vsub.f32 1.0, %v558_v1 }
  0xb3   : > { %v265_v18 = vmul.f32 0.0625, %v3241_v16  ;;  %v493_v39 = vmax.f32 %v461_v46, 0.0  ;;  %v574_v54 = vand.u32 2147483647, %v542_v37  ;;  %v281_v17 = vmul.f32 0.0625, %v249_v28 }
  0xb4   : > { %v848_v7 = vmul.f32 %v2714_v2, %v510_v14  ;;  %v671_v52 = vmul.f32 %v639_v63, %v510_v14  ;;  %v445_v58 = vand.u32 2147483647, %v413_v44  ;;  %v2733_v12 = vmax.f32 %v783_v24, 0.0 }
  0xb5   : > { %v2730_v11 = vfloor.f32 %v265_v18  ;;  %v831_v16 = vmul.f32 %v2719_v23, %v493_v39  ;;  %v622_v9 = vmax.f32 %v590_v26, 0.0  ;;  %v606_v43 = vsub.f32 1.0, %v574_v54 }
  0xb6   : > { %3243 = vst [vmem:[#allocation56_spill] sm:$0xff] %v2733_v12  ;;  %930 = vmatpush.msra.mxu1 %v848_v7  ;;  %1012 = vmatpush.msra.mxu3 %v671_v52  ;;  %v477_v53 = vsub.f32 1.0, %v445_v58  ;;  %v2739_v1 = vfloor.f32 %v281_v17  ;;  %v3245_v14 = vcvt.s32.f32 %v2669_v27  ;;  %v232_v24 = vcvt.s32.f32 %v2245_v3 }
  0xb7   : > { %3242 = vst [vmem:[#allocation55_spill] sm:$0xff] %v2730_v11  ;;  %v329_v5 = vmul.f32 16.0, %v2730_v11  ;;  %v702_v18 = vsub.f32 %v2312_v61, %v2730_v11  ;;  %v525_v63 = vsub.f32 %v2310_v60, %v2730_v11  ;;  %890 = vmatpush.msra.mxu0 %v831_v16  ;;  %v654_v46 = vmul.f32 %v622_v9, %v493_v39 }
  0xb8   : > { %3244 = vst [vmem:[#allocation57_spill] sm:$0xff] %v2739_v1  ;;  %v638_v37 = vmax.f32 %v606_v43, 0.0  ;;  %v509_v26 = vmax.f32 %v477_v53, 0.0  ;;  %v345_v7 = vmul.f32 16.0, %v2739_v1  ;;  %v718_v17 = vsub.f32 %v2312_v61, %v2739_v1 }
  0xb9   : > { %v2745_v44 = vsub.f32 %v3245_v14, %v329_v5  ;;  %v734_v54 = vand.u32 2147483647, %v702_v18  ;;  %972 = vmatpush.msra.mxu2 %v654_v46  ;;  %v557_v58 = vand.u32 2147483647, %v525_v63  ;;  %v541_v39 = vsub.f32 %v2310_v60, %v2739_v1 }
  0xba   : > { %v264_v27 = vmul.f32 0.0625, %v232_v24  ;;  %v847_v5 = vmul.f32 %v2733_v12, %v509_v26  ;;  %v670_v16 = vmul.f32 %v638_v37, %v509_v26  ;;  %v2756_v43 = vsub.f32 %v249_v28, %v345_v7 }
  0xbb   : > { %v396_v52 = vsub.f32 %v2308_v59, %v2745_v44  ;;  %v766_v9 = vsub.f32 1.0, %v734_v54  ;;  %v750_v18 = vand.u32 2147483647, %v718_v17  ;;  %v589_v14 = vsub.f32 1.0, %v557_v58 }
  0xbc   : > { %3246 = vst [vmem:[#allocation58_spill] sm:$0xff] %v2756_v43  ;;  %v2758_v23 = vfloor.f32 %v264_v27  ;;  %931 = vmatpush.msra.mxu1 %v847_v5  ;;  %1013 = vmatpush.msra.mxu3 %v670_v16  ;;  %v412_v63 = vsub.f32 %v2308_v59, %v2756_v43  ;;  %v573_v1 = vand.u32 2147483647, %v541_v39  ;;  %v216_v11 = vadd.s32 128, %v2245_v3 }
  0xbd   : > { %v428_v53 = vand.u32 2147483647, %v396_v52  ;;  %v2760_v46 = vmax.f32 %v766_v9, 0.0  ;;  %v782_v37 = vsub.f32 1.0, %v750_v18  ;;  %v621_v28 = vmax.f32 %v589_v14, 0.0  ;;  %v195_v18 = vld [vmem:[%s2239_s8 + $0x8] sm:$0xff] }
  0xbe   : > { %3247 = vst [vmem:[#allocation59_spill] sm:$0xff] %v2758_v23  ;;  %v328_v26 = vmul.f32 16.0, %v2758_v23  ;;  %v444_v54 = vand.u32 2147483647, %v412_v63  ;;  %v605_v7 = vsub.f32 1.0, %v573_v1  ;;  %v701_v17 = vsub.f32 %v2312_v61, %v2758_v23 }
  0xbf   : > { %3248 = vst [vmem:[#allocation60_spill] sm:$0xff] %v2760_v46  ;;  %v460_v12 = vsub.f32 1.0, %v428_v53  ;;  %v248_v52 = vcvt.s32.f32 %v216_v11  ;;  %v2768_v27 = vmax.f32 %v782_v37, 0.0  ;;  %v524_v3 = vsub.f32 %v2310_v60, %v2758_v23 }
  0xc0   : > { %v2770_v5 = vsub.f32 %v232_v24, %v328_v26  ;;  %v476_v39 = vsub.f32 1.0, %v444_v54  ;;  %v637_v16 = vmax.f32 %v605_v7, 0.0  ;;  %v733_v9 = vand.u32 2147483647, %v701_v17  ;;  %v2093_v24 = vld [vmem:[%s2239_s8] sm:$0xff] }
  0xc1   : > { %v492_v58 = vmax.f32 %v460_v12, 0.0  ;;  %3249 = vst [vmem:[#allocation61_spill] sm:$0xff] %v2768_v27  ;;  %v280_v53 = vmul.f32 0.0625, %v248_v52  ;;  %v556_v12 = vand.u32 2147483647, %v524_v3  ;;  %v1307_v26 = vadd.f32 1.0, %v2093_v24 }
  0xc2   : > { %v395_v11 = vsub.f32 %v2308_v59, %v2770_v5  ;;  %v508_v63 = vmax.f32 %v476_v39, 0.0  ;;  %v765_v37 = vsub.f32 1.0, %v733_v9  ;;  %v1309_v17 = vadd.f32 1.0, %v195_v18 }
  0xc3   : > { %v830_v1 = vmul.f32 %v2760_v46, %v492_v58  ;;  %v653_v14 = vmul.f32 %v621_v28, %v492_v58  ;;  %v2778_v43 = vfloor.f32 %v280_v53  ;;  %v588_v7 = vsub.f32 1.0, %v556_v12 }
  0xc4   : > { %v427_v54 = vand.u32 2147483647, %v395_v11  ;;  %v1056_v23 = vsub.f32 %v2310_v60, %v2280_v45  ;;  %v846_v28 = vmul.f32 %v2768_v27, %v508_v63  ;;  %v669_v58 = vmul.f32 %v637_v16, %v508_v63 }
  0xc5   : > { %891 = vmatpush.msra.mxu0 %v830_v1  ;;  %973 = vmatpush.msra.mxu2 %v653_v14  ;;  %v2784_v46 = vmax.f32 %v765_v37, 0.0  ;;  %v344_v3 = vmul.f32 16.0, %v2778_v43  ;;  %v717_v9 = vsub.f32 %v2312_v61, %v2778_v43  ;;  %v620_v53 = vmax.f32 %v588_v7, 0.0 }
  0xc6   : > { %v459_v39 = vsub.f32 1.0, %v427_v54  ;;  %v540_v1 = vsub.f32 %v2310_v60, %v2778_v43  ;;  %932 = vmatpush.msra.mxu1 %v846_v28  ;;  %1014 = vmatpush.msra.mxu3 %v669_v58  ;;  %v1308_v14 = vmul.f32 7.5, %v1307_v26  ;;  %v1310_v11 = vmul.f32 7.5, %v1309_v17 }
  0xc7   : > { %3250 = vst [vmem:[#allocation62_spill] sm:$0xff] %v2784_v46  ;;  %v2791_v18 = vsub.f32 %v248_v52, %v344_v3  ;;  %v1088_v12 = vand.u32 2147483647, %v1056_v23  ;;  %v749_v63 = vand.u32 2147483647, %v717_v9  ;;  %v1072_v24 = vsub.f32 %v2310_v60, %v2282_v47  ;;  %v861_v23 = vld [vmem:[#allocation3 + $0x10] sm:$0xff] }
  0xc8   : > { %v491_v16 = vmax.f32 %v459_v39, 0.0  ;;  %v572_v37 = vand.u32 2147483647, %v540_v1  ;;  %v2797_v54 = vperm.slane %v1308_v14, 7  ;;  %v2799_v7 = vperm.slane %v1310_v11, 0  ;;  %v684_v3 = vld [vmem:[#allocation3] sm:$0xff] }
  0xc9   : > { %v411_v61 = vsub.f32 %v2308_v59, %v2791_v18  ;;  %v1120_v28 = vsub.f32 1.0, %v1088_v12  ;;  %v781_v58 = vsub.f32 1.0, %v749_v63 }
  0xca   : > { %v829_v52 = vmul.f32 %v2784_v46, %v491_v16  ;;  %v652_v26 = vmul.f32 %v620_v53, %v491_v16  ;;  %v604_v17 = vsub.f32 1.0, %v572_v37  ;;  %v1327_v9 = vsub.f32 %v2797_v54, %v2280_v45 }
  0xcb   : > { %v443_v39 = vand.u32 2147483647, %v411_v61  ;;  %v1456_v1 = vsub.f32 %v2799_v7, %v2259_v30  ;;  %v1343_v59 = vsub.f32 %v2797_v54, %v2282_v47  ;;  %v2808_v14 = vmax.f32 %v781_v58, 0.0 }
  0xcc   : > { %892 = vmatpush.msra.mxu0 %v829_v52  ;;  %974 = vmatpush.msra.mxu2 %v652_v26  ;;  %v636_v11 = vmax.f32 %v604_v17, 0.0  ;;  %v1472_v53 = vsub.f32 %v2799_v7, %v2261_v31  ;;  %v1152_v12 = vmax.f32 %v1120_v28, 0.0  ;;  %v1359_v63 = vand.u32 2147483647, %v1327_v9  ;;  %v862_v9 = vld [vmem:[#allocation3 + $0x18] sm:$0xff] }
  0xcd   : > { %v475_v16 = vsub.f32 1.0, %v443_v39  ;;  %893 = vmatmul.f32.vlgmr.msra.gmra.mxu0 %v861_v23  ;;  %975 = vmatmul.f32.vlgmr.msra.gmra.mxu2 %v684_v3  ;;  %v1488_v45 = vand.u32 2147483647, %v1456_v1  ;;  %v1326_v30 = vsub.f32 %v2797_v54, %v2284_v48  ;;  %v1375_v37 = vand.u32 2147483647, %v1343_v59  ;;  %v685_v1 = vld [vmem:[#allocation3 + $0x8] sm:$0xff] }
  0xce   : > { %v1504_v61 = vand.u32 2147483647, %v1472_v53  ;;  %v1184_v47 = vmul.f32 %v1152_v12, %v2340_v38  ;;  %v1104_v52 = vand.u32 2147483647, %v1072_v24  ;;  %v1391_v26 = vsub.f32 1.0, %v1359_v63  ;;  %v863_v63 = vld [vmem:[#allocation3 + $0x50] sm:$0xff] }
  0xcf   : > { %v507_v58 = vmax.f32 %v475_v16, 0.0  ;;  %v1520_v17 = vsub.f32 1.0, %v1488_v45  ;;  %v1358_v46 = vand.u32 2147483647, %v1326_v30  ;;  %v1407_v27 = vsub.f32 1.0, %v1375_v37 }
  0xd0   : > { %v1536_v31 = vsub.f32 1.0, %v1504_v61  ;;  %1217 = vmatpush.msrb.mxu0 %v1184_v47  ;;  %v1136_v28 = vsub.f32 1.0, %v1104_v52  ;;  %v1455_v23 = vsub.f32 %v2799_v7, %v2263_v32  ;;  %v1423_v59 = vmax.f32 %v1391_v26, 0.0  ;;  %v686_v47 = vld [vmem:[#allocation3 + $0x40] sm:$0xff] }
  0xd1   : > { %v845_v3 = vmul.f32 %v2808_v14, %v507_v58  ;;  %v668_v39 = vmul.f32 %v636_v11, %v507_v58  ;;  %v1552_v53 = vmax.f32 %v1520_v17, 0.0  ;;  %v1439_v38 = vmax.f32 %v1407_v27, 0.0 }
  0xd2   : > { %v1568_v24 = vmax.f32 %v1536_v31, 0.0  ;;  %v1168_v12 = vmax.f32 %v1136_v28, 0.0  ;;  %v1390_v16 = vsub.f32 1.0, %v1358_v46  ;;  %v1487_v30 = vand.u32 2147483647, %v1455_v23 }
  0xd3   : > { %933 = vmatpush.msra.mxu1 %v845_v3  ;;  %1015 = vmatpush.msra.mxu3 %v668_v39  ;;  %v1584_v45 = vmul.f32 %v1552_v53, %v1423_v59  ;;  %v1342_v37 = vsub.f32 %v2797_v54, %v2286_v49  ;;  %v1471_v32 = vsub.f32 %v2799_v7, %v2265_v33 }
  0xd4   : > { %934 = vmatmul.f32.vlgmr.msra.gmra.mxu1 %v862_v9  ;;  %1016 = vmatmul.f32.vlgmr.msra.gmra.mxu3 %v685_v1  ;;  %v1600_v11 = vmul.f32 %v1568_v24, %v1439_v38  ;;  %v1200_v61 = vmul.f32 %v1168_v12, %v2342_v41  ;;  %v1422_v27 = vmax.f32 %v1390_v16, 0.0  ;;  %v1055_v46 = vsub.f32 %v2310_v60, %v2284_v48  ;;  %v864_v12 = vld [vmem:[#allocation3 + $0x58] sm:$0xff]  ;;  %v687_v16 = vld [vmem:[#allocation3 + $0x48] sm:$0xff] }
  0xd5   : > { %1617 = vmatpush.msrb.mxu2 %v1584_v45  ;;  %v1519_v52 = vsub.f32 1.0, %v1487_v30  ;;  %v1374_v58 = vand.u32 2147483647, %v1342_v37  ;;  %v1503_v26 = vand.u32 2147483647, %v1471_v32  ;;  %896 = vmatmul.f32.gmra.mxu0 %v863_v63  ;;  %v1071_v17 = vsub.f32 %v2310_v60, %v2286_v49  ;;  %v865_v32 = vld [vmem:[#allocation3 + $0x90] sm:$0xff] }
  0xd6   : > { %1658 = vmatpush.msrb.mxu3 %v1600_v11  ;;  %1258 = vmatpush.msrb.mxu1 %v1200_v61  ;;  %v1087_v33 = vand.u32 2147483647, %v1055_v46  ;;  %v1325_v31 = vsub.f32 %v2797_v54, %v2288_v50  ;;  %v1454_v41 = vsub.f32 %v2799_v7, %v2267_v34  ;;  %v1341_v48 = vsub.f32 %v2797_v54, %v2298_v55 }
  0xd7   : > { %v1551_v28 = vmax.f32 %v1519_v52, 0.0  ;;  %v1406_v23 = vsub.f32 1.0, %v1374_v58  ;;  %v1535_v3 = vsub.f32 1.0, %v1503_v26  ;;  %978 = vmatmul.f32.gmra.mxu2 %v686_v47  ;;  %v1103_v39 = vand.u32 2147483647, %v1071_v17  ;;  %v688_v26 = vld [vmem:[#allocation3 + $0x80] sm:$0xff] }
  0xd8   : > { %v1119_v9 = vsub.f32 1.0, %v1087_v33  ;;  %v1357_v1 = vand.u32 2147483647, %v1325_v31  ;;  %v1486_v49 = vand.u32 2147483647, %v1454_v41  ;;  %v1470_v59 = vsub.f32 %v2799_v7, %v2269_v35 }
  0xd9   : > { %v1583_v53 = vmul.f32 %v1551_v28, %v1422_v27  ;;  %v1438_v38 = vmax.f32 %v1406_v23, 0.0  ;;  %v1567_v24 = vmax.f32 %v1535_v3, 0.0  ;;  %v1135_v34 = vsub.f32 1.0, %v1103_v39 }
  0xda   : > { %v1151_v63 = vmax.f32 %v1119_v9, 0.0  ;;  %v1389_v45 = vsub.f32 1.0, %v1357_v1  ;;  %v1518_v30 = vsub.f32 1.0, %v1486_v49  ;;  %v1373_v37 = vand.u32 2147483647, %v1341_v48 }
  0xdb   : > { %1618 = vmatpush.msrb.mxu2 %v1583_v53  ;;  %v1599_v11 = vmul.f32 %v1567_v24, %v1438_v38  ;;  %v1167_v61 = vmax.f32 %v1135_v34, 0.0  ;;  %v1502_v47 = vand.u32 2147483647, %v1470_v59  ;;  %v1054_v46 = vsub.f32 %v2310_v60, %v2288_v50  ;;  %v866_v24 = vld [vmem:[#allocation3 + $0x98] sm:$0xff] }
  0xdc   : > { %937 = vmatmul.f32.gmra.mxu1 %v864_v12  ;;  %1019 = vmatmul.f32.gmra.mxu3 %v687_v16  ;;  %v1183_v35 = vmul.f32 %v1151_v63, %v2346_v8  ;;  %v1421_v27 = vmax.f32 %v1389_v45, 0.0  ;;  %v1550_v52 = vmax.f32 %v1518_v30, 0.0  ;;  %v1405_v58 = vsub.f32 1.0, %v1373_v37  ;;  %v689_v12 = vld [vmem:[#allocation3 + $0x88] sm:$0xff] }
  0xdd   : > { %1659 = vmatpush.msrb.mxu3 %v1599_v11  ;;  %v1199_v17 = vmul.f32 %v1167_v61, %v2358_v19  ;;  %v1534_v33 = vsub.f32 1.0, %v1502_v47  ;;  %v1086_v31 = vand.u32 2147483647, %v1054_v46  ;;  %v1070_v41 = vsub.f32 %v2310_v60, %v2298_v55  ;;  %899 = vmatmul.f32.gmra.mxu0 %v865_v32  ;;  %v867_v11 = vld [vmem:[#allocation3 + $0xd0] sm:$0xff] }
  0xde   : > { %1218 = vmatpush.msrb.mxu0 %v1183_v35  ;;  %v1582_v48 = vmul.f32 %v1550_v52, %v1421_v27  ;;  %v1437_v50 = vmax.f32 %v1405_v58, 0.0  ;;  %v1324_v28 = vsub.f32 %v2797_v54, %v2300_v56  ;;  %v1453_v8 = vsub.f32 %v2799_v7, %v2271_v36  ;;  %v690_v35 = vld [vmem:[#allocation3 + $0xc0] sm:$0xff] }
  0xdf   : > { %1259 = vmatpush.msrb.mxu1 %v1199_v17  ;;  %v1566_v23 = vmax.f32 %v1534_v33, 0.0  ;;  %v1118_v3 = vsub.f32 1.0, %v1086_v31  ;;  %v1102_v39 = vand.u32 2147483647, %v1070_v41  ;;  %v1340_v19 = vsub.f32 %v2797_v54, %v2380_v51  ;;  %981 = vmatmul.f32.gmra.mxu2 %v688_v26 }
  0xe0   : > { %1619 = vmatpush.msrb.mxu2 %v1582_v48  ;;  %v1356_v55 = vand.u32 2147483647, %v1324_v28  ;;  %v1485_v9 = vand.u32 2147483647, %v1453_v8  ;;  %v1469_v1 = vsub.f32 %v2799_v7, %v2314_v62  ;;  %v1053_v49 = vsub.f32 %v2310_v60, %v2300_v56 }
  0xe1   : > { %v1598_v59 = vmul.f32 %v1566_v23, %v1437_v50  ;;  %v1150_v53 = vmax.f32 %v1118_v3, 0.0  ;;  %v1134_v36 = vsub.f32 1.0, %v1102_v39  ;;  %v1372_v38 = vand.u32 2147483647, %v1340_v19  ;;  %v691_v3 = vld [vmem:[#allocation3 + $0xc8] sm:$0xff] }
  0xe2   : > { %v1388_v16 = vsub.f32 1.0, %v1356_v55  ;;  %v1517_v34 = vsub.f32 1.0, %v1485_v9  ;;  %v1501_v63 = vand.u32 2147483647, %v1469_v1  ;;  %v1085_v45 = vand.u32 2147483647, %v1053_v49 }
  0xe3   : > { %1660 = vmatpush.msrb.mxu3 %v1598_v59  ;;  %v1182_v30 = vmul.f32 %v1150_v53, %v2369_v6  ;;  %v1166_v37 = vmax.f32 %v1134_v36, 0.0  ;;  %v1404_v32 = vsub.f32 1.0, %v1372_v38  ;;  %v1069_v62 = vsub.f32 %v2310_v60, %v2380_v51  ;;  %v869_v38 = vld [vmem:[#allocation3 + $0x110] sm:$0xff] }
  0xe4   : > { %v1420_v56 = vmax.f32 %v1388_v16, 0.0  ;;  %v1549_v61 = vmax.f32 %v1517_v34, 0.0  ;;  %v1533_v47 = vsub.f32 1.0, %v1501_v63  ;;  %940 = vmatmul.f32.gmra.mxu1 %v866_v24  ;;  %1022 = vmatmul.f32.gmra.mxu3 %v689_v12  ;;  %v1117_v46 = vsub.f32 1.0, %v1085_v45  ;;  %v692_v24 = vld [vmem:[#allocation3 + $0x100] sm:$0xff] }
  0xe5   : > { %1219 = vmatpush.msrb.mxu0 %v1182_v30  ;;  %v1198_v27 = vmul.f32 %v1166_v37, %v2372_v21  ;;  %v1436_v52 = vmax.f32 %v1404_v32, 0.0  ;;  %v1101_v58 = vand.u32 2147483647, %v1069_v62  ;;  %v1323_v6 = vsub.f32 %v2797_v54, %v2414_v40 }
  0xe6   : > { %v1581_v26 = vmul.f32 %v1549_v61, %v1420_v56  ;;  %v1565_v17 = vmax.f32 %v1533_v47, 0.0  ;;  %v1149_v33 = vmax.f32 %v1117_v46, 0.0  ;;  %v1452_v51 = vsub.f32 %v2799_v7, %v2395_v13  ;;  %902 = vmatmul.f32.gmra.mxu0 %v867_v11  ;;  %v868_v13 = vld [vmem:[#allocation3 + $0xd8] sm:$0xff] }
  0xe7   : > { %1260 = vmatpush.msrb.mxu1 %v1198_v27  ;;  %v1133_v31 = vsub.f32 1.0, %v1101_v58  ;;  %v1355_v41 = vand.u32 2147483647, %v1323_v6  ;;  %v1339_v48 = vsub.f32 %v2797_v54, %v2428_v4  ;;  %v1468_v21 = vsub.f32 %v2799_v7, %v2407_v29  ;;  %984 = vmatmul.f32.gmra.mxu2 %v690_v35  ;;  %v3251_v35 = vld [vmem:[#allocation7_spill] sm:$0xff] }
  0xe8   : > { %1620 = vmatpush.msrb.mxu2 %v1581_v26  ;;  %v1597_v50 = vmul.f32 %v1565_v17, %v1436_v52  ;;  %v1181_v28 = vmul.f32 %v1149_v33, %v2393_v10  ;;  %v1484_v8 = vand.u32 2147483647, %v1452_v51  ;;  %v1052_v23 = vsub.f32 %v2310_v60, %v2414_v40  ;;  %v693_v51 = vld [vmem:[#allocation3 + $0x108] sm:$0xff] }
  0xe9   : > { %v1165_v39 = vmax.f32 %v1133_v31, 0.0  ;;  %v1387_v19 = vsub.f32 1.0, %v1355_v41  ;;  %v1371_v55 = vand.u32 2147483647, %v1339_v48  ;;  %v1500_v9 = vand.u32 2147483647, %v1468_v21 }
  0xea   : > { %1661 = vmatpush.msrb.mxu3 %v1597_v50  ;;  %1220 = vmatpush.msrb.mxu0 %v1181_v28  ;;  %v1516_v1 = vsub.f32 1.0, %v1484_v8  ;;  %v1084_v49 = vand.u32 2147483647, %v1052_v23  ;;  %v1068_v29 = vsub.f32 %v2310_v60, %v2428_v4  ;;  %v1322_v10 = vsub.f32 %v2797_v54, %v2436_v22  ;;  %v3252_v31 = vld [vmem:[#allocation8_spill] sm:$0xff]  ;;  %v3253_v48 = vld [vmem:[#allocation13_spill] sm:$0xff]  ;;  %v3254_v50 = vld [vmem:[#allocation10_spill] sm:$0xff] }
  0xeb   : > { %v1197_v59 = vmul.f32 %v1165_v39, %v2399_v15  ;;  %v1419_v53 = vmax.f32 %v1387_v19, 0.0  ;;  %v1403_v40 = vsub.f32 1.0, %v1371_v55  ;;  %v1532_v36 = vsub.f32 1.0, %v1500_v9  ;;  %v870_v8 = vld [vmem:[#allocation3 + $0x118] sm:$0xff]  ;;  %v871_v39 = vld [vmem:[#allocation3 + $0x150] sm:$0xff] }
  0xec   : > { %v1548_v12 = vmax.f32 %v1516_v1, 0.0  ;;  %v1116_v16 = vsub.f32 1.0, %v1084_v49  ;;  %v1100_v34 = vand.u32 2147483647, %v1068_v29  ;;  %v1354_v63 = vand.u32 2147483647, %v1322_v10  ;;  %943 = vmatmul.f32.gmra.mxu1 %v868_v13  ;;  %1025 = vmatmul.f32.gmra.mxu3 %v691_v3 }
  0xed   : > { %1261 = vmatpush.msrb.mxu1 %v1197_v59  ;;  %v1435_v45 = vmax.f32 %v1403_v40, 0.0  ;;  %v1564_v30 = vmax.f32 %v1532_v36, 0.0  ;;  %v1451_v4 = vsub.f32 %v2799_v7, %v2416_v20  ;;  %v1338_v15 = vsub.f32 %v2797_v54, %v2461_v0  ;;  %v3255_v9 = vld [vmem:[#allocation14_spill] sm:$0xff]  ;;  %v3256_v59 = vld [vmem:[#allocation12_spill] sm:$0xff]  ;;  %v694_v40 = vld [vmem:[#allocation3 + $0x140] sm:$0xff] }
  0xee   : > { %v1580_v37 = vmul.f32 %v1548_v12, %v1419_v53  ;;  %v1148_v32 = vmax.f32 %v1116_v16, 0.0  ;;  %v1132_v62 = vsub.f32 1.0, %v1100_v34  ;;  %v1386_v11 = vsub.f32 1.0, %v1354_v63  ;;  %905 = vmatmul.f32.gmra.mxu0 %v869_v38 }
  0xef   : > { %v1596_v56 = vmul.f32 %v1564_v30, %v1435_v45  ;;  %v1483_v61 = vand.u32 2147483647, %v1451_v4  ;;  %v1370_v47 = vand.u32 2147483647, %v1338_v15  ;;  %v1467_v46 = vsub.f32 %v2799_v7, %v2448_v42  ;;  %987 = vmatmul.f32.gmra.mxu2 %v692_v24  ;;  %v3257_v30 = vld [vmem:[#allocation9_spill] sm:$0xff] }
  0xf0   : > { %1621 = vmatpush.msrb.mxu2 %v1580_v37  ;;  %v1180_v27 = vmul.f32 %v1148_v32, %v3251_v35  ;;  %v1164_v52 = vmax.f32 %v1132_v62, 0.0  ;;  %v1418_v20 = vmax.f32 %v1386_v11, 0.0  ;;  %v1051_v58 = vsub.f32 %v2310_v60, %v2436_v22  ;;  %v3258_v62 = vld [vmem:[#allocation11_spill] sm:$0xff] }
  0xf1   : > { %1662 = vmatpush.msrb.mxu3 %v1596_v56  ;;  %v1515_v6 = vsub.f32 1.0, %v1483_v61  ;;  %v1402_v26 = vsub.f32 1.0, %v1370_v47  ;;  %v1499_v17 = vand.u32 2147483647, %v1467_v46  ;;  %v1067_v33 = vsub.f32 %v2310_v60, %v2461_v0  ;;  %v695_v46 = vld [vmem:[#allocation3 + $0x148] sm:$0xff] }
  0xf2   : > { %1221 = vmatpush.msrb.mxu0 %v1180_v27  ;;  %v1196_v42 = vmul.f32 %v1164_v52, %v3252_v31  ;;  %v1083_v41 = vand.u32 2147483647, %v1051_v58  ;;  %v1321_v21 = vsub.f32 %v2797_v54, %v3253_v48  ;;  %v1450_v28 = vsub.f32 %v2799_v7, %v3254_v50  ;;  %v3259_v52 = vld [vmem:[#allocation19_spill] sm:$0xff]  ;;  %v3260_v58 = vld [vmem:[#allocation16_spill] sm:$0xff]  ;;  %v3262_v50 = vld [vmem:[#allocation17_spill] sm:$0xff] }
  0xf3   : > { %v1547_v22 = vmax.f32 %v1515_v6, 0.0  ;;  %v1434_v23 = vmax.f32 %v1402_v26, 0.0  ;;  %v1531_v13 = vsub.f32 1.0, %v1499_v17  ;;  %v1099_v3 = vand.u32 2147483647, %v1067_v33  ;;  %v872_v26 = vld [vmem:[#allocation3 + $0x158] sm:$0xff] }
  0xf4   : > { %1262 = vmatpush.msrb.mxu1 %v1196_v42  ;;  %v1115_v19 = vsub.f32 1.0, %v1083_v41  ;;  %v1353_v0 = vand.u32 2147483647, %v1321_v21  ;;  %v1482_v55 = vand.u32 2147483647, %v1450_v28  ;;  %v1337_v1 = vsub.f32 %v2797_v54, %v3255_v9  ;;  %1028 = vmatmul.f32.gmra.mxu3 %v693_v51  ;;  %v3261_v31 = vld [vmem:[#allocation20_spill] sm:$0xff] }
  0xf5   : > { %v1579_v49 = vmul.f32 %v1547_v22, %v1418_v20  ;;  %v1563_v29 = vmax.f32 %v1531_v13, 0.0  ;;  %v1131_v10 = vsub.f32 1.0, %v1099_v3  ;;  %v1466_v53 = vsub.f32 %v2799_v7, %v3256_v59  ;;  %946 = vmatmul.f32.gmra.mxu1 %v870_v8  ;;  %v873_v41 = vld [vmem:[#allocation3 + $0x190] sm:$0xff] }
  0xf6   : > { %v1147_v36 = vmax.f32 %v1115_v19, 0.0  ;;  %v1385_v38 = vsub.f32 1.0, %v1353_v0  ;;  %v1514_v24 = vsub.f32 1.0, %v1482_v55  ;;  %v1369_v12 = vand.u32 2147483647, %v1337_v1  ;;  %908 = vmatmul.f32.gmra.mxu0 %v871_v39  ;;  %v696_v39 = vld [vmem:[#allocation3 + $0x180] sm:$0xff] }
  0xf7   : > { %1622 = vmatpush.msrb.mxu2 %v1579_v49  ;;  %v1595_v16 = vmul.f32 %v1563_v29, %v1434_v23  ;;  %v1163_v34 = vmax.f32 %v1131_v10, 0.0  ;;  %v1498_v63 = vand.u32 2147483647, %v1466_v53  ;;  %v1050_v45 = vsub.f32 %v2310_v60, %v3253_v48  ;;  %v3263_v1 = vld [vmem:[#allocation15_spill] sm:$0xff] }
  0xf8   : > { %v1179_v4 = vmul.f32 %v1147_v36, %v3257_v30  ;;  %v1417_v15 = vmax.f32 %v1385_v38, 0.0  ;;  %v1546_v37 = vmax.f32 %v1514_v24, 0.0  ;;  %v1401_v32 = vsub.f32 1.0, %v1369_v12  ;;  %990 = vmatmul.f32.gmra.mxu2 %v694_v40  ;;  %v3264_v24 = vld [vmem:[#allocation18_spill] sm:$0xff]  ;;  %v697_v30 = vld [vmem:[#allocation3 + $0x188] sm:$0xff] }
  0xf9   : > { %1663 = vmatpush.msrb.mxu3 %v1595_v16  ;;  %v1195_v11 = vmul.f32 %v1163_v34, %v3258_v62  ;;  %v1530_v56 = vsub.f32 1.0, %v1498_v63  ;;  %v1082_v61 = vand.u32 2147483647, %v1050_v45  ;;  %v1066_v47 = vsub.f32 %v2310_v60, %v3255_v9  ;;  %v3265_v63 = vld [vmem:[#allocation24_spill] sm:$0xff] }
  0xfa   : > { %1222 = vmatpush.msrb.mxu0 %v1179_v4  ;;  %v1578_v35 = vmul.f32 %v1546_v37, %v1417_v15  ;;  %v1433_v27 = vmax.f32 %v1401_v32, 0.0  ;;  %v1320_v20 = vsub.f32 %v2797_v54, %v3259_v52  ;;  %v1449_v6 = vsub.f32 %v2799_v7, %v3260_v58  ;;  %v3266_v32 = vld [vmem:[#allocation22_spill] sm:$0xff] }
  0xfb   : > { %1263 = vmatpush.msrb.mxu1 %v1195_v11  ;;  %v1562_v17 = vmax.f32 %v1530_v56, 0.0  ;;  %v1114_v33 = vsub.f32 1.0, %v1082_v61  ;;  %v1098_v51 = vand.u32 2147483647, %v1066_v47  ;;  %v1336_v42 = vsub.f32 %v2797_v54, %v3261_v31  ;;  %v874_v11 = vld [vmem:[#allocation3 + $0x198] sm:$0xff]  ;;  %v3267_v47 = vld [vmem:[#allocation28_spill] sm:$0xff] }
  0xfc   : > { %1623 = vmatpush.msrb.mxu2 %v1578_v35  ;;  %v1352_v48 = vand.u32 2147483647, %v1320_v20  ;;  %v1481_v21 = vand.u32 2147483647, %v1449_v6  ;;  %v1465_v28 = vsub.f32 %v2799_v7, %v3262_v50  ;;  %v1049_v8 = vsub.f32 %v2310_v60, %v3259_v52  ;;  %1031 = vmatmul.f32.gmra.mxu3 %v695_v46  ;;  %v3268_v35 = vld [vmem:[#allocation25_spill] sm:$0xff] }
  0xfd   : > { %v1594_v22 = vmul.f32 %v1562_v17, %v1433_v27  ;;  %v1146_v23 = vmax.f32 %v1114_v33, 0.0  ;;  %v1130_v13 = vsub.f32 1.0, %v1098_v51  ;;  %v1368_v3 = vand.u32 2147483647, %v1336_v42  ;;  %949 = vmatmul.f32.gmra.mxu1 %v872_v26  ;;  %v3269_v20 = vld [vmem:[#allocation21_spill] sm:$0xff] }
  0xfe   : > { %v1384_v19 = vsub.f32 1.0, %v1352_v48  ;;  %v1513_v0 = vsub.f32 1.0, %v1481_v21  ;;  %v1497_v55 = vand.u32 2147483647, %v1465_v28  ;;  %v1081_v9 = vand.u32 2147483647, %v1049_v8  ;;  %911 = vmatmul.f32.gmra.mxu0 %v873_v41 }
  0xff   : > { %1664 = vmatpush.msrb.mxu3 %v1594_v22  ;;  %v1178_v49 = vmul.f32 %v1146_v23, %v3263_v1  ;;  %v1162_v29 = vmax.f32 %v1130_v13, 0.0  ;;  %v1400_v10 = vsub.f32 1.0, %v1368_v3  ;;  %v1065_v59 = vsub.f32 %v2310_v60, %v3261_v31  ;;  %v3270_v21 = vld [vmem:[#allocation29_spill] sm:$0xff]  ;;  %v3271_v28 = vld [vmem:[#allocation23_spill] sm:$0xff] }
 0x100   : > { %v1416_v53 = vmax.f32 %v1384_v19, 0.0  ;;  %v1545_v40 = vmax.f32 %v1513_v0, 0.0  ;;  %v1529_v36 = vsub.f32 1.0, %v1497_v55  ;;  %v1113_v38 = vsub.f32 1.0, %v1081_v9  ;;  %993 = vmatmul.f32.gmra.mxu2 %v696_v39  ;;  %v3272_v1 = vld [vmem:[#allocation27_spill] sm:$0xff] }
 0x101   : > { %1223 = vmatpush.msrb.mxu0 %v1178_v49  ;;  %v1194_v12 = vmul.f32 %v1162_v29, %v3264_v24  ;;  %v1432_v16 = vmax.f32 %v1400_v10, 0.0  ;;  %v1097_v34 = vand.u32 2147483647, %v1065_v59  ;;  %v1319_v45 = vsub.f32 %v2797_v54, %v3265_v63  ;;  %v3273_v29 = vld [vmem:[#allocation33_spill] sm:$0xff] }
 0x102   : > { %v1577_v4 = vmul.f32 %v1545_v40, %v1416_v53  ;;  %v1561_v15 = vmax.f32 %v1529_v36, 0.0  ;;  %v1145_v37 = vmax.f32 %v1113_v38, 0.0  ;;  %v1448_v62 = vsub.f32 %v2799_v7, %v3266_v32 }
 0x103   : > { %1264 = vmatpush.msrb.mxu1 %v1194_v12  ;;  %v1129_v56 = vsub.f32 1.0, %v1097_v34  ;;  %v1351_v61 = vand.u32 2147483647, %v1319_v45  ;;  %v1335_v46 = vsub.f32 %v2797_v54, %v3267_v47  ;;  %v1464_v27 = vsub.f32 %v2799_v7, %v3268_v35 }
 0x104   : > { %1624 = vmatpush.msrb.mxu2 %v1577_v4  ;;  %v1593_v52 = vmul.f32 %v1561_v15, %v1432_v16  ;;  %v1177_v58 = vmul.f32 %v1145_v37, %v3269_v20  ;;  %v1480_v6 = vand.u32 2147483647, %v1448_v62  ;;  %v1048_v26 = vsub.f32 %v2310_v60, %v3265_v63  ;;  %1034 = vmatmul.f32.gmra.mxu3 %v697_v30  ;;  %v3274_v16 = vld [vmem:[#allocation30_spill] sm:$0xff]  ;;  %v3278_v20 = vld [vmem:[#allocation35_spill] sm:$0xff] }
 0x105   : > { %v1161_v17 = vmax.f32 %v1129_v56, 0.0  ;;  %v1383_v33 = vsub.f32 1.0, %v1351_v61  ;;  %v1367_v51 = vand.u32 2147483647, %v1335_v46  ;;  %v1496_v31 = vand.u32 2147483647, %v1464_v27  ;;  %952 = vmatmul.f32.gmra.mxu1 %v874_v11 }
 0x106   : > { %1665 = vmatpush.msrb.mxu3 %v1593_v52  ;;  %1224 = vmatpush.msrb.mxu0 %v1177_v58  ;;  %v1512_v42 = vsub.f32 1.0, %v1480_v6  ;;  %v1080_v41 = vand.u32 2147483647, %v1048_v26  ;;  %v1064_v48 = vsub.f32 %v2310_v60, %v3267_v47  ;;  %v1318_v50 = vsub.f32 %v2797_v54, %v3270_v21  ;;  %v3275_v63 = vld [vmem:[#allocation26_spill] sm:$0xff]  ;;  %v875_v56 = vld [vmem:[#allocation3 + $0x1d0] sm:$0xff]  ;;  %v3276_v47 = vld [vmem:[#allocation31_spill] sm:$0xff] }
 0x107   : > { %v1193_v8 = vmul.f32 %v1161_v17, %v3271_v28  ;;  %v1415_v22 = vmax.f32 %v1383_v33, 0.0  ;;  %v1399_v23 = vsub.f32 1.0, %v1367_v51  ;;  %v1528_v13 = vsub.f32 1.0, %v1496_v31  ;;  %v876_v61 = vld [vmem:[#allocation3 + $0x1d8] sm:$0xff]  ;;  %v3277_v27 = vld [vmem:[#allocation37_spill] sm:$0xff]  ;;  %v698_v6 = vld [vmem:[#allocation3 + $0x1c0] sm:$0xff]  ;;  %914 = vmatmul.f32.gmra.mxu0 %v875_v56 }
 0x108   : > { %v1544_v3 = vmax.f32 %v1512_v42, 0.0  ;;  %v1112_v39 = vsub.f32 1.0, %v1080_v41  ;;  %v1096_v19 = vand.u32 2147483647, %v1064_v48  ;;  %v1350_v0 = vand.u32 2147483647, %v1318_v50  ;;  %996 = vmatmul.f32.gmra.mxu2 %v698_v6 }
 0x109   : > { %1265 = vmatpush.msrb.mxu1 %v1193_v8  ;;  %v1431_v55 = vmax.f32 %v1399_v23, 0.0  ;;  %v1560_v9 = vmax.f32 %v1528_v13, 0.0  ;;  %v1447_v49 = vsub.f32 %v2799_v7, %v3272_v1  ;;  %v1334_v10 = vsub.f32 %v2797_v54, %v3273_v29  ;;  %v699_v26 = vld [vmem:[#allocation3 + $0x1c8] sm:$0xff] }
 0x10a   : > { %v1576_v59 = vmul.f32 %v1544_v3, %v1415_v22  ;;  %v1144_v53 = vmax.f32 %v1112_v39, 0.0  ;;  %v1128_v40 = vsub.f32 1.0, %v1096_v19  ;;  %v1382_v36 = vsub.f32 1.0, %v1350_v0  ;;  %v3280_v23 = vld [vmem:[#allocation36_spill] sm:$0xff] }
 0x10b   : > { %v1592_v38 = vmul.f32 %v1560_v9, %v1431_v55  ;;  %v1479_v24 = vand.u32 2147483647, %v1447_v49  ;;  %v1366_v12 = vand.u32 2147483647, %v1334_v10  ;;  %v1463_v34 = vsub.f32 %v2799_v7, %v3274_v16 }
 0x10c   : > { %1625 = vmatpush.msrb.mxu2 %v1576_v59  ;;  %v1176_v45 = vmul.f32 %v1144_v53, %v3275_v63  ;;  %v1160_v30 = vmax.f32 %v1128_v40, 0.0  ;;  %v1414_v4 = vmax.f32 %v1382_v36, 0.0  ;;  %v1047_v15 = vsub.f32 %v2310_v60, %v3270_v21  ;;  %v3279_v21 = vld [vmem:[#allocation38_spill] sm:$0xff]  ;;  %1037 = vmatmul.f32.gmra.mxu3 %v699_v26 }
 0x10d   : > { %1666 = vmatpush.msrb.mxu3 %v1592_v38  ;;  %v1511_v37 = vsub.f32 1.0, %v1479_v24  ;;  %v1398_v32 = vsub.f32 1.0, %v1366_v12  ;;  %v1495_v62 = vand.u32 2147483647, %v1463_v34  ;;  %v1063_v11 = vsub.f32 %v2310_v60, %v3273_v29  ;;  %955 = vmatmul.f32.gmra.mxu1 %v876_v61  ;;  %v3281_v29 = vld [vmem:[#allocation32_spill] sm:$0xff]  ;;  %v3282_v36 = vld [vmem:[#allocation34_spill] sm:$0xff] }
 0x10e   : > { %1225 = vmatpush.msrb.mxu0 %v1176_v45  ;;  %v1192_v46 = vmul.f32 %v1160_v30, %v3276_v47  ;;  %v1079_v35 = vand.u32 2147483647, %v1047_v15  ;;  %v1317_v52 = vsub.f32 %v2797_v54, %v3277_v27  ;;  %v1446_v58 = vsub.f32 %v2799_v7, %v3278_v20  ;;  %v3283_v45 = vld [vmem:[#allocation43_spill] sm:$0xff] }
 0x10f   : > { %v1543_v17 = vmax.f32 %v1511_v37, 0.0  ;;  %v1430_v33 = vmax.f32 %v1398_v32, 0.0  ;;  %v1527_v51 = vsub.f32 1.0, %v1495_v62  ;;  %v1095_v31 = vand.u32 2147483647, %v1063_v11  ;;  %v3285_v11 = vld [vmem:[#allocation44_spill] sm:$0xff] }
 0x110   : > { %1266 = vmatpush.msrb.mxu1 %v1192_v46  ;;  %v1111_v42 = vsub.f32 1.0, %v1079_v35  ;;  %v1349_v41 = vand.u32 2147483647, %v1317_v52  ;;  %v1478_v48 = vand.u32 2147483647, %v1446_v58  ;;  %v1333_v50 = vsub.f32 %v2797_v54, %v3279_v21  ;;  %v3286_v46 = vld [vmem:[#allocation41_spill] sm:$0xff] }
 0x111   : > { %v1575_v28 = vmul.f32 %v1543_v17, %v1414_v4  ;;  %v1559_v8 = vmax.f32 %v1527_v51, 0.0  ;;  %v1127_v22 = vsub.f32 1.0, %v1095_v31  ;;  %v1462_v13 = vsub.f32 %v2799_v7, %v3280_v23  ;;  %v3284_v4 = vld [vmem:[#allocation39_spill] sm:$0xff]  ;;  %v3287_v31 = vld [vmem:[#allocation40_spill] sm:$0xff]  ;;  %v3288_v23 = vld [vmem:[#allocation42_spill] sm:$0xff] }
 0x112   : > { %v1143_v3 = vmax.f32 %v1111_v42, 0.0  ;;  %v1381_v39 = vsub.f32 1.0, %v1349_v41  ;;  %v1510_v19 = vsub.f32 1.0, %v1478_v48  ;;  %v1365_v0 = vand.u32 2147483647, %v1333_v50 }
 0x113   : > { %1626 = vmatpush.msrb.mxu2 %v1575_v28  ;;  %v1591_v55 = vmul.f32 %v1559_v8, %v1430_v33  ;;  %v1159_v9 = vmax.f32 %v1127_v22, 0.0  ;;  %v1494_v1 = vand.u32 2147483647, %v1462_v13  ;;  %v1046_v49 = vsub.f32 %v2310_v60, %v3277_v27 }
 0x114   : > { %v1175_v10 = vmul.f32 %v1143_v3, %v3281_v29  ;;  %v1413_v59 = vmax.f32 %v1381_v39, 0.0  ;;  %v1542_v53 = vmax.f32 %v1510_v19, 0.0  ;;  %v1397_v40 = vsub.f32 1.0, %v1365_v0  ;;  %v3289_v19 = vld [vmem:[#allocation48_spill] sm:$0xff] }
 0x115   : > { %1667 = vmatpush.msrb.mxu3 %v1591_v55  ;;  %v1191_v38 = vmul.f32 %v1159_v9, %v3282_v36  ;;  %v1526_v24 = vsub.f32 1.0, %v1494_v1  ;;  %v1078_v12 = vand.u32 2147483647, %v1046_v49  ;;  %v1062_v16 = vsub.f32 %v2310_v60, %v3279_v21  ;;  %v3290_v49 = vld [vmem:[#allocation47_spill] sm:$0xff] }
 0x116   : > { %1226 = vmatpush.msrb.mxu0 %v1175_v10  ;;  %v1574_v34 = vmul.f32 %v1542_v53, %v1413_v59  ;;  %v1429_v63 = vmax.f32 %v1397_v40, 0.0  ;;  %v1316_v30 = vsub.f32 %v2797_v54, %v3283_v45  ;;  %v1445_v15 = vsub.f32 %v2799_v7, %v3284_v4  ;;  %v3291_v40 = vld [vmem:[#allocation49_spill] sm:$0xff] }
 0x117   : > { %1267 = vmatpush.msrb.mxu1 %v1191_v38  ;;  %v1558_v37 = vmax.f32 %v1526_v24, 0.0  ;;  %v1110_v32 = vsub.f32 1.0, %v1078_v12  ;;  %v1094_v62 = vand.u32 2147483647, %v1062_v16  ;;  %v1332_v56 = vsub.f32 %v2797_v54, %v3285_v11  ;;  %v3292_v24 = vld [vmem:[#allocation45_spill] sm:$0xff] }
 0x118   : > { %1627 = vmatpush.msrb.mxu2 %v1574_v34  ;;  %v1348_v61 = vand.u32 2147483647, %v1316_v30  ;;  %v1477_v47 = vand.u32 2147483647, %v1445_v15  ;;  %v1461_v35 = vsub.f32 %v2799_v7, %v3286_v46  ;;  %v1045_v27 = vsub.f32 %v2310_v60, %v3283_v45 }
 0x119   : > { %v1590_v52 = vmul.f32 %v1558_v37, %v1429_v63  ;;  %v1142_v20 = vmax.f32 %v1110_v32, 0.0  ;;  %v1126_v58 = vsub.f32 1.0, %v1094_v62  ;;  %v1364_v6 = vand.u32 2147483647, %v1332_v56  ;;  %v3293_v62 = vld [vmem:[#allocation52_spill] sm:$0xff]  ;;  %v3294_v56 = vld [vmem:[#allocation46_spill] sm:$0xff] }
 0x11a   : > { %v1380_v26 = vsub.f32 1.0, %v1348_v61  ;;  %v1509_v17 = vsub.f32 1.0, %v1477_v47  ;;  %v1493_v33 = vand.u32 2147483647, %v1461_v35  ;;  %v1077_v51 = vand.u32 2147483647, %v1045_v27 }
 0x11b   : > { %1668 = vmatpush.msrb.mxu3 %v1590_v52  ;;  %v1174_v42 = vmul.f32 %v1142_v20, %v3287_v31  ;;  %v1158_v41 = vmax.f32 %v1126_v58, 0.0  ;;  %v1396_v48 = vsub.f32 1.0, %v1364_v6  ;;  %v1061_v21 = vsub.f32 %v2310_v60, %v3285_v11 }
 0x11c   : > { %v1412_v50 = vmax.f32 %v1380_v26, 0.0  ;;  %v1541_v28 = vmax.f32 %v1509_v17, 0.0  ;;  %v1525_v8 = vsub.f32 1.0, %v1493_v33  ;;  %v1109_v22 = vsub.f32 1.0, %v1077_v51  ;;  %v3295_v17 = vld [vmem:[#allocation50_spill] sm:$0xff] }
 0x11d   : > { %1227 = vmatpush.msrb.mxu0 %v1174_v42  ;;  %v1190_v13 = vmul.f32 %v1158_v41, %v3288_v23  ;;  %v1428_v3 = vmax.f32 %v1396_v48, 0.0  ;;  %v1093_v39 = vand.u32 2147483647, %v1061_v21  ;;  %v1315_v0 = vsub.f32 %v2797_v54, %v3289_v19 }
 0x11e   : > { %v1573_v55 = vmul.f32 %v1541_v28, %v1412_v50  ;;  %v1557_v9 = vmax.f32 %v1525_v8, 0.0  ;;  %v1141_v1 = vmax.f32 %v1109_v22, 0.0  ;;  %v1444_v29 = vsub.f32 %v2799_v7, %v3290_v49  ;;  %v3296_v28 = vld [vmem:[#allocation53_spill] sm:$0xff]  ;;  %v3297_v22 = vld [vmem:[#allocation51_spill] sm:$0xff] }
 0x11f   : > { %1268 = vmatpush.msrb.mxu1 %v1190_v13  ;;  %v1125_v10 = vsub.f32 1.0, %v1093_v39  ;;  %v1347_v59 = vand.u32 2147483647, %v1315_v0  ;;  %v1331_v53 = vsub.f32 %v2797_v54, %v2701_v57  ;;  %v1460_v36 = vsub.f32 %v2799_v7, %v3291_v40 }
 0x120   : > { %1628 = vmatpush.msrb.mxu2 %v1573_v55  ;;  %v1589_v38 = vmul.f32 %v1557_v9, %v1428_v3  ;;  %v1173_v12 = vmul.f32 %v1141_v1, %v3292_v24  ;;  %v1476_v16 = vand.u32 2147483647, %v1444_v29  ;;  %v1044_v34 = vsub.f32 %v2310_v60, %v3289_v19 }
 0x121   : > { %v1157_v63 = vmax.f32 %v1125_v10, 0.0  ;;  %v1379_v45 = vsub.f32 1.0, %v1347_v59  ;;  %v1363_v30 = vand.u32 2147483647, %v1331_v53  ;;  %v1492_v4 = vand.u32 2147483647, %v1460_v36 }
 0x122   : > { %1669 = vmatpush.msrb.mxu3 %v1589_v38  ;;  %1228 = vmatpush.msrb.mxu0 %v1173_v12  ;;  %v1508_v15 = vsub.f32 1.0, %v1476_v16  ;;  %v1076_v37 = vand.u32 2147483647, %v1044_v34  ;;  %v1060_v32 = vsub.f32 %v2310_v60, %v2701_v57  ;;  %v1314_v11 = vsub.f32 %v2797_v54, %v3293_v62  ;;  %v3298_v10 = vld [vmem:[#allocation55_spill] sm:$0xff]  ;;  %v3299_v34 = vld [vmem:[#allocation58_spill] sm:$0xff] }
 0x123   : > { %v1189_v61 = vmul.f32 %v1157_v63, %v3294_v56  ;;  %v1411_v47 = vmax.f32 %v1379_v45, 0.0  ;;  %v1395_v46 = vsub.f32 1.0, %v1363_v30  ;;  %v1524_v35 = vsub.f32 1.0, %v1492_v4  ;;  %v3300_v30 = vld [vmem:[#allocation57_spill] sm:$0xff] }
 0x124   : > { %v1540_v27 = vmax.f32 %v1508_v15, 0.0  ;;  %v1108_v52 = vsub.f32 1.0, %v1076_v37  ;;  %v1092_v20 = vand.u32 2147483647, %v1060_v32  ;;  %v1346_v58 = vand.u32 2147483647, %v1314_v11 }
 0x125   : > { %1269 = vmatpush.msrb.mxu1 %v1189_v61  ;;  %v1427_v6 = vmax.f32 %v1395_v46, 0.0  ;;  %v1556_v26 = vmax.f32 %v1524_v35, 0.0  ;;  %v1443_v33 = vsub.f32 %v2799_v7, %v3295_v17  ;;  %v1330_v57 = vsub.f32 %v2797_v54, %v2721_v25  ;;  %v3301_v46 = vld [vmem:[#allocation54_spill] sm:$0xff] }
 0x126   : > { %v1572_v51 = vmul.f32 %v1540_v27, %v1411_v47  ;;  %v1140_v31 = vmax.f32 %v1108_v52, 0.0  ;;  %v1124_v42 = vsub.f32 1.0, %v1092_v20  ;;  %v1378_v41 = vsub.f32 1.0, %v1346_v58  ;;  %v3302_v58 = vld [vmem:[#allocation56_spill] sm:$0xff] }
 0x127   : > { %v1588_v48 = vmul.f32 %v1556_v26, %v1427_v6  ;;  %v1475_v21 = vand.u32 2147483647, %v1443_v33  ;;  %v1362_v50 = vand.u32 2147483647, %v1330_v57  ;;  %v1459_v8 = vsub.f32 %v2799_v7, %v3296_v28 }
 0x128   : > { %1629 = vmatpush.msrb.mxu2 %v1572_v51  ;;  %v1172_v23 = vmul.f32 %v1140_v31, %v3297_v22  ;;  %v1156_v13 = vmax.f32 %v1124_v42, 0.0  ;;  %v1410_v3 = vmax.f32 %v1378_v41, 0.0  ;;  %v1043_v39 = vsub.f32 %v2310_v60, %v3293_v62 }
 0x129   : > { %1670 = vmatpush.msrb.mxu3 %v1588_v48  ;;  %v1507_v19 = vsub.f32 1.0, %v1475_v21  ;;  %v1394_v0 = vsub.f32 1.0, %v1362_v50  ;;  %v1491_v55 = vand.u32 2147483647, %v1459_v8  ;;  %v1059_v9 = vsub.f32 %v2310_v60, %v2721_v25 }
 0x12a   : > { %1229 = vmatpush.msrb.mxu0 %v1172_v23  ;;  %v1188_v1 = vmul.f32 %v1156_v13, %v2714_v2  ;;  %v1075_v49 = vand.u32 2147483647, %v1043_v39  ;;  %v1313_v29 = vsub.f32 %v2797_v54, %v2745_v44  ;;  %v1442_v59 = vsub.f32 %v2799_v7, %v3298_v10 }
 0x12b   : > { %v1539_v53 = vmax.f32 %v1507_v19, 0.0  ;;  %v1426_v40 = vmax.f32 %v1394_v0, 0.0  ;;  %v1523_v36 = vsub.f32 1.0, %v1491_v55  ;;  %v1091_v38 = vand.u32 2147483647, %v1059_v9 }
 0x12c   : > { %1270 = vmatpush.msrb.mxu1 %v1188_v1  ;;  %v1107_v24 = vsub.f32 1.0, %v1075_v49  ;;  %v1345_v12 = vand.u32 2147483647, %v1313_v29  ;;  %v1474_v16 = vand.u32 2147483647, %v1442_v59  ;;  %v1329_v25 = vsub.f32 %v2797_v54, %v3299_v34  ;;  %v3304_v49 = vld [vmem:[#allocation60_spill] sm:$0xff] }
 0x12d   : > { %v1571_v63 = vmul.f32 %v1539_v53, %v1410_v3  ;;  %v1555_v2 = vmax.f32 %v1523_v36, 0.0  ;;  %v1123_v45 = vsub.f32 1.0, %v1091_v38  ;;  %v1458_v4 = vsub.f32 %v2799_v7, %v3300_v30 }
 0x12e   : > { %v1139_v15 = vmax.f32 %v1107_v24, 0.0  ;;  %v1377_v37 = vsub.f32 1.0, %v1345_v12  ;;  %v1506_v32 = vsub.f32 1.0, %v1474_v16  ;;  %v1361_v62 = vand.u32 2147483647, %v1329_v25  ;;  %v1601_v25 = vld [vmem:[#allocation3 + $0x30] sm:$0xff] }
 0x12f   : > { %1630 = vmatpush.msrb.mxu2 %v1571_v63  ;;  %v1587_v11 = vmul.f32 %v1555_v2, %v1426_v40  ;;  %v1155_v56 = vmax.f32 %v1123_v45, 0.0  ;;  %v1490_v61 = vand.u32 2147483647, %v1458_v4  ;;  %v1042_v47 = vsub.f32 %v2310_v60, %v2745_v44  ;;  %v3303_v44 = vld [vmem:[#allocation59_spill] sm:$0xff]  ;;  %v3305_v40 = vld [vmem:[#allocation61_spill] sm:$0xff]  ;;  %v3306_v45 = vld [vmem:[#allocation62_spill] sm:$0xff] }
 0x130   : > { %v1171_v35 = vmul.f32 %v1139_v15, %v3301_v46  ;;  %v1409_v27 = vmax.f32 %v1377_v37, 0.0  ;;  %v1538_v52 = vmax.f32 %v1506_v32, 0.0  ;;  %v1393_v20 = vsub.f32 1.0, %v1361_v62  ;;  %v1202_v37 = vld [vmem:[#allocation3 + $0x28] sm:$0xff]  ;;  %v1603_v32 = vld [vmem:[#allocation3 + $0x70] sm:$0xff]  ;;  %v1203_v62 = vld [vmem:[#allocation3 + $0x60] sm:$0xff] }
 0x131   : > { %1671 = vmatpush.msrb.mxu3 %v1587_v11  ;;  %v1187_v6 = vmul.f32 %v1155_v56, %v3302_v58  ;;  %v1522_v26 = vsub.f32 1.0, %v1490_v61  ;;  %v1074_v17 = vand.u32 2147483647, %v1042_v47  ;;  %v1058_v33 = vsub.f32 %v2310_v60, %v3299_v34  ;;  %v1604_v11 = vld [vmem:[#allocation3 + $0x78] sm:$0xff]  ;;  %v1204_v56 = vld [vmem:[#allocation3 + $0x68] sm:$0xff]  ;;  %v1605_v61 = vld [vmem:[#allocation3 + $0xb0] sm:$0xff] }
 0x132   : > { %1230 = vmatpush.msrb.mxu0 %v1171_v35  ;;  %v1570_v57 = vmul.f32 %v1538_v52, %v1409_v27  ;;  %v1425_v51 = vmax.f32 %v1393_v20, 0.0  ;;  %v1312_v31 = vsub.f32 %v2797_v54, %v2770_v5  ;;  %v1441_v42 = vsub.f32 %v2799_v7, %v3303_v44  ;;  %v1205_v47 = vld [vmem:[#allocation3 + $0xa0] sm:$0xff]  ;;  %v1606_v46 = vld [vmem:[#allocation3 + $0xb8] sm:$0xff]  ;;  %v1206_v35 = vld [vmem:[#allocation3 + $0xa8] sm:$0xff] }
 0x133   : > { %1271 = vmatpush.msrb.mxu1 %v1187_v6  ;;  %v1554_v41 = vmax.f32 %v1522_v26, 0.0  ;;  %v1106_v48 = vsub.f32 1.0, %v1074_v17  ;;  %v1090_v21 = vand.u32 2147483647, %v1058_v33  ;;  %v1328_v50 = vsub.f32 %v2797_v54, %v2791_v18  ;;  %v1207_v27 = vld [vmem:[#allocation3 + $0xe0] sm:$0xff]  ;;  %v1608_v52 = vld [vmem:[#allocation3 + $0xf8] sm:$0xff] }
 0x134   : > { %1631 = vmatpush.msrb.mxu2 %v1570_v57  ;;  %v1344_v28 = vand.u32 2147483647, %v1312_v31  ;;  %v1473_v8 = vand.u32 2147483647, %v1441_v42  ;;  %v1457_v22 = vsub.f32 %v2799_v7, %v2778_v43  ;;  %v1041_v23 = vsub.f32 %v2310_v60, %v2770_v5  ;;  %v1208_v20 = vld [vmem:[#allocation3 + $0xe8] sm:$0xff]  ;;  %v1609_v58 = vld [vmem:[#allocation3 + $0x130] sm:$0xff] }
 0x135   : > { %v1586_v13 = vmul.f32 %v1554_v41, %v1425_v51  ;;  %v1138_v3 = vmax.f32 %v1106_v48, 0.0  ;;  %v1122_v39 = vsub.f32 1.0, %v1090_v21  ;;  %v1360_v19 = vand.u32 2147483647, %v1328_v50  ;;  %v1209_v57 = vld [vmem:[#allocation3 + $0x120] sm:$0xff]  ;;  %v1610_v51 = vld [vmem:[#allocation3 + $0x138] sm:$0xff] }
 0x136   : > { %v1376_v0 = vsub.f32 1.0, %v1344_v28  ;;  %v1505_v55 = vsub.f32 1.0, %v1473_v8  ;;  %v1489_v9 = vand.u32 2147483647, %v1457_v22  ;;  %v1073_v1 = vand.u32 2147483647, %v1041_v23 }
 0x137   : > { %1672 = vmatpush.msrb.mxu3 %v1586_v13  ;;  %v1170_v54 = vmul.f32 %v1138_v3, %v3304_v49  ;;  %v1154_v29 = vmax.f32 %v1122_v39, 0.0  ;;  %v1392_v10 = vsub.f32 1.0, %v1360_v19  ;;  %v1057_v59 = vsub.f32 %v2310_v60, %v2791_v18  ;;  %v1201_v60 = vld [vmem:[#allocation3 + $0x20] sm:$0xff]  ;;  %v1602_v18 = vld [vmem:[#allocation3 + $0x38] sm:$0xff]  ;;  %v1210_v31 = vld [vmem:[#allocation3 + $0x128] sm:$0xff] }
 0x138   : > { %v1408_v43 = vmax.f32 %v1376_v0, 0.0  ;;  %v1537_v7 = vmax.f32 %v1505_v55, 0.0  ;;  %v1521_v53 = vsub.f32 1.0, %v1489_v9  ;;  %v1105_v5 = vsub.f32 1.0, %v1073_v1  ;;  %v1611_v44 = vld [vmem:[#allocation3 + $0x170] sm:$0xff]  ;;  %v1211_v28 = vld [vmem:[#allocation3 + $0x160] sm:$0xff] }
 0x139   : > { %1231 = vmatpush.msrb.mxu0 %v1170_v54  ;;  %v1186_v36 = vmul.f32 %v1154_v29, %v3305_v40  ;;  %v1424_v38 = vmax.f32 %v1392_v10, 0.0  ;;  %v1089_v24 = vand.u32 2147483647, %v1057_v59  ;;  %v1612_v8 = vld [vmem:[#allocation3 + $0x178] sm:$0xff]  ;;  %v1212_v23 = vld [vmem:[#allocation3 + $0x168] sm:$0xff]  ;;  %v1613_v3 = vld [vmem:[#allocation3 + $0x1b0] sm:$0xff] }
 0x13a   : > { %v1569_v12 = vmul.f32 %v1537_v7, %v1408_v43  ;;  %v1553_v16 = vmax.f32 %v1521_v53, 0.0  ;;  %v1137_v34 = vmax.f32 %v1105_v5, 0.0  ;;  %v1213_v1 = vld [vmem:[#allocation3 + $0x1a0] sm:$0xff]  ;;  %v1614_v49 = vld [vmem:[#allocation3 + $0x1b8] sm:$0xff]  ;;  %v1214_v29 = vld [vmem:[#allocation3 + $0x1a8] sm:$0xff] }
 0x13b   : > { %1272 = vmatpush.msrb.mxu1 %v1186_v36  ;;  %v1121_v63 = vsub.f32 1.0, %v1089_v24  ;;  %v1615_v59 = vld [vmem:[#allocation3 + $0x1f0] sm:$0xff]  ;;  %v1215_v36 = vld [vmem:[#allocation3 + $0x1e0] sm:$0xff] }
 0x13c   : > { %1632 = vmatpush.msrb.mxu2 %v1569_v12  ;;  %v1585_v2 = vmul.f32 %v1553_v16, %v1424_v38  ;;  %v1169_v30 = vmul.f32 %v1137_v34, %v3306_v45  ;;  %v1616_v38 = vld [vmem:[#allocation3 + $0x1f8] sm:$0xff]  ;;  %v1216_v12 = vld [vmem:[#allocation3 + $0x1e8] sm:$0xff] }
 0x13d   : > { %v1153_v4 = vmax.f32 %v1121_v63, 0.0  ;;  %1633 = vmatmul.f32.vlgmr.msrb.gmra.mxu2 %v1601_v25 }
 0x13e   : > { %1673 = vmatpush.msrb.mxu3 %v1585_v2  ;;  %1232 = vmatpush.msrb.mxu0 %v1169_v30 }
 0x13f   : > { %v1185_v15 = vmul.f32 %v1153_v4, %v2808_v14  ;;  %1233 = vmatmul.f32.vlgmr.msrb.gmra.mxu0 %v1201_v60  ;;  %1674 = vmatmul.f32.vlgmr.msrb.gmra.mxu3 %v1602_v18  ;;  %v1607_v14 = vld [vmem:[#allocation3 + $0xf0] sm:$0xff] }
 0x141   : > { %1273 = vmatpush.msrb.mxu1 %v1185_v15 }
 0x142   : > { %1274 = vmatmul.f32.vlgmr.msrb.gmra.mxu1 %v1202_v37 }
 0x145   : > { %1636 = vmatmul.f32.gmra.mxu2 %v1603_v32 }
 0x147   : > { %1236 = vmatmul.f32.gmra.mxu0 %v1203_v62  ;;  %1677 = vmatmul.f32.gmra.mxu3 %v1604_v11 }
 0x14a   : > { %1277 = vmatmul.f32.gmra.mxu1 %v1204_v56  ;;  %v3025_v6 = vpop.f32.mrf.mxu0 }
 0x14d   : > { %1639 = vmatmul.f32.gmra.mxu2 %v1605_v61 }
 0x14f   : > { %1239 = vmatmul.f32.gmra.mxu0 %v1205_v47  ;;  %1680 = vmatmul.f32.gmra.mxu3 %v1606_v46 }
 0x150   : > { %v3029_v17 = vpop.f32.mrf.mxu2 }
 0x151   : > { %v3027_v26 = vpop.f32.mrf.mxu1 }
 0x152   : > { %1280 = vmatmul.f32.gmra.mxu1 %v1206_v35  ;;  %v897_v42 = vpop.f32.mrf.mxu0 }
 0x155   : > { %1642 = vmatmul.f32.gmra.mxu2 %v1607_v14 }
 0x157   : > { %1242 = vmatmul.f32.gmra.mxu0 %v1207_v27  ;;  %1683 = vmatmul.f32.gmra.mxu3 %v1608_v52  ;;  %v3031_v33 = vpop.f32.mrf.mxu3 }
 0x159   : > { %v938_v41 = vpop.f32.mrf.mxu1 }
 0x15a   : > { %1283 = vmatmul.f32.gmra.mxu1 %v1208_v20  ;;  %v939_v48 = vadd.f32 %v938_v41, %v897_v42  ;;  %v979_v21 = vpop.f32.mrf.mxu2  ;;  %v900_v39 = vpop.f32.mrf.mxu0 }
 0x15c   : > { %v980_v22 = vadd.f32 %v979_v21, %v939_v48 }
 0x15d   : > { %1645 = vmatmul.f32.gmra.mxu2 %v1609_v58 }
 0x15f   : > { %1245 = vmatmul.f32.gmra.mxu0 %v1209_v57  ;;  %1686 = vmatmul.f32.gmra.mxu3 %v1610_v51  ;;  %v1020_v50 = vpop.f32.mrf.mxu3  ;;  %v936_v51 = vadd.f32 %v3027_v26, %v3025_v6 }
 0x160   : > { %v3033_v13 = vadd.f32 %v1020_v50, %v980_v22 }
 0x161   : > { %v941_v19 = vpop.f32.mrf.mxu1 }
 0x162   : > { %1286 = vmatmul.f32.gmra.mxu1 %v1210_v31  ;;  %v942_v0 = vadd.f32 %v941_v19, %v900_v39  ;;  %v982_v55 = vpop.f32.mrf.mxu2 }
 0x163   : > { %v903_v43 = vpop.f32.mrf.mxu0 }
 0x164   : > { %v983_v54 = vadd.f32 %v982_v55, %v942_v0 }
 0x165   : > { %1648 = vmatmul.f32.gmra.mxu2 %v1611_v44  ;;  %v977_v44 = vadd.f32 %v3029_v17, %v936_v51 }
 0x167   : > { %1248 = vmatmul.f32.gmra.mxu0 %v1211_v28  ;;  %1689 = vmatmul.f32.gmra.mxu3 %v1612_v8  ;;  %v1023_v9 = vpop.f32.mrf.mxu3  ;;  %v1018_v21 = vadd.f32 %v3031_v33, %v977_v44 }
 0x168   : > { %v3035_v10 = vadd.f32 %v1023_v9, %v983_v54 }
 0x169   : > { %v944_v7 = vpop.f32.mrf.mxu1 }
 0x16a   : > { %1289 = vmatmul.f32.gmra.mxu1 %v1212_v23  ;;  %v945_v53 = vadd.f32 %v944_v7, %v903_v43  ;;  %v985_v5 = vpop.f32.mrf.mxu2 }
 0x16b   : > { %v3039_v34 = vpop.f32.mrf.mxu0 }
 0x16c   : > { %v986_v24 = vadd.f32 %v985_v5, %v945_v53 }
 0x16d   : > { %1651 = vmatmul.f32.gmra.mxu2 %v1613_v3 }
 0x16f   : > { %1251 = vmatmul.f32.gmra.mxu0 %v1213_v1  ;;  %1692 = vmatmul.f32.gmra.mxu3 %v1614_v49  ;;  %v1026_v40 = vpop.f32.mrf.mxu3 }
 0x170   : > { %v3037_v16 = vadd.f32 %v1026_v40, %v986_v24 }
 0x172   : > { %1292 = vmatmul.f32.gmra.mxu1 %v1214_v29  ;;  %v3041_v25 = vpop.f32.mrf.mxu1  ;;  %v3043_v63 = vpop.f32.mrf.mxu2 }
 0x173   : > { %v909_v45 = vpop.f32.mrf.mxu0 }
 0x175   : > { %1654 = vmatmul.f32.gmra.mxu2 %v1615_v59 }
 0x177   : > { %1254 = vmatmul.f32.gmra.mxu0 %v1215_v36  ;;  %1695 = vmatmul.f32.gmra.mxu3 %v1616_v38  ;;  %v3045_v2 = vpop.f32.mrf.mxu3 }
 0x17a   : > { %1295 = vmatmul.f32.gmra.mxu1 %v1216_v12  ;;  %v950_v30 = vpop.f32.mrf.mxu1 }
 0x17b   : > { %v951_v60 = vadd.f32 %v950_v30, %v909_v45  ;;  %v991_v18 = vpop.f32.mrf.mxu2  ;;  %v912_v32 = vpop.f32.mrf.mxu0 }
 0x17d   : > { %v992_v15 = vadd.f32 %v991_v18, %v951_v60 }
 0x17f   : > { %v1032_v4 = vpop.f32.mrf.mxu3 }
 0x180   : > { %v3047_v37 = vadd.f32 %v1032_v4, %v992_v15  ;;  %v948_v15 = vadd.f32 %v3041_v25, %v3039_v34 }
 0x182   : > { %v953_v62 = vpop.f32.mrf.mxu1 }
 0x183   : > { %v954_v11 = vadd.f32 %v953_v62, %v912_v32  ;;  %v994_v56 = vpop.f32.mrf.mxu2 }
 0x184   : > { %v915_v35 = vpop.f32.mrf.mxu0 }
 0x185   : > { %v995_v47 = vadd.f32 %v994_v56, %v954_v11 }
 0x187   : > { %v1035_v61 = vpop.f32.mrf.mxu3 }
 0x188   : > { %v3049_v46 = vadd.f32 %v1035_v61, %v995_v47  ;;  %v989_v61 = vadd.f32 %v3043_v63, %v948_v15 }
 0x18a   : > { %v956_v14 = vpop.f32.mrf.mxu1  ;;  %v1030_v34 = vadd.f32 %v3045_v2, %v989_v61 }
 0x18b   : > { %v957_v27 = vadd.f32 %v956_v14, %v915_v35  ;;  %v997_v52 = vpop.f32.mrf.mxu2 }
 0x18d   : > { %v998_v20 = vadd.f32 %v997_v52, %v957_v27 }
 0x18f   : > { %v1038_v58 = vpop.f32.mrf.mxu3 }
 0x190   : > { %v3051_v57 = vadd.f32 %v1038_v58, %v998_v20 }
 0x1bc   : > { %v1234_v31 = vpop.f32.mrf.mxu0 }
 0x1bf   : > { %v1275_v42 = vpop.f32.mrf.mxu1 }
 0x1c0   : > { %v1276_v41 = vadd.f32 %v1275_v42, %v1234_v31  ;;  %v1634_v48 = vpop.f32.mrf.mxu2 }
 0x1c2   : > { %v1675_v50 = vpop.f32.mrf.mxu3  ;;  %v1299_v28 = vadd.f32 %v1276_v41, %v1018_v21 }
 0x1c3   : > { %v1676_v8 = vadd.f32 %v1675_v50, %v1634_v48 }
 0x1c4   : > { %v1237_v22 = vpop.f32.mrf.mxu0 }
 0x1c5   : > { %v1699_v23 = vadd.f32 %v1676_v8, %v1299_v28 }
 0x1c7   : > { %v1707_v3 = vmul.f32 10.0, %v1699_v23  ;;  %v1278_v39 = vpop.f32.mrf.mxu1 }
 0x1c8   : > { %v1637_v19 = vpop.f32.mrf.mxu2  ;;  %v1279_v1 = vadd.f32 %v1278_v39, %v1237_v22 }
 0x1c9   : > { %v1708_v0 = vrot.slane %v1707_v3, 4 }
 0x1ca   : > { %v1678_v55 = vpop.f32.mrf.mxu3  ;;  %v1300_v43 = vadd.f32 %v1279_v1, %v3033_v13 }
 0x1cb   : > { %v1709_v9 = vmax.f32 %v1707_v3, %v1708_v0  ;;  %v1679_v49 = vadd.f32 %v1678_v55, %v1637_v19 }
 0x1cc   : > { %v1240_v6 = vpop.f32.mrf.mxu0 }
 0x1cd   : > { %v1710_v26 = vrot.slane %v1709_v9, 2  ;;  %v3058_v5 = vadd.f32 %v1679_v49, %v1300_v43 }
 0x1cf   : > { %v1711_v17 = vmax.f32 %v1709_v9, %v1710_v26  ;;  %v1281_v54 = vpop.f32.mrf.mxu1  ;;  %v1728_v30 = vmul.f32 %v3058_v5, %v3058_v5 }
 0x1d0   : > { %v1282_v29 = vadd.f32 %v1281_v54, %v1240_v6  ;;  %v1640_v59 = vpop.f32.mrf.mxu2 }
 0x1d1   : > { %v1712_v33 = vrot.slane %v1711_v17, 1 }
 0x1d2   : > { %v1681_v7 = vpop.f32.mrf.mxu3  ;;  %v1301_v40 = vadd.f32 %v1282_v29, %v3035_v10 }
 0x1d3   : > { %v1713_v53 = vmax.f32 %v1711_v17, %v1712_v33  ;;  %v1682_v36 = vadd.f32 %v1681_v7, %v1640_v59 }
 0x1d4   : > { %v1243_v38 = vpop.f32.mrf.mxu0 }
 0x1d5   : > { %v1714_v24 = vsub.f32 %v1707_v3, %v1713_v53  ;;  %v3061_v12 = vadd.f32 %v1682_v36, %v1301_v40 }
 0x1d7   : > { %v1715_v45 = vmul.f32 1.442695, %v1714_v24  ;;  %v1729_v60 = vmul.f32 %v3061_v12, %v3061_v12  ;;  %v1284_v18 = vpop.f32.mrf.mxu1 }
 0x1d8   : > { %v1285_v13 = vadd.f32 %v1284_v18, %v1243_v38  ;;  %v1643_v4 = vpop.f32.mrf.mxu2 }
 0x1d9   : > { %2087 = vpow2.f32 %v1715_v45  ;;  %v1730_v10 = vadd.f32 %v1729_v60, %v1728_v30 }
 0x1da   : > { %v1684_v32 = vpop.f32.mrf.mxu3  ;;  %v1302_v62 = vadd.f32 %v1285_v13, %v3037_v16 }
 0x1db   : > { %v1685_v11 = vadd.f32 %v1684_v32, %v1643_v4 }
 0x1dc   : > { %v1246_v56 = vpop.f32.mrf.mxu0 }
 0x1dd   : > { %v3071_v47 = vadd.f32 %v1685_v11, %v1302_v62 }
 0x1df   : > { %v2088_v35 = vpop.eup %2087  ;;  %v1731_v14 = vmul.f32 %v3071_v47, %v3071_v47  ;;  %v1287_v27 = vpop.f32.mrf.mxu1 }
 0x1e0   : > { %v1717_v52 = vrot.slane %v2088_v35, 4  ;;  %v1288_v20 = vadd.f32 %v1287_v27, %v1246_v56  ;;  %v1646_v58 = vpop.f32.mrf.mxu2 }
 0x1e1   : > { %v1732_v25 = vadd.f32 %v1731_v14, %v1730_v10 }
 0x1e2   : > { %v1718_v51 = vadd.f32 %v2088_v35, %v1717_v52  ;;  %v1687_v31 = vpop.f32.mrf.mxu3  ;;  %v1303_v16 = vadd.f32 %v1288_v20, %v1030_v34 }
 0x1e3   : > { %v1688_v44 = vadd.f32 %v1687_v31, %v1646_v58 }
 0x1e4   : > { %v1719_v42 = vrot.slane %v1718_v51, 2  ;;  %v1249_v41 = vpop.f32.mrf.mxu0 }
 0x1e5   : > { %v1703_v63 = vadd.f32 %v1688_v44, %v1303_v16 }
 0x1e6   : > { %v1720_v48 = vadd.f32 %v1719_v42, %v1718_v51 }
 0x1e7   : > { %v1733_v21 = vmul.f32 %v1703_v63, %v1703_v63  ;;  %v1290_v50 = vpop.f32.mrf.mxu1 }
 0x1e8   : > { %v1721_v28 = vrot.slane %v1720_v48, 1  ;;  %v1649_v8 = vpop.f32.mrf.mxu2  ;;  %v1291_v29 = vadd.f32 %v1290_v50, %v1249_v41 }
 0x1e9   : > { %v1734_v22 = vadd.f32 %v1733_v21, %v1732_v25 }
 0x1ea   : > { %v1722_v23 = vadd.f32 %v1721_v28, %v1720_v48  ;;  %v1690_v3 = vpop.f32.mrf.mxu3  ;;  %v1304_v30 = vadd.f32 %v1291_v29, %v3047_v37 }
 0x1eb   : > { %v1735_v39 = vmax.f32 %v1734_v22, 1e-24  ;;  %v1691_v53 = vadd.f32 %v1690_v3, %v1649_v8 }
 0x1ec   : > { %2089 = vrcp.f32 %v1722_v23  ;;  %v1252_v19 = vpop.f32.mrf.mxu0 }
 0x1ed   : > { %2091 = vrsqrt.f32 %v1735_v39  ;;  %vm1742_vm1 = vweird.f32 %v1735_v39  ;;  %v1704_v10 = vadd.f32 %v1691_v53, %v1304_v30 }
 0x1ef   : > { %v1293_v2 = vpop.f32.mrf.mxu1 }
 0x1f0   : > { %v1652_v0 = vpop.f32.mrf.mxu2  ;;  %v1294_v59 = vadd.f32 %v1293_v2, %v1252_v19 }
 0x1f2   : > { %v2090_v55 = vpop.eup %2089  ;;  %v1693_v9 = vpop.f32.mrf.mxu3  ;;  %v1305_v60 = vadd.f32 %v1294_v59, %v3049_v46  ;;  %v2094_v59 = vld [vmem:[%s2239_s8] sm:$0xff] }
 0x1f3   : > { %v2092_v6 = vpop.eup %2091  ;;  %v1724_v26 = vmul.f32 %v2090_v55, %v1722_v23  ;;  %v1694_v40 = vadd.f32 %v1693_v9, %v1652_v0 }
 0x1f4   : > { %v1737_v1 = vmul.f32 %v2092_v6, %v1735_v39  ;;  %v1255_v49 = vpop.f32.mrf.mxu0  ;;  %vm1743_vm0 = vweird.f32 %v2092_v6 }
 0x1f5   : > { %v1725_v17 = vsub.f32 2.0, %v1724_v26  ;;  %v1705_v32 = vadd.f32 %v1694_v40, %v1305_v60  ;;  %vm1744_vm2 = vmor %vm1742_vm1, %vm1743_vm0 }
 0x1f6   : > { %v1738_v54 = vmul.f32 %v2092_v6, %v1737_v1 }
 0x1f7   : > { %v1726_v33 = vmul.f32 %v2090_v55, %v1725_v17  ;;  %v1296_v43 = vpop.f32.mrf.mxu1 }
 0x1f8   : > { %v1739_v7 = vmul.f32 0.5, %v1738_v54  ;;  %v1297_v36 = vadd.f32 %v1296_v43, %v1255_v49  ;;  %v1655_v38 = vpop.f32.mrf.mxu2 }
 0x1f9   : > { %v1727_v24 = vmul.f32 %v2088_v35, %v1726_v33 }
 0x1fa   : > { %v1740_v45 = vsub.f32 1.5, %v1739_v7  ;;  %v1696_v18 = vpop.f32.mrf.mxu3  ;;  %v1306_v13 = vadd.f32 %v1297_v36, %v3051_v57 }
 0x1fb   : > { %v1697_v4 = vadd.f32 %v1696_v18, %v1655_v38  ;;  %1916 = vst [vmem:[%s3080_s9] sm:$0xff] %v1727_v24  ;;  %v1775_v56 = vmul.f32 %v1727_v24, %v1704_v10  ;;  %v1782_v61 = vmul.f32 %v1727_v24, %v1705_v32 }
 0x1fc   : > { %v1741_v15 = vmul.f32 %v2092_v6, %v1740_v45 }
 0x1fd   : > { %v1706_v62 = vadd.f32 %v1697_v4, %v1306_v13  ;;  %v1776_v52 = vrot.slane %v1775_v56, 4  ;;  %v1783_v20 = vrot.slane %v1782_v61, 4 }
 0x1fe   : > { %v1745_v11 = vsel %vm1744_vm2, %v2092_v6, %v1741_v15 }
 0x1ff   : > { %v1746_v37 = vmul.f32 %v1745_v11, %v1727_v24  ;;  %v1789_v35 = vmul.f32 %v1727_v24, %v1706_v62  ;;  %v1777_v48 = vadd.f32 %v1776_v52, %v1775_v56  ;;  %v1784_v21 = vadd.f32 %v1783_v20, %v1782_v61 }
 0x201   : > { %v1747_v46 = vmul.f32 %v1746_v37, %v3058_v5  ;;  %v1754_v57 = vmul.f32 %v1746_v37, %v3061_v12  ;;  %v1761_v14 = vmul.f32 %v1746_v37, %v3071_v47  ;;  %v1768_v27 = vmul.f32 %v1746_v37, %v1703_v63 }
 0x202   : > { %v1790_v31 = vrot.slane %v1789_v35, 4  ;;  %v1778_v3 = vrot.slane %v1777_v48, 2  ;;  %v1785_v39 = vrot.slane %v1784_v21, 2 }
 0x203   : > { %v1748_v58 = vrot.slane %v1747_v46, 4  ;;  %v1755_v34 = vrot.slane %v1754_v57, 4  ;;  %v1762_v25 = vrot.slane %v1761_v14, 4  ;;  %v1769_v51 = vrot.slane %v1768_v27, 4 }
 0x204   : > { %v1791_v8 = vadd.f32 %v1790_v31, %v1789_v35  ;;  %v3086_v49 = vadd.f32 %v1778_v3, %v1777_v48  ;;  %v3088_v54 = vadd.f32 %v1785_v39, %v1784_v21 }
 0x205   : > { %v1749_v16 = vadd.f32 %v1748_v58, %v1747_v46  ;;  %v1756_v44 = vadd.f32 %v1755_v34, %v1754_v57  ;;  %v1763_v42 = vadd.f32 %v1762_v25, %v1761_v14  ;;  %v1770_v41 = vadd.f32 %v1769_v51, %v1768_v27 }
 0x206   : > { %v1792_v9 = vrot.slane %v1791_v8, 2  ;;  %v1780_v60 = vrot.slane %v3086_v49, 1  ;;  %v1787_v18 = vrot.slane %v3088_v54, 1 }
 0x207   : > { %v1750_v50 = vrot.slane %v1749_v16, 2  ;;  %v1757_v5 = vrot.slane %v1756_v44, 2  ;;  %v1764_v28 = vrot.slane %v1763_v42, 2  ;;  %v1771_v12 = vrot.slane %v1770_v41, 2 }
 0x208   : > { %v1793_v53 = vadd.f32 %v1792_v9, %v1791_v8 }
 0x209   : > { %v1751_v47 = vadd.f32 %v1750_v50, %v1749_v16  ;;  %v1758_v63 = vadd.f32 %v1757_v5, %v1756_v44  ;;  %v1765_v22 = vadd.f32 %v1764_v28, %v1763_v42  ;;  %v1772_v23 = vadd.f32 %v1771_v12, %v1770_v41 }
 0x20a   : > { %v1794_v46 = vrot.slane %v1793_v53, 1 }
 0x20b   : > { %v1752_v19 = vrot.slane %v1751_v47, 1  ;;  %v1759_v2 = vrot.slane %v1758_v63, 1  ;;  %v1766_v0 = vrot.slane %v1765_v22, 1  ;;  %v1773_v55 = vrot.slane %v1772_v23, 1 }
 0x20d   : > { %v1753_v6 = vadd.f32 %v1752_v19, %v1751_v47  ;;  %v1760_v26 = vadd.f32 %v1759_v2, %v1758_v63  ;;  %v1767_v1 = vadd.f32 %v1766_v0, %v1765_v22  ;;  %v1774_v17 = vadd.f32 %v1773_v55, %v1772_v23 }
 0x20f   : > { %v1796_v29 = vsub.f32 0.0, %v1760_v26  ;;  %v1798_v33 = vmul.f32 %v2094_v59, %v1767_v1  ;;  %v1803_v43 = vmul.f32 %v2094_v59, %v1774_v17  ;;  %v1815_v7 = vmul.f32 %v2094_v59, %v1760_v26 }
 0x210   : > { %v1808_v38 = vmul.f32 %v2094_v59, %v1753_v6 }
 0x211   : > { %v1797_v40 = vmul.f32 %v2094_v59, %v1796_v29  ;;  %v1800_v36 = vrot.slane %v1798_v33, 1  ;;  %v1809_v24 = vrot.slane %v1798_v33, 2  ;;  %v1817_v45 = vrot.slane %v1815_v7, 1 }
 0x212   : > { %v1823_v30 = vrot.slane %v1815_v7, 7  ;;  %v1805_v4 = vrot.slane %v1803_v43, 2  ;;  %v1812_v10 = vrot.slane %v1803_v43, 1  ;;  %v1820_v62 = vrot.slane %v1803_v43, 7 }
 0x213   : > { %v1802_v13 = vsub.f32 %v1797_v40, %v1800_v36  ;;  %v1811_v15 = vadd.f32 %v1809_v24, %v1808_v38  ;;  %v1819_v32 = vsub.f32 %v1808_v38, %v1817_v45  ;;  %v1826_v56 = vrot.slane %v1798_v33, 6 }
 0x214   : > { %v1825_v11 = vadd.f32 %v1823_v30, %v1808_v38  ;;  %v1877_v35 = vrot.slane %v1803_v43, 5  ;;  %v1870_v12 = vrot.slane %v1803_v43, 3  ;;  %v1781_v59 = vadd.f32 %v1780_v60, %v3086_v49 }
 0x215   : > { %v1807_v61 = vsub.f32 %v1802_v13, %v1805_v4  ;;  %v1814_v37 = vsub.f32 %v1811_v15, %v1812_v10  ;;  %v1822_v57 = vadd.f32 %v1820_v62, %v1819_v32  ;;  %v1875_v27 = vadd.f32 %v1826_v56, %v1819_v32 }
 0x216   : > { %v1873_v14 = vadd.f32 %v1825_v11, %v1809_v24  ;;  %v1828_v52 = vsub.f32 %v1825_v11, %v1826_v56  ;;  %v1869_v19 = vsub.f32 %v1819_v32, %v1809_v24  ;;  %v1795_v7 = vadd.f32 %v1794_v46, %v1793_v53 }
 0x217   : > { %v1829_v20 = vsub.f32 0.0, %v1807_v61  ;;  %v1844_v58 = vmul.f32 %v1814_v37, %v1774_v17  ;;  %v1831_v34 = vmul.f32 %v1814_v37, %v1753_v6  ;;  %v1857_v25 = vmul.f32 %v1814_v37, %v1767_v1 }
 0x218   : > { %v1833_v51 = vmul.f32 %v1822_v57, %v1774_v17  ;;  %v1874_v31 = vsub.f32 %v1873_v14, %v1812_v10  ;;  %v1876_v16 = vadd.f32 %v1875_v27, %v1820_v62  ;;  %v1838_v44 = vmul.f32 %v1828_v52, %v1767_v1 }
 0x219   : > { %v1856_v42 = vmul.f32 %v1829_v20, %v1774_v17  ;;  %v1830_v41 = vmul.f32 %v1829_v20, %v1760_v26  ;;  %v1843_v48 = vmul.f32 %v1829_v20, %v1767_v1  ;;  %v1846_v21 = vmul.f32 %v1822_v57, %v1753_v6 }
 0x21a   : > { %v1835_v50 = vrot.slane %v1833_v51, 1  ;;  %v1851_v5 = vmul.f32 %v1828_v52, %v1760_v26  ;;  %v1859_v28 = vmul.f32 %v1822_v57, %v1760_v26  ;;  %v1840_v23 = vrot.slane %v1838_v44, 2 }
 0x21b   : > { %v1832_v8 = vadd.f32 %v1831_v34, %v1830_v41  ;;  %v1845_v47 = vadd.f32 %v1844_v58, %v1843_v48  ;;  %v1848_v63 = vrot.slane %v1846_v21, 1  ;;  %v1858_v22 = vsub.f32 %v1856_v42, %v1857_v25 }
 0x21c   : > { %v1861_v3 = vrot.slane %v1859_v28, 1  ;;  %v1864_v39 = vmul.f32 %v1828_v52, %v1753_v6  ;;  %v1853_v55 = vrot.slane %v1851_v5, 2  ;;  %v1879_v9 = vadd.f32 %v1877_v35, %v1828_v52  ;;  %v1957_v35 = vld [vmem:[%s3080_s9] sm:$0xff] (%p2207_p5) }
 0x21d   : > { %v1837_v2 = vsub.f32 %v1832_v8, %v1835_v50  ;;  %v1850_v0 = vadd.f32 %v1848_v63, %v1845_v47  ;;  %v1872_v1 = vsub.f32 %v1869_v19, %v1870_v12  ;;  %v1788_v26 = vadd.f32 %v1787_v18, %v3088_v54  ;;  %1958 = vst [vmem:[%s1926_s17] sm:$0xff] (%p2207_p5), %v1957_v35 }
 0x21e   : > { %v1863_v17 = vadd.f32 %v1861_v3, %v1858_v22  ;;  %v1866_v29 = vrot.slane %v1864_v39, 2  ;;  %v2156_v6 = vmov 1.0  }
 0x21f   : > { %v1842_v33 = vadd.f32 %v1840_v23, %v1837_v2  ;;  %v1855_v43 = vsub.f32 %v1850_v0, %v1853_v55  ;;  %vm1880_vm3 = vcmp.lt.f32.partialorder %v1872_v1, 0.0 }
 0x220   : > { %v1868_v40 = vadd.f32 %v1866_v29, %v1863_v17  ;;  %v1881_v24 = vsel %vm1880_vm3, -1.0, %v2156_v6 }
 0x221   : > { %v1882_v36 = vadd.f32 %v1842_v33, %v1781_v59  ;;  %v1883_v38 = vadd.f32 %v1855_v43, %v1788_v26  ;;  %v1887_v30 = vrot.slane %v1881_v24, 7  ;;  %v1890_v13 = vrot.slane %v1881_v24, 6 }
 0x222   : > { %v1884_v45 = vadd.f32 %v1868_v40, %v1795_v7  ;;  %v1893_v15 = vrot.slane %v1881_v24, 5  ;;  %v1885_v53 = vmul.f32 %v1881_v24, %v1872_v1 }
 0x223   : > { %v1897_v4 = vrot.slane %v1883_v38, 7  ;;  %v1889_v10 = vmul.f32 %v1887_v30, %v1874_v31  ;;  %v1892_v49 = vmul.f32 %v1890_v13, %v1876_v16 }
 0x224   : > { %v1900_v60 = vrot.slane %v1884_v45, 6  ;;  %v1895_v18 = vmul.f32 %v1893_v15, %v1879_v9 }
 0x225   : > { %v1903_v54 = vsel %vm1902_vm4, %v1882_v36, %v1897_v4 }
 0x226   : > { %v1905_v32 = vsel %vm1904_vm5, %v1903_v54, %v1900_v60 }
 0x227   : > { %v1907_v62 = vsel %vm1906_vm6, %v1905_v32, %v1885_v53 }
 0x228   : > { %v1909_v11 = vsel %vm1908_vm7, %v1907_v62, %v1889_v10  ;;  %1924 = sbr.rel (!%p2207_p5) target bundleno = 565 (0x235), region = 74 }
 0x229   : > { %v1911_v56 = vsel %vm1910_vm8, %v1909_v11, %v1892_v49 }
 0x22a   : > { %v1913_v61 = vsel %vm1912_vm9, %v1911_v56, %v1895_v18 }
 0x22b   : > { %v1915_v37 = vsel %vm1914_vm10, %v1913_v61, 0.0 }
 0x22c   : > { %1917 = vst [vmem:[%s3080_s9 + $0x8] sm:$0xff] %v1915_v37 }
 0x233   : > { %v1959_v46 = vld [vmem:[%s3080_s9 + $0x8] sm:$0xff] }
 0x234   : > { %1960 = vst [vmem:[%s1926_s17 + $0x10] sm:$0xff] %v1959_v46 }
 0x235 PF: > { %p10_p13 = scmp.ge.s32.totalorder %s2191_s13, 4   ;;  %s3307_s9 = smov %s2147_s10 }
 0x236   : > { %s3308_s10 = smov %s2201_s16  ;;  %s3309_s11 = smov %s2191_s13 }
 0x237   :  { %12 = sbr.rel (!%p10_p13) target bundleno = 2 (0x2), region = 144 }
 0x23c   :  { %1976 = vsyncpa [#allocation4], 1 }
 0x23d   :  { %1978 = vsyncpa [#allocation4 + $0x1], 1 }

</bundles_post_ra>
